<compile_context>
chip_gen: v5e
topology: v5e:2x2
jax: 0.10.0
libtpu: 0.0.40
codegen_flags: <defaults>
</compile_context>

<pallas_src>
import functools

import jax
import jax.numpy as jnp
from jax.experimental import pallas as pl
from jax.experimental.pallas import tpu as pltpu

LANE = 128


def _round_up(x, m):
    return ((x + m - 1) // m) * m


# ---------------------------------------------------------------------------
# Kernel 1: Conv3x3(pad=1) + folded BN + ReLU + MaxPool2d(2), fully fused.
# ---------------------------------------------------------------------------
def _conv_bn_relu_pool_kernel(xe_ref, xo_ref, w_ref, scale_ref, bias_ref, o_ref,
                              *, H, Wq, Wh):
    """One image per grid step.

    xe_ref / xo_ref : (1, (H+3)*Wq, Cin)  bf16  even/odd padded-column planes, flattened
                      row-major over (padded_row, column_cell);  Wq % 8 == 0.
    w_ref           : (9, Cin, Cout)      bf16  conv taps, k = di*3 + dj.
    scale_ref/bias_ref : (1, Cout)        f32   folded BatchNorm (+ conv bias).
    o_ref           : (1, H//2, Wh, Cout) bf16  max-pooled activation.
    """
    M = H * Wq                               # rows of the wide conv output (incl. pad cols)
    cout = w_ref.shape[-1]
    scale = scale_ref[...]                   # (1, Cout) f32
    bias = bias_ref[...]

    pooled = None
    for b in (0, 1):                         # output-column parity: w_out = 2*w' + b
        acc = jnp.zeros((M, cout), jnp.float32)
        for di in range(3):
            for dj in range(3):
                parity = (b + dj) % 2
                delta = (b + dj) // 2
                off = di * Wq + delta        # static Python int
                src = xe_ref if parity == 0 else xo_ref
                xs = src[0, off:off + M, :]  # (M, Cin) bf16, contiguous slice
                acc += jnp.dot(xs, w_ref[di * 3 + dj],
                               preferred_element_type=jnp.float32)
        y = jnp.maximum(acc * scale + bias, 0.0)            # BN + ReLU epilogue (f32)
        pooled = y if pooled is None else jnp.maximum(pooled, y)  # pool over W pairs

    t = pooled.reshape(H, Wq, cout)                          # layout no-op (Wq % 8 == 0)
    t = jnp.max(t.reshape(H // 2, 2, Wq, cout), axis=1)      # pool over H pairs
    o_ref[0] = t[:, :Wh, :].astype(o_ref.dtype)              # drop padded garbage columns


def conv_bn_relu_pool(x_nhwc, w, scale, bias):
    """(N,H,W,Cin) bf16 -> (N,H//2,W//2,Cout) bf16.  Assumes H and W even (MaxPool2d(2))."""
    n, h, wdt, cin = x_nhwc.shape
    cout = w.shape[-1]
    hh, wh = h // 2, wdt // 2
    wq = _round_up(wh + 1, 8)                # column cells per row, padded to sublane mult
    lp = (h + 3) * wq                        # flat rows per parity plane

    # Glue (cheap, ~1x activation size): pad spatially (1 top / 2 bottom rows, 1 col each
    # side), split padded columns into even/odd planes, pad cells to wq, flatten rows.
    xp = jnp.pad(x_nhwc, ((0, 0), (1, 2), (1, 1), (0, 0)))
    xe = xp[:, :, 0::2, :]
    xo = xp[:, :, 1::2, :]
    pad_cells = wq - xe.shape[2]
    xe = jnp.pad(xe, ((0, 0), (0, 0), (0, pad_cells), (0, 0))).reshape(n, lp, cin)
    xo = jnp.pad(xo, ((0, 0), (0, 0), (0, pad_cells), (0, 0))).reshape(n, lp, cin)

    kern = functools.partial(_conv_bn_relu_pool_kernel, H=h, Wq=wq, Wh=wh)
    flops = 2 * n * 18 * (h * wq) * cin * cout
    bytes_accessed = (2 * n * lp * cin + 9 * cin * cout + n * hh * wh * cout) * 2 \
        + 2 * cout * 4

    return pl.pallas_call(
        kern,
        out_shape=jax.ShapeDtypeStruct((n, hh, wh, cout), jnp.bfloat16),
        grid=(n,),
        in_specs=[
            pl.BlockSpec((1, lp, cin), lambda i: (i, 0, 0)),
            pl.BlockSpec((1, lp, cin), lambda i: (i, 0, 0)),
            pl.BlockSpec((9, cin, cout), lambda i: (0, 0, 0)),   # weights stay resident
            pl.BlockSpec((1, cout), lambda i: (0, 0)),           # scale resident
            pl.BlockSpec((1, cout), lambda i: (0, 0)),           # bias resident
        ],
        out_specs=pl.BlockSpec((1, hh, wh, cout), lambda i: (i, 0, 0, 0)),
        compiler_params=pltpu.CompilerParams(
            dimension_semantics=("parallel",),   # batch axis -> both TCs on v7x
            vmem_limit_bytes=32 * 1024 * 1024,
        ),
        cost_estimate=pl.CostEstimate(flops=flops, transcendentals=0,
                                      bytes_accessed=bytes_accessed),
    )(xe, xo, w, scale, bias)


# ---------------------------------------------------------------------------
# Kernel 2: AdaptiveAvgPool2d((4,4)) + flatten + Linear, fused.
# ---------------------------------------------------------------------------
def _avgpool_fc_kernel(x_ref, w_ref, b_ref, o_ref):
    """Grid = spatial positions; the average pool is folded into the weights.

    x_ref : (1, N, C)    bf16  activations at spatial position k.
    w_ref : (1, C, NCp)  bf16  pool-folded FC weight slice for position k.
    b_ref : (1, NCp)     f32   FC bias (lane-padded).
    o_ref : (N, NCp)     f32   logits, accumulated across the grid (resident in VMEM).
    """
    k = pl.program_id(0)
    contrib = jnp.dot(x_ref[0], w_ref[0], preferred_element_type=jnp.float32)

    @pl.when(k == 0)
    def _():
        o_ref[...] = b_ref[...] + contrib

    @pl.when(k != 0)
    def _():
        o_ref[...] = o_ref[...] + contrib


def avgpool_flatten_fc(x_nhwc, fc_w, fc_b):
    """x (N,H2,W2,C) bf16, fc_w (4,4,C,NCp) f32, fc_b (1,NCp) f32 -> (N,NCp) f32."""
    n, h2, w2, c = x_nhwc.shape
    fh, fw = h2 // 4, w2 // 4
    ncp = fc_w.shape[-1]
    # TODO(synk): PyTorch's uneven-window AdaptiveAvgPool2d (H or W not divisible by 4)
    #             is not implemented; only the evenly-divisible case is handled.
    # Fold the average pool into the FC weights:  logits = sum_{h,w} x[:,h,w,:] @ Wf[h,w]
    w_fold = jnp.repeat(jnp.repeat(fc_w, fh, axis=0), fw, axis=1) / float(fh * fw)
    w_fold = w_fold.reshape(h2 * w2, c, ncp).astype(jnp.bfloat16)
    x_sp = jnp.transpose(x_nhwc.reshape(n, h2 * w2, c), (1, 0, 2))  # (H2*W2, N, C)

    return pl.pallas_call(
        _avgpool_fc_kernel,
        out_shape=jax.ShapeDtypeStruct((n, ncp), jnp.float32),
        grid=(h2 * w2,),
        in_specs=[
            pl.BlockSpec((1, n, c), lambda k: (k, 0, 0)),
            pl.BlockSpec((1, c, ncp), lambda k: (k, 0, 0)),
            pl.BlockSpec((1, ncp), lambda k: (0, 0)),            # bias resident
        ],
        out_specs=pl.BlockSpec((n, ncp), lambda k: (0, 0)),      # accumulator
        compiler_params=pltpu.CompilerParams(
            dimension_semantics=("arbitrary",),                  # reduction axis
            vmem_limit_bytes=32 * 1024 * 1024,
        ),
    )(x_sp, w_fold, fc_b)


# ---------------------------------------------------------------------------
# Parameter construction (deterministic, synthetic), laid out for the kernels.
# ---------------------------------------------------------------------------
def init_params(key, in_channels, num_classes):
    eps = 1e-5
    c1, c2 = 32, 64
    c1p, c2p = _round_up(c1, LANE), _round_up(c2, LANE)
    ncp = _round_up(num_classes, LANE)
    ks = jax.random.split(key, 10)

    def conv_block_params(kw, kb, kg, kbeta, cin, cin_pad, cout, cout_pad):
        w = jax.random.normal(kw, (3, 3, cin, cout), jnp.float32) * 0.1
        b = jax.random.normal(kb, (cout,), jnp.float32) * 0.1
        gamma = 1.0 + 0.1 * jax.random.normal(kg, (cout,), jnp.float32)
        beta = 0.1 * jax.random.normal(kbeta, (cout,), jnp.float32)
        run_mean = jnp.zeros((cout,), jnp.float32)
        run_var = jnp.ones((cout,), jnp.float32)
        scale = gamma / jnp.sqrt(run_var + eps)          # eval-mode BN fold
        bias = beta + scale * (b - run_mean)
        # lane-pad channels with zeros (padded channels stay exactly 0 through ReLU/pool)
        w = jnp.pad(w, ((0, 0), (0, 0), (0, cin_pad - cin), (0, cout_pad - cout)))
        w = w.reshape(9, cin_pad, cout_pad).astype(jnp.bfloat16)
        scale = jnp.pad(scale, (0, cout_pad - cout)).reshape(1, cout_pad)
        bias = jnp.pad(bias, (0, cout_pad - cout)).reshape(1, cout_pad)
        return w, scale, bias

    w1, s1, b1 = conv_block_params(ks[0], ks[1], ks[2], ks[3],
                                   in_channels, in_channels, c1, c1p)
    w2, s2, b2 = conv_block_params(ks[4], ks[5], ks[6], ks[7], c1, c1p, c2, c2p)

    # FC weights stored directly in (pool_h, pool_w, channel, class) order — the same
    # linear map as PyTorch's Linear(64*4*4, num_classes) on flattened pooled features —
    # with padded channels / classes zeroed.
    fc_w = jax.random.normal(ks[8], (4, 4, c2, num_classes), jnp.float32) * 0.05
    fc_w = jnp.pad(fc_w, ((0, 0), (0, 0), (0, c2p - c2), (0, ncp - num_classes)))
    fc_b = jax.random.normal(ks[9], (num_classes,), jnp.float32) * 0.05
    fc_b = jnp.pad(fc_b, (0, ncp - num_classes)).reshape(1, ncp)
    return dict(w1=w1, s1=s1, b1=b1, w2=w2, s2=s2, b2=b2, fc_w=fc_w, fc_b=fc_b)


# ---------------------------------------------------------------------------
# Forward pass
# ---------------------------------------------------------------------------
def enhanced_cnn_forward(params, x_nchw, *, num_classes):
    # Public input is NCHW (PyTorch); internally NHWC so channels sit on the lane axis.
    x = jnp.transpose(x_nchw, (0, 2, 3, 1)).astype(jnp.bfloat16)

    # Conv(3x3,p=1) + BN + ReLU + MaxPool(2)   (Dropout = identity in eval mode)
    x = conv_bn_relu_pool(x, params["w1"], params["s1"], params["b1"])
    x = conv_bn_relu_pool(x, params["w2"], params["s2"], params["b2"])

    # AdaptiveAvgPool2d((4,4)) + flatten + Linear, fused; slice off the lane padding.
    logits = avgpool_flatten_fc(x, params["fc_w"], params["fc_b"])
    return logits[:, :num_classes]


if __name__ == "__main__":
    key = jax.random.PRNGKey(0)
    in_channels, num_classes = 4, 10
    N, H, W = 2, 16, 16

    pkey, xkey = jax.random.split(key)
    params = init_params(pkey, in_channels, num_classes)
    x = jax.random.normal(xkey, (N, in_channels, H, W), jnp.float32)  # NCHW input

    fwd = jax.jit(functools.partial(enhanced_cnn_forward, num_classes=num_classes))
    out = jax.block_until_ready(fwd(params, x))
    assert out.shape == (N, num_classes), out.shape
    print("KERNEL_OK")
</pallas_src>

<mosaic_0001>
module attributes {stable_mosaic.version = 11 : i64} {
  func.func @_conv_bn_relu_pool_kernel(%arg0: i32, %arg1: memref<1x304x4xbf16, #tpu.memory_space<vmem>>, %arg2: memref<1x304x4xbf16, #tpu.memory_space<vmem>>, %arg3: memref<9x4x128xbf16, #tpu.memory_space<vmem>>, %arg4: memref<1x128xf32, #tpu.memory_space<vmem>>, %arg5: memref<1x128xf32, #tpu.memory_space<vmem>>, %arg6: memref<1x8x8x128xbf16, #tpu.memory_space<vmem>>) attributes {dimension_semantics = [#tpu.dimension_semantics<parallel>], iteration_bounds = array<i64: 2>, scalar_prefetch = 0 : i64, scratch_operands = 0 : i64, tpu.core_type = #tpu.core_type<tc>, window_params = [{transform_indices = @transform_0, window_bounds = array<i64: 1, 304, 4>}, {transform_indices = @transform_1, window_bounds = array<i64: 1, 304, 4>}, {pipeline_mode = #tpu.pipeline_mode<synchronous>, transform_indices = @transform_2, window_bounds = array<i64: 9, 4, 128>}, {pipeline_mode = #tpu.pipeline_mode<synchronous>, transform_indices = @transform_3, window_bounds = array<i64: 1, 128>}, {pipeline_mode = #tpu.pipeline_mode<synchronous>, transform_indices = @transform_4, window_bounds = array<i64: 1, 128>}, {transform_indices = @transform_5, window_bounds = array<i64: 1, 8, 8, 128>}]} {
    %c0 = arith.constant 0 : index
    %c0_0 = arith.constant 0 : index
    %0 = vector.load %arg4[%c0, %c0_0] : memref<1x128xf32, #tpu.memory_space<vmem>>, vector<1x128xf32>
    %c0_1 = arith.constant 0 : index
    %c0_2 = arith.constant 0 : index
    %1 = vector.load %arg5[%c0_1, %c0_2] : memref<1x128xf32, #tpu.memory_space<vmem>>, vector<1x128xf32>
    %cst = arith.constant 0.000000e+00 : f32
    %2 = vector.broadcast %cst : f32 to vector<256x128xf32>
    %c0_3 = arith.constant 0 : index
    %c0_4 = arith.constant 0 : index
    %c0_5 = arith.constant 0 : index
    %3 = vector.load %arg1[%c0_3, %c0_4, %c0_5] : memref<1x304x4xbf16, #tpu.memory_space<vmem>>, vector<1x256x4xbf16>
    %4 = vector.shape_cast %3 : vector<1x256x4xbf16> to vector<256x4xbf16>
    %c0_6 = arith.constant 0 : index
    %c0_7 = arith.constant 0 : index
    %c0_8 = arith.constant 0 : index
    %5 = vector.load %arg3[%c0_6, %c0_7, %c0_8] : memref<9x4x128xbf16, #tpu.memory_space<vmem>>, vector<1x4x128xbf16>
    %6 = vector.shape_cast %5 : vector<1x4x128xbf16> to vector<4x128xbf16>
    %cst_9 = arith.constant dense<0.000000e+00> : vector<256x128xf32>
    %7 = tpu.matmul %4, %6, %cst_9 {dimension_numbers = #tpu.dot_dimension_numbers<[1], [0], [0], [1], [0, 0, 1, 1], [], []>} : vector<256x4xbf16>, vector<4x128xbf16>, vector<256x128xf32> -> vector<256x128xf32>
    %8 = arith.addf %2, %7 : vector<256x128xf32>
    %c0_10 = arith.constant 0 : index
    %c0_11 = arith.constant 0 : index
    %c0_12 = arith.constant 0 : index
    %9 = vector.load %arg2[%c0_10, %c0_11, %c0_12] : memref<1x304x4xbf16, #tpu.memory_space<vmem>>, vector<1x256x4xbf16>
    %10 = vector.shape_cast %9 : vector<1x256x4xbf16> to vector<256x4xbf16>
    %c1 = arith.constant 1 : index
    %c0_13 = arith.constant 0 : index
    %c0_14 = arith.constant 0 : index
    %11 = vector.load %arg3[%c1, %c0_13, %c0_14] : memref<9x4x128xbf16, #tpu.memory_space<vmem>>, vector<1x4x128xbf16>
    %12 = vector.shape_cast %11 : vector<1x4x128xbf16> to vector<4x128xbf16>
    %cst_15 = arith.constant dense<0.000000e+00> : vector<256x128xf32>
    %13 = tpu.matmul %10, %12, %cst_15 {dimension_numbers = #tpu.dot_dimension_numbers<[1], [0], [0], [1], [0, 0, 1, 1], [], []>} : vector<256x4xbf16>, vector<4x128xbf16>, vector<256x128xf32> -> vector<256x128xf32>
    %14 = arith.addf %8, %13 : vector<256x128xf32>
    %c0_16 = arith.constant 0 : index
    %c1_17 = arith.constant 1 : index
    %c0_18 = arith.constant 0 : index
    %15 = vector.load %arg1[%c0_16, %c1_17, %c0_18] : memref<1x304x4xbf16, #tpu.memory_space<vmem>>, vector<1x256x4xbf16>
    %16 = vector.shape_cast %15 : vector<1x256x4xbf16> to vector<256x4xbf16>
    %c2 = arith.constant 2 : index
    %c0_19 = arith.constant 0 : index
    %c0_20 = arith.constant 0 : index
    %17 = vector.load %arg3[%c2, %c0_19, %c0_20] : memref<9x4x128xbf16, #tpu.memory_space<vmem>>, vector<1x4x128xbf16>
    %18 = vector.shape_cast %17 : vector<1x4x128xbf16> to vector<4x128xbf16>
    %cst_21 = arith.constant dense<0.000000e+00> : vector<256x128xf32>
    %19 = tpu.matmul %16, %18, %cst_21 {dimension_numbers = #tpu.dot_dimension_numbers<[1], [0], [0], [1], [0, 0, 1, 1], [], []>} : vector<256x4xbf16>, vector<4x128xbf16>, vector<256x128xf32> -> vector<256x128xf32>
    %20 = arith.addf %14, %19 : vector<256x128xf32>
    %c0_22 = arith.constant 0 : index
    %c16 = arith.constant 16 : index
    %c0_23 = arith.constant 0 : index
    %21 = vector.load %arg1[%c0_22, %c16, %c0_23] : memref<1x304x4xbf16, #tpu.memory_space<vmem>>, vector<1x256x4xbf16>
    %22 = vector.shape_cast %21 : vector<1x256x4xbf16> to vector<256x4xbf16>
    %c3 = arith.constant 3 : index
    %c0_24 = arith.constant 0 : index
    %c0_25 = arith.constant 0 : index
    %23 = vector.load %arg3[%c3, %c0_24, %c0_25] : memref<9x4x128xbf16, #tpu.memory_space<vmem>>, vector<1x4x128xbf16>
    %24 = vector.shape_cast %23 : vector<1x4x128xbf16> to vector<4x128xbf16>
    %cst_26 = arith.constant dense<0.000000e+00> : vector<256x128xf32>
    %25 = tpu.matmul %22, %24, %cst_26 {dimension_numbers = #tpu.dot_dimension_numbers<[1], [0], [0], [1], [0, 0, 1, 1], [], []>} : vector<256x4xbf16>, vector<4x128xbf16>, vector<256x128xf32> -> vector<256x128xf32>
    %26 = arith.addf %20, %25 : vector<256x128xf32>
    %c0_27 = arith.constant 0 : index
    %c16_28 = arith.constant 16 : index
    %c0_29 = arith.constant 0 : index
    %27 = vector.load %arg2[%c0_27, %c16_28, %c0_29] : memref<1x304x4xbf16, #tpu.memory_space<vmem>>, vector<1x256x4xbf16>
    %28 = vector.shape_cast %27 : vector<1x256x4xbf16> to vector<256x4xbf16>
    %c4 = arith.constant 4 : index
    %c0_30 = arith.constant 0 : index
    %c0_31 = arith.constant 0 : index
    %29 = vector.load %arg3[%c4, %c0_30, %c0_31] : memref<9x4x128xbf16, #tpu.memory_space<vmem>>, vector<1x4x128xbf16>
    %30 = vector.shape_cast %29 : vector<1x4x128xbf16> to vector<4x128xbf16>
    %cst_32 = arith.constant dense<0.000000e+00> : vector<256x128xf32>
    %31 = tpu.matmul %28, %30, %cst_32 {dimension_numbers = #tpu.dot_dimension_numbers<[1], [0], [0], [1], [0, 0, 1, 1], [], []>} : vector<256x4xbf16>, vector<4x128xbf16>, vector<256x128xf32> -> vector<256x128xf32>
    %32 = arith.addf %26, %31 : vector<256x128xf32>
    %c0_33 = arith.constant 0 : index
    %c17 = arith.constant 17 : index
    %c0_34 = arith.constant 0 : index
    %33 = vector.load %arg1[%c0_33, %c17, %c0_34] : memref<1x304x4xbf16, #tpu.memory_space<vmem>>, vector<1x256x4xbf16>
    %34 = vector.shape_cast %33 : vector<1x256x4xbf16> to vector<256x4xbf16>
    %c5 = arith.constant 5 : index
    %c0_35 = arith.constant 0 : index
    %c0_36 = arith.constant 0 : index
    %35 = vector.load %arg3[%c5, %c0_35, %c0_36] : memref<9x4x128xbf16, #tpu.memory_space<vmem>>, vector<1x4x128xbf16>
    %36 = vector.shape_cast %35 : vector<1x4x128xbf16> to vector<4x128xbf16>
    %cst_37 = arith.constant dense<0.000000e+00> : vector<256x128xf32>
    %37 = tpu.matmul %34, %36, %cst_37 {dimension_numbers = #tpu.dot_dimension_numbers<[1], [0], [0], [1], [0, 0, 1, 1], [], []>} : vector<256x4xbf16>, vector<4x128xbf16>, vector<256x128xf32> -> vector<256x128xf32>
    %38 = arith.addf %32, %37 : vector<256x128xf32>
    %c0_38 = arith.constant 0 : index
    %c32 = arith.constant 32 : index
    %c0_39 = arith.constant 0 : index
    %39 = vector.load %arg1[%c0_38, %c32, %c0_39] : memref<1x304x4xbf16, #tpu.memory_space<vmem>>, vector<1x256x4xbf16>
    %40 = vector.shape_cast %39 : vector<1x256x4xbf16> to vector<256x4xbf16>
    %c6 = arith.constant 6 : index
    %c0_40 = arith.constant 0 : index
    %c0_41 = arith.constant 0 : index
    %41 = vector.load %arg3[%c6, %c0_40, %c0_41] : memref<9x4x128xbf16, #tpu.memory_space<vmem>>, vector<1x4x128xbf16>
    %42 = vector.shape_cast %41 : vector<1x4x128xbf16> to vector<4x128xbf16>
    %cst_42 = arith.constant dense<0.000000e+00> : vector<256x128xf32>
    %43 = tpu.matmul %40, %42, %cst_42 {dimension_numbers = #tpu.dot_dimension_numbers<[1], [0], [0], [1], [0, 0, 1, 1], [], []>} : vector<256x4xbf16>, vector<4x128xbf16>, vector<256x128xf32> -> vector<256x128xf32>
    %44 = arith.addf %38, %43 : vector<256x128xf32>
    %c0_43 = arith.constant 0 : index
    %c32_44 = arith.constant 32 : index
    %c0_45 = arith.constant 0 : index
    %45 = vector.load %arg2[%c0_43, %c32_44, %c0_45] : memref<1x304x4xbf16, #tpu.memory_space<vmem>>, vector<1x256x4xbf16>
    %46 = vector.shape_cast %45 : vector<1x256x4xbf16> to vector<256x4xbf16>
    %c7 = arith.constant 7 : index
    %c0_46 = arith.constant 0 : index
    %c0_47 = arith.constant 0 : index
    %47 = vector.load %arg3[%c7, %c0_46, %c0_47] : memref<9x4x128xbf16, #tpu.memory_space<vmem>>, vector<1x4x128xbf16>
    %48 = vector.shape_cast %47 : vector<1x4x128xbf16> to vector<4x128xbf16>
    %cst_48 = arith.constant dense<0.000000e+00> : vector<256x128xf32>
    %49 = tpu.matmul %46, %48, %cst_48 {dimension_numbers = #tpu.dot_dimension_numbers<[1], [0], [0], [1], [0, 0, 1, 1], [], []>} : vector<256x4xbf16>, vector<4x128xbf16>, vector<256x128xf32> -> vector<256x128xf32>
    %50 = arith.addf %44, %49 : vector<256x128xf32>
    %c0_49 = arith.constant 0 : index
    %c33 = arith.constant 33 : index
    %c0_50 = arith.constant 0 : index
    %51 = vector.load %arg1[%c0_49, %c33, %c0_50] : memref<1x304x4xbf16, #tpu.memory_space<vmem>>, vector<1x256x4xbf16>
    %52 = vector.shape_cast %51 : vector<1x256x4xbf16> to vector<256x4xbf16>
    %c8 = arith.constant 8 : index
    %c0_51 = arith.constant 0 : index
    %c0_52 = arith.constant 0 : index
    %53 = vector.load %arg3[%c8, %c0_51, %c0_52] : memref<9x4x128xbf16, #tpu.memory_space<vmem>>, vector<1x4x128xbf16>
    %54 = vector.shape_cast %53 : vector<1x4x128xbf16> to vector<4x128xbf16>
    %cst_53 = arith.constant dense<0.000000e+00> : vector<256x128xf32>
    %55 = tpu.matmul %52, %54, %cst_53 {dimension_numbers = #tpu.dot_dimension_numbers<[1], [0], [0], [1], [0, 0, 1, 1], [], []>} : vector<256x4xbf16>, vector<4x128xbf16>, vector<256x128xf32> -> vector<256x128xf32>
    %56 = arith.addf %50, %55 : vector<256x128xf32>
    %57 = vector.broadcast %0 : vector<1x128xf32> to vector<256x128xf32>
    %58 = arith.mulf %56, %57 : vector<256x128xf32>
    %59 = vector.broadcast %1 : vector<1x128xf32> to vector<256x128xf32>
    %60 = arith.addf %58, %59 : vector<256x128xf32>
    %cst_54 = arith.constant 0.000000e+00 : f32
    %61 = vector.broadcast %cst_54 : f32 to vector<256x128xf32>
    %62 = arith.maximumf %60, %61 : vector<256x128xf32>
    %cst_55 = arith.constant 0.000000e+00 : f32
    %63 = vector.broadcast %cst_55 : f32 to vector<256x128xf32>
    %c0_56 = arith.constant 0 : index
    %c0_57 = arith.constant 0 : index
    %c0_58 = arith.constant 0 : index
    %64 = vector.load %arg2[%c0_56, %c0_57, %c0_58] : memref<1x304x4xbf16, #tpu.memory_space<vmem>>, vector<1x256x4xbf16>
    %65 = vector.shape_cast %64 : vector<1x256x4xbf16> to vector<256x4xbf16>
    %c0_59 = arith.constant 0 : index
    %c0_60 = arith.constant 0 : index
    %c0_61 = arith.constant 0 : index
    %66 = vector.load %arg3[%c0_59, %c0_60, %c0_61] : memref<9x4x128xbf16, #tpu.memory_space<vmem>>, vector<1x4x128xbf16>
    %67 = vector.shape_cast %66 : vector<1x4x128xbf16> to vector<4x128xbf16>
    %cst_62 = arith.constant dense<0.000000e+00> : vector<256x128xf32>
    %68 = tpu.matmul %65, %67, %cst_62 {dimension_numbers = #tpu.dot_dimension_numbers<[1], [0], [0], [1], [0, 0, 1, 1], [], []>} : vector<256x4xbf16>, vector<4x128xbf16>, vector<256x128xf32> -> vector<256x128xf32>
    %69 = arith.addf %63, %68 : vector<256x128xf32>
    %c0_63 = arith.constant 0 : index
    %c1_64 = arith.constant 1 : index
    %c0_65 = arith.constant 0 : index
    %70 = vector.load %arg1[%c0_63, %c1_64, %c0_65] : memref<1x304x4xbf16, #tpu.memory_space<vmem>>, vector<1x256x4xbf16>
    %71 = vector.shape_cast %70 : vector<1x256x4xbf16> to vector<256x4xbf16>
    %c1_66 = arith.constant 1 : index
    %c0_67 = arith.constant 0 : index
    %c0_68 = arith.constant 0 : index
    %72 = vector.load %arg3[%c1_66, %c0_67, %c0_68] : memref<9x4x128xbf16, #tpu.memory_space<vmem>>, vector<1x4x128xbf16>
    %73 = vector.shape_cast %72 : vector<1x4x128xbf16> to vector<4x128xbf16>
    %cst_69 = arith.constant dense<0.000000e+00> : vector<256x128xf32>
    %74 = tpu.matmul %71, %73, %cst_69 {dimension_numbers = #tpu.dot_dimension_numbers<[1], [0], [0], [1], [0, 0, 1, 1], [], []>} : vector<256x4xbf16>, vector<4x128xbf16>, vector<256x128xf32> -> vector<256x128xf32>
    %75 = arith.addf %69, %74 : vector<256x128xf32>
    %c0_70 = arith.constant 0 : index
    %c1_71 = arith.constant 1 : index
    %c0_72 = arith.constant 0 : index
    %76 = vector.load %arg2[%c0_70, %c1_71, %c0_72] : memref<1x304x4xbf16, #tpu.memory_space<vmem>>, vector<1x256x4xbf16>
    %77 = vector.shape_cast %76 : vector<1x256x4xbf16> to vector<256x4xbf16>
    %c2_73 = arith.constant 2 : index
    %c0_74 = arith.constant 0 : index
    %c0_75 = arith.constant 0 : index
    %78 = vector.load %arg3[%c2_73, %c0_74, %c0_75] : memref<9x4x128xbf16, #tpu.memory_space<vmem>>, vector<1x4x128xbf16>
    %79 = vector.shape_cast %78 : vector<1x4x128xbf16> to vector<4x128xbf16>
    %cst_76 = arith.constant dense<0.000000e+00> : vector<256x128xf32>
    %80 = tpu.matmul %77, %79, %cst_76 {dimension_numbers = #tpu.dot_dimension_numbers<[1], [0], [0], [1], [0, 0, 1, 1], [], []>} : vector<256x4xbf16>, vector<4x128xbf16>, vector<256x128xf32> -> vector<256x128xf32>
    %81 = arith.addf %75, %80 : vector<256x128xf32>
    %c0_77 = arith.constant 0 : index
    %c16_78 = arith.constant 16 : index
    %c0_79 = arith.constant 0 : index
    %82 = vector.load %arg2[%c0_77, %c16_78, %c0_79] : memref<1x304x4xbf16, #tpu.memory_space<vmem>>, vector<1x256x4xbf16>
    %83 = vector.shape_cast %82 : vector<1x256x4xbf16> to vector<256x4xbf16>
    %c3_80 = arith.constant 3 : index
    %c0_81 = arith.constant 0 : index
    %c0_82 = arith.constant 0 : index
    %84 = vector.load %arg3[%c3_80, %c0_81, %c0_82] : memref<9x4x128xbf16, #tpu.memory_space<vmem>>, vector<1x4x128xbf16>
    %85 = vector.shape_cast %84 : vector<1x4x128xbf16> to vector<4x128xbf16>
    %cst_83 = arith.constant dense<0.000000e+00> : vector<256x128xf32>
    %86 = tpu.matmul %83, %85, %cst_83 {dimension_numbers = #tpu.dot_dimension_numbers<[1], [0], [0], [1], [0, 0, 1, 1], [], []>} : vector<256x4xbf16>, vector<4x128xbf16>, vector<256x128xf32> -> vector<256x128xf32>
    %87 = arith.addf %81, %86 : vector<256x128xf32>
    %c0_84 = arith.constant 0 : index
    %c17_85 = arith.constant 17 : index
    %c0_86 = arith.constant 0 : index
    %88 = vector.load %arg1[%c0_84, %c17_85, %c0_86] : memref<1x304x4xbf16, #tpu.memory_space<vmem>>, vector<1x256x4xbf16>
    %89 = vector.shape_cast %88 : vector<1x256x4xbf16> to vector<256x4xbf16>
    %c4_87 = arith.constant 4 : index
    %c0_88 = arith.constant 0 : index
    %c0_89 = arith.constant 0 : index
    %90 = vector.load %arg3[%c4_87, %c0_88, %c0_89] : memref<9x4x128xbf16, #tpu.memory_space<vmem>>, vector<1x4x128xbf16>
    %91 = vector.shape_cast %90 : vector<1x4x128xbf16> to vector<4x128xbf16>
    %cst_90 = arith.constant dense<0.000000e+00> : vector<256x128xf32>
    %92 = tpu.matmul %89, %91, %cst_90 {dimension_numbers = #tpu.dot_dimension_numbers<[1], [0], [0], [1], [0, 0, 1, 1], [], []>} : vector<256x4xbf16>, vector<4x128xbf16>, vector<256x128xf32> -> vector<256x128xf32>
    %93 = arith.addf %87, %92 : vector<256x128xf32>
    %c0_91 = arith.constant 0 : index
    %c17_92 = arith.constant 17 : index
    %c0_93 = arith.constant 0 : index
    %94 = vector.load %arg2[%c0_91, %c17_92, %c0_93] : memref<1x304x4xbf16, #tpu.memory_space<vmem>>, vector<1x256x4xbf16>
    %95 = vector.shape_cast %94 : vector<1x256x4xbf16> to vector<256x4xbf16>
    %c5_94 = arith.constant 5 : index
    %c0_95 = arith.constant 0 : index
    %c0_96 = arith.constant 0 : index
    %96 = vector.load %arg3[%c5_94, %c0_95, %c0_96] : memref<9x4x128xbf16, #tpu.memory_space<vmem>>, vector<1x4x128xbf16>
    %97 = vector.shape_cast %96 : vector<1x4x128xbf16> to vector<4x128xbf16>
    %cst_97 = arith.constant dense<0.000000e+00> : vector<256x128xf32>
    %98 = tpu.matmul %95, %97, %cst_97 {dimension_numbers = #tpu.dot_dimension_numbers<[1], [0], [0], [1], [0, 0, 1, 1], [], []>} : vector<256x4xbf16>, vector<4x128xbf16>, vector<256x128xf32> -> vector<256x128xf32>
    %99 = arith.addf %93, %98 : vector<256x128xf32>
    %c0_98 = arith.constant 0 : index
    %c32_99 = arith.constant 32 : index
    %c0_100 = arith.constant 0 : index
    %100 = vector.load %arg2[%c0_98, %c32_99, %c0_100] : memref<1x304x4xbf16, #tpu.memory_space<vmem>>, vector<1x256x4xbf16>
    %101 = vector.shape_cast %100 : vector<1x256x4xbf16> to vector<256x4xbf16>
    %c6_101 = arith.constant 6 : index
    %c0_102 = arith.constant 0 : index
    %c0_103 = arith.constant 0 : index
    %102 = vector.load %arg3[%c6_101, %c0_102, %c0_103] : memref<9x4x128xbf16, #tpu.memory_space<vmem>>, vector<1x4x128xbf16>
    %103 = vector.shape_cast %102 : vector<1x4x128xbf16> to vector<4x128xbf16>
    %cst_104 = arith.constant dense<0.000000e+00> : vector<256x128xf32>
    %104 = tpu.matmul %101, %103, %cst_104 {dimension_numbers = #tpu.dot_dimension_numbers<[1], [0], [0], [1], [0, 0, 1, 1], [], []>} : vector<256x4xbf16>, vector<4x128xbf16>, vector<256x128xf32> -> vector<256x128xf32>
    %105 = arith.addf %99, %104 : vector<256x128xf32>
    %c0_105 = arith.constant 0 : index
    %c33_106 = arith.constant 33 : index
    %c0_107 = arith.constant 0 : index
    %106 = vector.load %arg1[%c0_105, %c33_106, %c0_107] : memref<1x304x4xbf16, #tpu.memory_space<vmem>>, vector<1x256x4xbf16>
    %107 = vector.shape_cast %106 : vector<1x256x4xbf16> to vector<256x4xbf16>
    %c7_108 = arith.constant 7 : index
    %c0_109 = arith.constant 0 : index
    %c0_110 = arith.constant 0 : index
    %108 = vector.load %arg3[%c7_108, %c0_109, %c0_110] : memref<9x4x128xbf16, #tpu.memory_space<vmem>>, vector<1x4x128xbf16>
    %109 = vector.shape_cast %108 : vector<1x4x128xbf16> to vector<4x128xbf16>
    %cst_111 = arith.constant dense<0.000000e+00> : vector<256x128xf32>
    %110 = tpu.matmul %107, %109, %cst_111 {dimension_numbers = #tpu.dot_dimension_numbers<[1], [0], [0], [1], [0, 0, 1, 1], [], []>} : vector<256x4xbf16>, vector<4x128xbf16>, vector<256x128xf32> -> vector<256x128xf32>
    %111 = arith.addf %105, %110 : vector<256x128xf32>
    %c0_112 = arith.constant 0 : index
    %c33_113 = arith.constant 33 : index
    %c0_114 = arith.constant 0 : index
    %112 = vector.load %arg2[%c0_112, %c33_113, %c0_114] : memref<1x304x4xbf16, #tpu.memory_space<vmem>>, vector<1x256x4xbf16>
    %113 = vector.shape_cast %112 : vector<1x256x4xbf16> to vector<256x4xbf16>
    %c8_115 = arith.constant 8 : index
    %c0_116 = arith.constant 0 : index
    %c0_117 = arith.constant 0 : index
    %114 = vector.load %arg3[%c8_115, %c0_116, %c0_117] : memref<9x4x128xbf16, #tpu.memory_space<vmem>>, vector<1x4x128xbf16>
    %115 = vector.shape_cast %114 : vector<1x4x128xbf16> to vector<4x128xbf16>
    %cst_118 = arith.constant dense<0.000000e+00> : vector<256x128xf32>
    %116 = tpu.matmul %113, %115, %cst_118 {dimension_numbers = #tpu.dot_dimension_numbers<[1], [0], [0], [1], [0, 0, 1, 1], [], []>} : vector<256x4xbf16>, vector<4x128xbf16>, vector<256x128xf32> -> vector<256x128xf32>
    %117 = arith.addf %111, %116 : vector<256x128xf32>
    %118 = vector.broadcast %0 : vector<1x128xf32> to vector<256x128xf32>
    %119 = arith.mulf %117, %118 : vector<256x128xf32>
    %120 = vector.broadcast %1 : vector<1x128xf32> to vector<256x128xf32>
    %121 = arith.addf %119, %120 : vector<256x128xf32>
    %cst_119 = arith.constant 0.000000e+00 : f32
    %122 = vector.broadcast %cst_119 : f32 to vector<256x128xf32>
    %123 = arith.maximumf %121, %122 : vector<256x128xf32>
    %124 = arith.maximumf %62, %123 : vector<256x128xf32>
    %125 = vector.shape_cast %124 : vector<256x128xf32> to vector<16x16x128xf32>
    %126 = vector.shape_cast %125 : vector<16x16x128xf32> to vector<8x2x16x128xf32>
    %cst_120 = arith.constant dense<0xFF800000> : vector<8x16x128xf32>
    %127 = vector.multi_reduction <maximumf>, %126, %cst_120 [1] : vector<8x2x16x128xf32> to vector<8x16x128xf32>
    %128 = vector.extract_strided_slice %127 {offsets = [0, 0, 0], sizes = [8, 8, 128], strides = [1, 1, 1]} : vector<8x16x128xf32> to vector<8x8x128xf32>
    %129 = arith.truncf %128 : vector<8x8x128xf32> to vector<8x8x128xbf16>
    %c0_121 = arith.constant 0 : index
    %c0_122 = arith.constant 0 : index
    %c0_123 = arith.constant 0 : index
    %c0_124 = arith.constant 0 : index
    %130 = vector.load %arg6[%c0_121, %c0_122, %c0_123, %c0_124] : memref<1x8x8x128xbf16, #tpu.memory_space<vmem>>, vector<1x8x8x128xbf16>
    %131 = vector.shape_cast %130 : vector<1x8x8x128xbf16> to vector<8x8x128xbf16>
    %132 = vector.shape_cast %129 : vector<8x8x128xbf16> to vector<1x8x8x128xbf16>
    tpu.vector_store %arg6[%c0_121, %c0_122, %c0_123, %c0_124], %132 {strides = array<i32>} : memref<1x8x8x128xbf16, #tpu.memory_space<vmem>>, vector<1x8x8x128xbf16>,
    return
  }
  func.func @transform_0(%arg0: i32) -> (i32, i32, i32) {
    %c0_i32 = arith.constant 0 : i32
    %c0_i32_0 = arith.constant 0 : i32
    %c0_i32_1 = arith.constant 0 : i32
    return %arg0, %c0_i32, %c0_i32_0 : i32, i32, i32
  }
  func.func @transform_1(%arg0: i32) -> (i32, i32, i32) {
    %c0_i32 = arith.constant 0 : i32
    %c0_i32_0 = arith.constant 0 : i32
    %c0_i32_1 = arith.constant 0 : i32
    return %arg0, %c0_i32, %c0_i32_0 : i32, i32, i32
  }
  func.func @transform_2(%arg0: i32) -> (i32, i32, i32) {
    %c0_i32 = arith.constant 0 : i32
    %c0_i32_0 = arith.constant 0 : i32
    %c0_i32_1 = arith.constant 0 : i32
    %c0_i32_2 = arith.constant 0 : i32
    return %c0_i32, %c0_i32_0, %c0_i32_1 : i32, i32, i32
  }
  func.func @transform_3(%arg0: i32) -> (i32, i32) {
    %c0_i32 = arith.constant 0 : i32
    %c0_i32_0 = arith.constant 0 : i32
    %c0_i32_1 = arith.constant 0 : i32
    return %c0_i32, %c0_i32_0 : i32, i32
  }
  func.func @transform_4(%arg0: i32) -> (i32, i32) {
    %c0_i32 = arith.constant 0 : i32
    %c0_i32_0 = arith.constant 0 : i32
    %c0_i32_1 = arith.constant 0 : i32
    return %c0_i32, %c0_i32_0 : i32, i32
  }
  func.func @transform_5(%arg0: i32) -> (i32, i32, i32, i32) {
    %c0_i32 = arith.constant 0 : i32
    %c0_i32_0 = arith.constant 0 : i32
    %c0_i32_1 = arith.constant 0 : i32
    %c0_i32_2 = arith.constant 0 : i32
    return %arg0, %c0_i32, %c0_i32_0, %c0_i32_1 : i32, i32, i32, i32
  }
}

module attributes {stable_mosaic.version = 11 : i64} {
  func.func @_conv_bn_relu_pool_kernel(%arg0: i32, %arg1: memref<1x88x128xbf16, #tpu.memory_space<vmem>>, %arg2: memref<1x88x128xbf16, #tpu.memory_space<vmem>>, %arg3: memref<9x128x128xbf16, #tpu.memory_space<vmem>>, %arg4: memref<1x128xf32, #tpu.memory_space<vmem>>, %arg5: memref<1x128xf32, #tpu.memory_space<vmem>>, %arg6: memref<1x4x4x128xbf16, #tpu.memory_space<vmem>>) attributes {dimension_semantics = [#tpu.dimension_semantics<parallel>], iteration_bounds = array<i64: 2>, scalar_prefetch = 0 : i64, scratch_operands = 0 : i64, tpu.core_type = #tpu.core_type<tc>, window_params = [{transform_indices = @transform_0, window_bounds = array<i64: 1, 88, 128>}, {transform_indices = @transform_1, window_bounds = array<i64: 1, 88, 128>}, {pipeline_mode = #tpu.pipeline_mode<synchronous>, transform_indices = @transform_2, window_bounds = array<i64: 9, 128, 128>}, {pipeline_mode = #tpu.pipeline_mode<synchronous>, transform_indices = @transform_3, window_bounds = array<i64: 1, 128>}, {pipeline_mode = #tpu.pipeline_mode<synchronous>, transform_indices = @transform_4, window_bounds = array<i64: 1, 128>}, {transform_indices = @transform_5, window_bounds = array<i64: 1, 4, 4, 128>}]} {
    %c0 = arith.constant 0 : index
    %c0_0 = arith.constant 0 : index
    %0 = vector.load %arg4[%c0, %c0_0] : memref<1x128xf32, #tpu.memory_space<vmem>>, vector<1x128xf32>
    %c0_1 = arith.constant 0 : index
    %c0_2 = arith.constant 0 : index
    %1 = vector.load %arg5[%c0_1, %c0_2] : memref<1x128xf32, #tpu.memory_space<vmem>>, vector<1x128xf32>
    %cst = arith.constant 0.000000e+00 : f32
    %2 = vector.broadcast %cst : f32 to vector<64x128xf32>
    %c0_3 = arith.constant 0 : index
    %c0_4 = arith.constant 0 : index
    %c0_5 = arith.constant 0 : index
    %3 = vector.load %arg1[%c0_3, %c0_4, %c0_5] : memref<1x88x128xbf16, #tpu.memory_space<vmem>>, vector<1x64x128xbf16>
    %4 = vector.shape_cast %3 : vector<1x64x128xbf16> to vector<64x128xbf16>
    %c0_6 = arith.constant 0 : index
    %c0_7 = arith.constant 0 : index
    %c0_8 = arith.constant 0 : index
    %5 = vector.load %arg3[%c0_6, %c0_7, %c0_8] : memref<9x128x128xbf16, #tpu.memory_space<vmem>>, vector<1x128x128xbf16>
    %6 = vector.shape_cast %5 : vector<1x128x128xbf16> to vector<128x128xbf16>
    %cst_9 = arith.constant dense<0.000000e+00> : vector<64x128xf32>
    %7 = tpu.matmul %4, %6, %cst_9 {dimension_numbers = #tpu.dot_dimension_numbers<[1], [0], [0], [1], [0, 0, 1, 1], [], []>} : vector<64x128xbf16>, vector<128x128xbf16>, vector<64x128xf32> -> vector<64x128xf32>
    %8 = arith.addf %2, %7 : vector<64x128xf32>
    %c0_10 = arith.constant 0 : index
    %c0_11 = arith.constant 0 : index
    %c0_12 = arith.constant 0 : index
    %9 = vector.load %arg2[%c0_10, %c0_11, %c0_12] : memref<1x88x128xbf16, #tpu.memory_space<vmem>>, vector<1x64x128xbf16>
    %10 = vector.shape_cast %9 : vector<1x64x128xbf16> to vector<64x128xbf16>
    %c1 = arith.constant 1 : index
    %c0_13 = arith.constant 0 : index
    %c0_14 = arith.constant 0 : index
    %11 = vector.load %arg3[%c1, %c0_13, %c0_14] : memref<9x128x128xbf16, #tpu.memory_space<vmem>>, vector<1x128x128xbf16>
    %12 = vector.shape_cast %11 : vector<1x128x128xbf16> to vector<128x128xbf16>
    %cst_15 = arith.constant dense<0.000000e+00> : vector<64x128xf32>
    %13 = tpu.matmul %10, %12, %cst_15 {dimension_numbers = #tpu.dot_dimension_numbers<[1], [0], [0], [1], [0, 0, 1, 1], [], []>} : vector<64x128xbf16>, vector<128x128xbf16>, vector<64x128xf32> -> vector<64x128xf32>
    %14 = arith.addf %8, %13 : vector<64x128xf32>
    %c0_16 = arith.constant 0 : index
    %c1_17 = arith.constant 1 : index
    %c0_18 = arith.constant 0 : index
    %15 = vector.load %arg1[%c0_16, %c1_17, %c0_18] : memref<1x88x128xbf16, #tpu.memory_space<vmem>>, vector<1x64x128xbf16>
    %16 = vector.shape_cast %15 : vector<1x64x128xbf16> to vector<64x128xbf16>
    %c2 = arith.constant 2 : index
    %c0_19 = arith.constant 0 : index
    %c0_20 = arith.constant 0 : index
    %17 = vector.load %arg3[%c2, %c0_19, %c0_20] : memref<9x128x128xbf16, #tpu.memory_space<vmem>>, vector<1x128x128xbf16>
    %18 = vector.shape_cast %17 : vector<1x128x128xbf16> to vector<128x128xbf16>
    %cst_21 = arith.constant dense<0.000000e+00> : vector<64x128xf32>
    %19 = tpu.matmul %16, %18, %cst_21 {dimension_numbers = #tpu.dot_dimension_numbers<[1], [0], [0], [1], [0, 0, 1, 1], [], []>} : vector<64x128xbf16>, vector<128x128xbf16>, vector<64x128xf32> -> vector<64x128xf32>
    %20 = arith.addf %14, %19 : vector<64x128xf32>
    %c0_22 = arith.constant 0 : index
    %c8 = arith.constant 8 : index
    %c0_23 = arith.constant 0 : index
    %21 = vector.load %arg1[%c0_22, %c8, %c0_23] : memref<1x88x128xbf16, #tpu.memory_space<vmem>>, vector<1x64x128xbf16>
    %22 = vector.shape_cast %21 : vector<1x64x128xbf16> to vector<64x128xbf16>
    %c3 = arith.constant 3 : index
    %c0_24 = arith.constant 0 : index
    %c0_25 = arith.constant 0 : index
    %23 = vector.load %arg3[%c3, %c0_24, %c0_25] : memref<9x128x128xbf16, #tpu.memory_space<vmem>>, vector<1x128x128xbf16>
    %24 = vector.shape_cast %23 : vector<1x128x128xbf16> to vector<128x128xbf16>
    %cst_26 = arith.constant dense<0.000000e+00> : vector<64x128xf32>
    %25 = tpu.matmul %22, %24, %cst_26 {dimension_numbers = #tpu.dot_dimension_numbers<[1], [0], [0], [1], [0, 0, 1, 1], [], []>} : vector<64x128xbf16>, vector<128x128xbf16>, vector<64x128xf32> -> vector<64x128xf32>
    %26 = arith.addf %20, %25 : vector<64x128xf32>
    %c0_27 = arith.constant 0 : index
    %c8_28 = arith.constant 8 : index
    %c0_29 = arith.constant 0 : index
    %27 = vector.load %arg2[%c0_27, %c8_28, %c0_29] : memref<1x88x128xbf16, #tpu.memory_space<vmem>>, vector<1x64x128xbf16>
    %28 = vector.shape_cast %27 : vector<1x64x128xbf16> to vector<64x128xbf16>
    %c4 = arith.constant 4 : index
    %c0_30 = arith.constant 0 : index
    %c0_31 = arith.constant 0 : index
    %29 = vector.load %arg3[%c4, %c0_30, %c0_31] : memref<9x128x128xbf16, #tpu.memory_space<vmem>>, vector<1x128x128xbf16>
    %30 = vector.shape_cast %29 : vector<1x128x128xbf16> to vector<128x128xbf16>
    %cst_32 = arith.constant dense<0.000000e+00> : vector<64x128xf32>
    %31 = tpu.matmul %28, %30, %cst_32 {dimension_numbers = #tpu.dot_dimension_numbers<[1], [0], [0], [1], [0, 0, 1, 1], [], []>} : vector<64x128xbf16>, vector<128x128xbf16>, vector<64x128xf32> -> vector<64x128xf32>
    %32 = arith.addf %26, %31 : vector<64x128xf32>
    %c0_33 = arith.constant 0 : index
    %c9 = arith.constant 9 : index
    %c0_34 = arith.constant 0 : index
    %33 = vector.load %arg1[%c0_33, %c9, %c0_34] : memref<1x88x128xbf16, #tpu.memory_space<vmem>>, vector<1x64x128xbf16>
    %34 = vector.shape_cast %33 : vector<1x64x128xbf16> to vector<64x128xbf16>
    %c5 = arith.constant 5 : index
    %c0_35 = arith.constant 0 : index
    %c0_36 = arith.constant 0 : index
    %35 = vector.load %arg3[%c5, %c0_35, %c0_36] : memref<9x128x128xbf16, #tpu.memory_space<vmem>>, vector<1x128x128xbf16>
    %36 = vector.shape_cast %35 : vector<1x128x128xbf16> to vector<128x128xbf16>
    %cst_37 = arith.constant dense<0.000000e+00> : vector<64x128xf32>
    %37 = tpu.matmul %34, %36, %cst_37 {dimension_numbers = #tpu.dot_dimension_numbers<[1], [0], [0], [1], [0, 0, 1, 1], [], []>} : vector<64x128xbf16>, vector<128x128xbf16>, vector<64x128xf32> -> vector<64x128xf32>
    %38 = arith.addf %32, %37 : vector<64x128xf32>
    %c0_38 = arith.constant 0 : index
    %c16 = arith.constant 16 : index
    %c0_39 = arith.constant 0 : index
    %39 = vector.load %arg1[%c0_38, %c16, %c0_39] : memref<1x88x128xbf16, #tpu.memory_space<vmem>>, vector<1x64x128xbf16>
    %40 = vector.shape_cast %39 : vector<1x64x128xbf16> to vector<64x128xbf16>
    %c6 = arith.constant 6 : index
    %c0_40 = arith.constant 0 : index
    %c0_41 = arith.constant 0 : index
    %41 = vector.load %arg3[%c6, %c0_40, %c0_41] : memref<9x128x128xbf16, #tpu.memory_space<vmem>>, vector<1x128x128xbf16>
    %42 = vector.shape_cast %41 : vector<1x128x128xbf16> to vector<128x128xbf16>
    %cst_42 = arith.constant dense<0.000000e+00> : vector<64x128xf32>
    %43 = tpu.matmul %40, %42, %cst_42 {dimension_numbers = #tpu.dot_dimension_numbers<[1], [0], [0], [1], [0, 0, 1, 1], [], []>} : vector<64x128xbf16>, vector<128x128xbf16>, vector<64x128xf32> -> vector<64x128xf32>
    %44 = arith.addf %38, %43 : vector<64x128xf32>
    %c0_43 = arith.constant 0 : index
    %c16_44 = arith.constant 16 : index
    %c0_45 = arith.constant 0 : index
    %45 = vector.load %arg2[%c0_43, %c16_44, %c0_45] : memref<1x88x128xbf16, #tpu.memory_space<vmem>>, vector<1x64x128xbf16>
    %46 = vector.shape_cast %45 : vector<1x64x128xbf16> to vector<64x128xbf16>
    %c7 = arith.constant 7 : index
    %c0_46 = arith.constant 0 : index
    %c0_47 = arith.constant 0 : index
    %47 = vector.load %arg3[%c7, %c0_46, %c0_47] : memref<9x128x128xbf16, #tpu.memory_space<vmem>>, vector<1x128x128xbf16>
    %48 = vector.shape_cast %47 : vector<1x128x128xbf16> to vector<128x128xbf16>
    %cst_48 = arith.constant dense<0.000000e+00> : vector<64x128xf32>
    %49 = tpu.matmul %46, %48, %cst_48 {dimension_numbers = #tpu.dot_dimension_numbers<[1], [0], [0], [1], [0, 0, 1, 1], [], []>} : vector<64x128xbf16>, vector<128x128xbf16>, vector<64x128xf32> -> vector<64x128xf32>
    %50 = arith.addf %44, %49 : vector<64x128xf32>
    %c0_49 = arith.constant 0 : index
    %c17 = arith.constant 17 : index
    %c0_50 = arith.constant 0 : index
    %51 = vector.load %arg1[%c0_49, %c17, %c0_50] : memref<1x88x128xbf16, #tpu.memory_space<vmem>>, vector<1x64x128xbf16>
    %52 = vector.shape_cast %51 : vector<1x64x128xbf16> to vector<64x128xbf16>
    %c8_51 = arith.constant 8 : index
    %c0_52 = arith.constant 0 : index
    %c0_53 = arith.constant 0 : index
    %53 = vector.load %arg3[%c8_51, %c0_52, %c0_53] : memref<9x128x128xbf16, #tpu.memory_space<vmem>>, vector<1x128x128xbf16>
    %54 = vector.shape_cast %53 : vector<1x128x128xbf16> to vector<128x128xbf16>
    %cst_54 = arith.constant dense<0.000000e+00> : vector<64x128xf32>
    %55 = tpu.matmul %52, %54, %cst_54 {dimension_numbers = #tpu.dot_dimension_numbers<[1], [0], [0], [1], [0, 0, 1, 1], [], []>} : vector<64x128xbf16>, vector<128x128xbf16>, vector<64x128xf32> -> vector<64x128xf32>
    %56 = arith.addf %50, %55 : vector<64x128xf32>
    %57 = vector.broadcast %0 : vector<1x128xf32> to vector<64x128xf32>
    %58 = arith.mulf %56, %57 : vector<64x128xf32>
    %59 = vector.broadcast %1 : vector<1x128xf32> to vector<64x128xf32>
    %60 = arith.addf %58, %59 : vector<64x128xf32>
    %cst_55 = arith.constant 0.000000e+00 : f32
    %61 = vector.broadcast %cst_55 : f32 to vector<64x128xf32>
    %62 = arith.maximumf %60, %61 : vector<64x128xf32>
    %cst_56 = arith.constant 0.000000e+00 : f32
    %63 = vector.broadcast %cst_56 : f32 to vector<64x128xf32>
    %c0_57 = arith.constant 0 : index
    %c0_58 = arith.constant 0 : index
    %c0_59 = arith.constant 0 : index
    %64 = vector.load %arg2[%c0_57, %c0_58, %c0_59] : memref<1x88x128xbf16, #tpu.memory_space<vmem>>, vector<1x64x128xbf16>
    %65 = vector.shape_cast %64 : vector<1x64x128xbf16> to vector<64x128xbf16>
    %c0_60 = arith.constant 0 : index
    %c0_61 = arith.constant 0 : index
    %c0_62 = arith.constant 0 : index
    %66 = vector.load %arg3[%c0_60, %c0_61, %c0_62] : memref<9x128x128xbf16, #tpu.memory_space<vmem>>, vector<1x128x128xbf16>
    %67 = vector.shape_cast %66 : vector<1x128x128xbf16> to vector<128x128xbf16>
    %cst_63 = arith.constant dense<0.000000e+00> : vector<64x128xf32>
    %68 = tpu.matmul %65, %67, %cst_63 {dimension_numbers = #tpu.dot_dimension_numbers<[1], [0], [0], [1], [0, 0, 1, 1], [], []>} : vector<64x128xbf16>, vector<128x128xbf16>, vector<64x128xf32> -> vector<64x128xf32>
    %69 = arith.addf %63, %68 : vector<64x128xf32>
    %c0_64 = arith.constant 0 : index
    %c1_65 = arith.constant 1 : index
    %c0_66 = arith.constant 0 : index
    %70 = vector.load %arg1[%c0_64, %c1_65, %c0_66] : memref<1x88x128xbf16, #tpu.memory_space<vmem>>, vector<1x64x128xbf16>
    %71 = vector.shape_cast %70 : vector<1x64x128xbf16> to vector<64x128xbf16>
    %c1_67 = arith.constant 1 : index
    %c0_68 = arith.constant 0 : index
    %c0_69 = arith.constant 0 : index
    %72 = vector.load %arg3[%c1_67, %c0_68, %c0_69] : memref<9x128x128xbf16, #tpu.memory_space<vmem>>, vector<1x128x128xbf16>
    %73 = vector.shape_cast %72 : vector<1x128x128xbf16> to vector<128x128xbf16>
    %cst_70 = arith.constant dense<0.000000e+00> : vector<64x128xf32>
    %74 = tpu.matmul %71, %73, %cst_70 {dimension_numbers = #tpu.dot_dimension_numbers<[1], [0], [0], [1], [0, 0, 1, 1], [], []>} : vector<64x128xbf16>, vector<128x128xbf16>, vector<64x128xf32> -> vector<64x128xf32>
    %75 = arith.addf %69, %74 : vector<64x128xf32>
    %c0_71 = arith.constant 0 : index
    %c1_72 = arith.constant 1 : index
    %c0_73 = arith.constant 0 : index
    %76 = vector.load %arg2[%c0_71, %c1_72, %c0_73] : memref<1x88x128xbf16, #tpu.memory_space<vmem>>, vector<1x64x128xbf16>
    %77 = vector.shape_cast %76 : vector<1x64x128xbf16> to vector<64x128xbf16>
    %c2_74 = arith.constant 2 : index
    %c0_75 = arith.constant 0 : index
    %c0_76 = arith.constant 0 : index
    %78 = vector.load %arg3[%c2_74, %c0_75, %c0_76] : memref<9x128x128xbf16, #tpu.memory_space<vmem>>, vector<1x128x128xbf16>
    %79 = vector.shape_cast %78 : vector<1x128x128xbf16> to vector<128x128xbf16>
    %cst_77 = arith.constant dense<0.000000e+00> : vector<64x128xf32>
    %80 = tpu.matmul %77, %79, %cst_77 {dimension_numbers = #tpu.dot_dimension_numbers<[1], [0], [0], [1], [0, 0, 1, 1], [], []>} : vector<64x128xbf16>, vector<128x128xbf16>, vector<64x128xf32> -> vector<64x128xf32>
    %81 = arith.addf %75, %80 : vector<64x128xf32>
    %c0_78 = arith.constant 0 : index
    %c8_79 = arith.constant 8 : index
    %c0_80 = arith.constant 0 : index
    %82 = vector.load %arg2[%c0_78, %c8_79, %c0_80] : memref<1x88x128xbf16, #tpu.memory_space<vmem>>, vector<1x64x128xbf16>
    %83 = vector.shape_cast %82 : vector<1x64x128xbf16> to vector<64x128xbf16>
    %c3_81 = arith.constant 3 : index
    %c0_82 = arith.constant 0 : index
    %c0_83 = arith.constant 0 : index
    %84 = vector.load %arg3[%c3_81, %c0_82, %c0_83] : memref<9x128x128xbf16, #tpu.memory_space<vmem>>, vector<1x128x128xbf16>
    %85 = vector.shape_cast %84 : vector<1x128x128xbf16> to vector<128x128xbf16>
    %cst_84 = arith.constant dense<0.000000e+00> : vector<64x128xf32>
    %86 = tpu.matmul %83, %85, %cst_84 {dimension_numbers = #tpu.dot_dimension_numbers<[1], [0], [0], [1], [0, 0, 1, 1], [], []>} : vector<64x128xbf16>, vector<128x128xbf16>, vector<64x128xf32> -> vector<64x128xf32>
    %87 = arith.addf %81, %86 : vector<64x128xf32>
    %c0_85 = arith.constant 0 : index
    %c9_86 = arith.constant 9 : index
    %c0_87 = arith.constant 0 : index
    %88 = vector.load %arg1[%c0_85, %c9_86, %c0_87] : memref<1x88x128xbf16, #tpu.memory_space<vmem>>, vector<1x64x128xbf16>
    %89 = vector.shape_cast %88 : vector<1x64x128xbf16> to vector<64x128xbf16>
    %c4_88 = arith.constant 4 : index
    %c0_89 = arith.constant 0 : index
    %c0_90 = arith.constant 0 : index
    %90 = vector.load %arg3[%c4_88, %c0_89, %c0_90] : memref<9x128x128xbf16, #tpu.memory_space<vmem>>, vector<1x128x128xbf16>
    %91 = vector.shape_cast %90 : vector<1x128x128xbf16> to vector<128x128xbf16>
    %cst_91 = arith.constant dense<0.000000e+00> : vector<64x128xf32>
    %92 = tpu.matmul %89, %91, %cst_91 {dimension_numbers = #tpu.dot_dimension_numbers<[1], [0], [0], [1], [0, 0, 1, 1], [], []>} : vector<64x128xbf16>, vector<128x128xbf16>, vector<64x128xf32> -> vector<64x128xf32>
    %93 = arith.addf %87, %92 : vector<64x128xf32>
    %c0_92 = arith.constant 0 : index
    %c9_93 = arith.constant 9 : index
    %c0_94 = arith.constant 0 : index
    %94 = vector.load %arg2[%c0_92, %c9_93, %c0_94] : memref<1x88x128xbf16, #tpu.memory_space<vmem>>, vector<1x64x128xbf16>
    %95 = vector.shape_cast %94 : vector<1x64x128xbf16> to vector<64x128xbf16>
    %c5_95 = arith.constant 5 : index
    %c0_96 = arith.constant 0 : index
    %c0_97 = arith.constant 0 : index
    %96 = vector.load %arg3[%c5_95, %c0_96, %c0_97] : memref<9x128x128xbf16, #tpu.memory_space<vmem>>, vector<1x128x128xbf16>
    %97 = vector.shape_cast %96 : vector<1x128x128xbf16> to vector<128x128xbf16>
    %cst_98 = arith.constant dense<0.000000e+00> : vector<64x128xf32>
    %98 = tpu.matmul %95, %97, %cst_98 {dimension_numbers = #tpu.dot_dimension_numbers<[1], [0], [0], [1], [0, 0, 1, 1], [], []>} : vector<64x128xbf16>, vector<128x128xbf16>, vector<64x128xf32> -> vector<64x128xf32>
    %99 = arith.addf %93, %98 : vector<64x128xf32>
    %c0_99 = arith.constant 0 : index
    %c16_100 = arith.constant 16 : index
    %c0_101 = arith.constant 0 : index
    %100 = vector.load %arg2[%c0_99, %c16_100, %c0_101] : memref<1x88x128xbf16, #tpu.memory_space<vmem>>, vector<1x64x128xbf16>
    %101 = vector.shape_cast %100 : vector<1x64x128xbf16> to vector<64x128xbf16>
    %c6_102 = arith.constant 6 : index
    %c0_103 = arith.constant 0 : index
    %c0_104 = arith.constant 0 : index
    %102 = vector.load %arg3[%c6_102, %c0_103, %c0_104] : memref<9x128x128xbf16, #tpu.memory_space<vmem>>, vector<1x128x128xbf16>
    %103 = vector.shape_cast %102 : vector<1x128x128xbf16> to vector<128x128xbf16>
    %cst_105 = arith.constant dense<0.000000e+00> : vector<64x128xf32>
    %104 = tpu.matmul %101, %103, %cst_105 {dimension_numbers = #tpu.dot_dimension_numbers<[1], [0], [0], [1], [0, 0, 1, 1], [], []>} : vector<64x128xbf16>, vector<128x128xbf16>, vector<64x128xf32> -> vector<64x128xf32>
    %105 = arith.addf %99, %104 : vector<64x128xf32>
    %c0_106 = arith.constant 0 : index
    %c17_107 = arith.constant 17 : index
    %c0_108 = arith.constant 0 : index
    %106 = vector.load %arg1[%c0_106, %c17_107, %c0_108] : memref<1x88x128xbf16, #tpu.memory_space<vmem>>, vector<1x64x128xbf16>
    %107 = vector.shape_cast %106 : vector<1x64x128xbf16> to vector<64x128xbf16>
    %c7_109 = arith.constant 7 : index
    %c0_110 = arith.constant 0 : index
    %c0_111 = arith.constant 0 : index
    %108 = vector.load %arg3[%c7_109, %c0_110, %c0_111] : memref<9x128x128xbf16, #tpu.memory_space<vmem>>, vector<1x128x128xbf16>
    %109 = vector.shape_cast %108 : vector<1x128x128xbf16> to vector<128x128xbf16>
    %cst_112 = arith.constant dense<0.000000e+00> : vector<64x128xf32>
    %110 = tpu.matmul %107, %109, %cst_112 {dimension_numbers = #tpu.dot_dimension_numbers<[1], [0], [0], [1], [0, 0, 1, 1], [], []>} : vector<64x128xbf16>, vector<128x128xbf16>, vector<64x128xf32> -> vector<64x128xf32>
    %111 = arith.addf %105, %110 : vector<64x128xf32>
    %c0_113 = arith.constant 0 : index
    %c17_114 = arith.constant 17 : index
    %c0_115 = arith.constant 0 : index
    %112 = vector.load %arg2[%c0_113, %c17_114, %c0_115] : memref<1x88x128xbf16, #tpu.memory_space<vmem>>, vector<1x64x128xbf16>
    %113 = vector.shape_cast %112 : vector<1x64x128xbf16> to vector<64x128xbf16>
    %c8_116 = arith.constant 8 : index
    %c0_117 = arith.constant 0 : index
    %c0_118 = arith.constant 0 : index
    %114 = vector.load %arg3[%c8_116, %c0_117, %c0_118] : memref<9x128x128xbf16, #tpu.memory_space<vmem>>, vector<1x128x128xbf16>
    %115 = vector.shape_cast %114 : vector<1x128x128xbf16> to vector<128x128xbf16>
    %cst_119 = arith.constant dense<0.000000e+00> : vector<64x128xf32>
    %116 = tpu.matmul %113, %115, %cst_119 {dimension_numbers = #tpu.dot_dimension_numbers<[1], [0], [0], [1], [0, 0, 1, 1], [], []>} : vector<64x128xbf16>, vector<128x128xbf16>, vector<64x128xf32> -> vector<64x128xf32>
    %117 = arith.addf %111, %116 : vector<64x128xf32>
    %118 = vector.broadcast %0 : vector<1x128xf32> to vector<64x128xf32>
    %119 = arith.mulf %117, %118 : vector<64x128xf32>
    %120 = vector.broadcast %1 : vector<1x128xf32> to vector<64x128xf32>
    %121 = arith.addf %119, %120 : vector<64x128xf32>
    %cst_120 = arith.constant 0.000000e+00 : f32
    %122 = vector.broadcast %cst_120 : f32 to vector<64x128xf32>
    %123 = arith.maximumf %121, %122 : vector<64x128xf32>
    %124 = arith.maximumf %62, %123 : vector<64x128xf32>
    %125 = vector.shape_cast %124 : vector<64x128xf32> to vector<8x8x128xf32>
    %126 = vector.shape_cast %125 : vector<8x8x128xf32> to vector<4x2x8x128xf32>
    %cst_121 = arith.constant dense<0xFF800000> : vector<4x8x128xf32>
    %127 = vector.multi_reduction <maximumf>, %126, %cst_121 [1] : vector<4x2x8x128xf32> to vector<4x8x128xf32>
    %128 = vector.extract_strided_slice %127 {offsets = [0, 0, 0], sizes = [4, 4, 128], strides = [1, 1, 1]} : vector<4x8x128xf32> to vector<4x4x128xf32>
    %129 = arith.truncf %128 : vector<4x4x128xf32> to vector<4x4x128xbf16>
    %c0_122 = arith.constant 0 : index
    %c0_123 = arith.constant 0 : index
    %c0_124 = arith.constant 0 : index
    %c0_125 = arith.constant 0 : index
    %130 = vector.load %arg6[%c0_122, %c0_123, %c0_124, %c0_125] : memref<1x4x4x128xbf16, #tpu.memory_space<vmem>>, vector<1x4x4x128xbf16>
    %131 = vector.shape_cast %130 : vector<1x4x4x128xbf16> to vector<4x4x128xbf16>
    %132 = vector.shape_cast %129 : vector<4x4x128xbf16> to vector<1x4x4x128xbf16>
    tpu.vector_store %arg6[%c0_122, %c0_123, %c0_124, %c0_125], %132 {strides = array<i32>} : memref<1x4x4x128xbf16, #tpu.memory_space<vmem>>, vector<1x4x4x128xbf16>,
    return
  }
  func.func @transform_0(%arg0: i32) -> (i32, i32, i32) {
    %c0_i32 = arith.constant 0 : i32
    %c0_i32_0 = arith.constant 0 : i32
    %c0_i32_1 = arith.constant 0 : i32
    return %arg0, %c0_i32, %c0_i32_0 : i32, i32, i32
  }
  func.func @transform_1(%arg0: i32) -> (i32, i32, i32) {
    %c0_i32 = arith.constant 0 : i32
    %c0_i32_0 = arith.constant 0 : i32
    %c0_i32_1 = arith.constant 0 : i32
    return %arg0, %c0_i32, %c0_i32_0 : i32, i32, i32
  }
  func.func @transform_2(%arg0: i32) -> (i32, i32, i32) {
    %c0_i32 = arith.constant 0 : i32
    %c0_i32_0 = arith.constant 0 : i32
    %c0_i32_1 = arith.constant 0 : i32
    %c0_i32_2 = arith.constant 0 : i32
    return %c0_i32, %c0_i32_0, %c0_i32_1 : i32, i32, i32
  }
  func.func @transform_3(%arg0: i32) -> (i32, i32) {
    %c0_i32 = arith.constant 0 : i32
    %c0_i32_0 = arith.constant 0 : i32
    %c0_i32_1 = arith.constant 0 : i32
    return %c0_i32, %c0_i32_0 : i32, i32
  }
  func.func @transform_4(%arg0: i32) -> (i32, i32) {
    %c0_i32 = arith.constant 0 : i32
    %c0_i32_0 = arith.constant 0 : i32
    %c0_i32_1 = arith.constant 0 : i32
    return %c0_i32, %c0_i32_0 : i32, i32
  }
  func.func @transform_5(%arg0: i32) -> (i32, i32, i32, i32) {
    %c0_i32 = arith.constant 0 : i32
    %c0_i32_0 = arith.constant 0 : i32
    %c0_i32_1 = arith.constant 0 : i32
    %c0_i32_2 = arith.constant 0 : i32
    return %arg0, %c0_i32, %c0_i32_0, %c0_i32_1 : i32, i32, i32, i32
  }
}

module attributes {stable_mosaic.version = 11 : i64} {
  func.func @_avgpool_fc_kernel(%arg0: i32, %arg1: memref<1x2x128xbf16, #tpu.memory_space<vmem>>, %arg2: memref<1x128x128xbf16, #tpu.memory_space<vmem>>, %arg3: memref<1x128xf32, #tpu.memory_space<vmem>>, %arg4: memref<2x128xf32, #tpu.memory_space<vmem>>) attributes {dimension_semantics = [#tpu.dimension_semantics<arbitrary>], iteration_bounds = array<i64: 16>, scalar_prefetch = 0 : i64, scratch_operands = 0 : i64, tpu.core_type = #tpu.core_type<tc>, window_params = [{transform_indices = @transform_0, window_bounds = array<i64: 1, 2, 128>}, {transform_indices = @transform_1, window_bounds = array<i64: 1, 128, 128>}, {pipeline_mode = #tpu.pipeline_mode<synchronous>, transform_indices = @transform_2, window_bounds = array<i64: 1, 128>}, {pipeline_mode = #tpu.pipeline_mode<synchronous>, transform_indices = @transform_3, window_bounds = array<i64: 2, 128>}]} {
    %c0 = arith.constant 0 : index
    %c0_0 = arith.constant 0 : index
    %c0_1 = arith.constant 0 : index
    %0 = vector.load %arg1[%c0, %c0_0, %c0_1] : memref<1x2x128xbf16, #tpu.memory_space<vmem>>, vector<1x2x128xbf16>
    %1 = vector.shape_cast %0 : vector<1x2x128xbf16> to vector<2x128xbf16>
    %c0_2 = arith.constant 0 : index
    %c0_3 = arith.constant 0 : index
    %c0_4 = arith.constant 0 : index
    %2 = vector.load %arg2[%c0_2, %c0_3, %c0_4] : memref<1x128x128xbf16, #tpu.memory_space<vmem>>, vector<1x128x128xbf16>
    %3 = vector.shape_cast %2 : vector<1x128x128xbf16> to vector<128x128xbf16>
    %cst = arith.constant dense<0.000000e+00> : vector<2x128xf32>
    %4 = tpu.matmul %1, %3, %cst {dimension_numbers = #tpu.dot_dimension_numbers<[1], [0], [0], [1], [0, 0, 1, 1], [], []>} : vector<2x128xbf16>, vector<128x128xbf16>, vector<2x128xf32> -> vector<2x128xf32>
    %c0_i32 = arith.constant 0 : i32
    %5 = arith.cmpi eq, %arg0, %c0_i32 : i32
    %6 = arith.extui %5 : i1 to i32
    %c0_i32_5 = arith.constant 0 : i32
    %7 = arith.cmpi ne, %6, %c0_i32_5 : i32
    scf.if %7 {
      %c0_8 = arith.constant 0 : index
      %c0_9 = arith.constant 0 : index
      %11 = vector.load %arg3[%c0_8, %c0_9] : memref<1x128xf32, #tpu.memory_space<vmem>>, vector<1x128xf32>
      %12 = vector.broadcast %11 : vector<1x128xf32> to vector<2x128xf32>
      %13 = arith.addf %12, %4 : vector<2x128xf32>
      %c0_10 = arith.constant 0 : index
      %c0_11 = arith.constant 0 : index
      %14 = vector.load %arg4[%c0_10, %c0_11] : memref<2x128xf32, #tpu.memory_space<vmem>>, vector<2x128xf32>
      tpu.vector_store %arg4[%c0_10, %c0_11], %13 {strides = array<i32>} : memref<2x128xf32, #tpu.memory_space<vmem>>, vector<2x128xf32>,
    } else {
    }
    %c0_i32_6 = arith.constant 0 : i32
    %8 = arith.cmpi ne, %arg0, %c0_i32_6 : i32
    %9 = arith.extui %8 : i1 to i32
    %c0_i32_7 = arith.constant 0 : i32
    %10 = arith.cmpi ne, %9, %c0_i32_7 : i32
    scf.if %10 {
      %c0_8 = arith.constant 0 : index
      %c0_9 = arith.constant 0 : index
      %11 = vector.load %arg4[%c0_8, %c0_9] : memref<2x128xf32, #tpu.memory_space<vmem>>, vector<2x128xf32>
      %12 = arith.addf %11, %4 : vector<2x128xf32>
      %c0_10 = arith.constant 0 : index
      %c0_11 = arith.constant 0 : index
      %13 = vector.load %arg4[%c0_10, %c0_11] : memref<2x128xf32, #tpu.memory_space<vmem>>, vector<2x128xf32>
      tpu.vector_store %arg4[%c0_10, %c0_11], %12 {strides = array<i32>} : memref<2x128xf32, #tpu.memory_space<vmem>>, vector<2x128xf32>,
    } else {
    }
    return
  }
  func.func @transform_0(%arg0: i32) -> (i32, i32, i32) {
    %c0_i32 = arith.constant 0 : i32
    %c0_i32_0 = arith.constant 0 : i32
    %c0_i32_1 = arith.constant 0 : i32
    return %arg0, %c0_i32, %c0_i32_0 : i32, i32, i32
  }
  func.func @transform_1(%arg0: i32) -> (i32, i32, i32) {
    %c0_i32 = arith.constant 0 : i32
    %c0_i32_0 = arith.constant 0 : i32
    %c0_i32_1 = arith.constant 0 : i32
    return %arg0, %c0_i32, %c0_i32_0 : i32, i32, i32
  }
  func.func @transform_2(%arg0: i32) -> (i32, i32) {
    %c0_i32 = arith.constant 0 : i32
    %c0_i32_0 = arith.constant 0 : i32
    %c0_i32_1 = arith.constant 0 : i32
    return %c0_i32, %c0_i32_0 : i32, i32
  }
  func.func @transform_3(%arg0: i32) -> (i32, i32) {
    %c0_i32 = arith.constant 0 : i32
    %c0_i32_0 = arith.constant 0 : i32
    %c0_i32_1 = arith.constant 0 : i32
    return %c0_i32, %c0_i32_0 : i32, i32
  }
}

</mosaic_0001>

<bundles_post_ra>
// kernel: enhanced_cnn_forward.5
= control target key start
LH: loop header
LB: loop body
LE: loop exit
PB: predicated region body
PF: predicated region fallthrough
CT: control target
= control target key end

     0   :  { %8 = vsyncpa [#allocation3], 0  ;;  %s453_s12 = smov 0   ;;  %s483_s0 = inlined_call_operand.vmem [shape: bf16[16,2,128], index: 0, kind: input, shape index: {}]   ;;  %s484_s1 = inlined_call_operand.vmem [shape: bf16[16,128,128], index: 1, kind: input, shape index: {}]   ;;  %s485_s2 = inlined_call_operand.vmem [shape: f32[1,128], index: 2, kind: input, shape index: {}]   ;;  %s486_s3 = inlined_call_operand.hbm [shape: f32[2,128], index: 3, kind: output, shape index: {}]  }
   0x1 LB: > { %s459_s13 = sadd.s32 4294967295, %s430_s12   ;;  %p326_p0 = scmp.ge.s32.totalorder %s430_s12, 1  ;;  %s430_s12 = sphi %s453_s12, %s14_s12  }
   0x2   : > { %p141_p1 = scmp.lt.s32.totalorder %s430_s12, 17 }
   0x4   : > { %p142_p2 = pnand %p326_p0, %p141_p1 }
   0x5   : > { %p163_p3 = scmp.lt.s32.totalorder (!%p142_p2), %s459_s13, 15  ;;  %p361_p4 = scmp.ne.s32.totalorder (!%p142_p2), %s459_s13, 0 }
   0x6   : > { %145 = sbr.rel (%p142_p2) target bundleno = 202 (0xca), region = 32 }
   0xb   : > { %s164_s14 = scalar_select %p163_p3, %s459_s13, 15 }
   0xd   : > { %s367_s15 = sshll.u32 %s164_s14, 6  ;;  %s165_s21 = scalar_lea.vmem %s483_s0, %s164_s14 }
   0xe   : > { %s170_s18 = scalar_lea.vmem %s484_s1, %s367_s15  ;;  %v171_v8 = vld [vmem:[%s165_s21] sm:$0x1] }
   0xf   : > { %v375_v0 = vld [vmem:[%s170_s18 + $0x38] sm:$0xff]  ;;  %v374_v1 = vld [vmem:[%s170_s18 + $0x30] sm:$0xff]  ;;  %v373_v2 = vld [vmem:[%s170_s18 + $0x28] sm:$0xff] }
  0x10   : > { %236 = vmatpush.bf16.msra.mxu0 %v375_v0  ;;  %v372_v3 = vld [vmem:[%s170_s18 + $0x20] sm:$0xff]  ;;  %v371_v4 = vld [vmem:[%s170_s18 + $0x18] sm:$0xff]  ;;  %v370_v5 = vld [vmem:[%s170_s18 + $0x10] sm:$0xff] }
  0x11   : > { %v369_v6 = vld [vmem:[%s170_s18 + $0x8] sm:$0xff]  ;;  %v368_v7 = vld [vmem:[%s170_s18] sm:$0xff] }
  0x14   : > { %237 = vmatpush.bf16.msra.mxu0 %v374_v1 }
  0x18   : > { %238 = vmatpush.bf16.msra.mxu0 %v373_v2 }
  0x1c   : > { %239 = vmatpush.bf16.msra.mxu0 %v372_v3 }
  0x20   : > { %240 = vmatpush.bf16.msra.mxu0 %v371_v4 }
  0x24   : > { %241 = vmatpush.bf16.msra.mxu0 %v370_v5 }
  0x28   : > { %242 = vmatpush.bf16.msra.mxu0 %v369_v6 }
  0x2c   : > { %243 = vmatpush.bf16.msra.mxu0 %v368_v7 }
  0x2f   : > { %244 = vmatmul.bf16.vlgmr.msra.gmra.mxu0 %v171_v8 }
  0xac   : > { %v245_v9 = vpop.f32.mrf.mxu0 }
  0xb0   : > { %252 = sbr.rel (%p361_p4) target bundleno = 185 (0xb9), region = 36 }
  0xb4   : > { %v247_v10 = vpop.f32.mrf.mxu0 }
  0xb5   : > { %v391_v11 = vld [vmem:[%s485_s2] ss:$0 sm:$0xff] }
  0xb6   : > { %v257_v12 = vadd.f32 %v391_v11, %v245_v9 }
  0xb8   : > { %258 = vst [vmem:[#allocation2] sm:$0x3] %v257_v12 }
  0xb9 PF: > { %p362_p5 = scmp.eq.s32.totalorder %s459_s13, 0 }
  0xbb   : > { %262 = sbr.rel (%p362_p5) target bundleno = 196 (0xc4), region = 40 }
  0xc0   : > { %v263_v13 = vld [vmem:[#allocation2] sm:$0x3] }
  0xc1   : > { %v264_v14 = vadd.f32 %v263_v13, %v245_v9 }
  0xc3   : > { %265 = vst [vmem:[#allocation2] sm:$0x3] %v264_v14 }
  0xc4 PF: > { %p380_p6 = scmp.eq.s32.totalorder %s459_s13, 15  ;;  %s274_s26 = sshll.u32 %s486_s3, 4  ;;  %s275_s26 = int_to_ptr.hbm [resolvable:$true] %s274_s26 }
  0xc5   : > { %s432_s27 = smov [#allocation2]  }
  0xc6   : > { %s272_s28 = sshll.u32 %s432_s27, 4  ;;  %s273_s28 = int_to_ptr.vmem [resolvable:$true] %s272_s28 }
  0xc7   : > { %377 = dma.vmem_to_hbm [thread:$0]  (%p380_p6), %s273_s28, 32, %s275_s26, [#allocation3]  }
  0xc8   : > { %425 = dma.done.wait (%p380_p6), [#allocation3], 32  }
  0xc9   : > { %427 = vsyncadd (%p380_p6), [#allocation3], 4294967264 }
  0xca PF: > { %s14_s12 = sadd.s32 1, %s430_s12  }
  0xcb   : > { %p11_p7 = scmp.ge.s32.totalorder %s14_s12, 18  }
  0xcd   :  { %13 = sbr.rel (!%p11_p7) target bundleno = 1 (0x1), region = 70 }
  0xd2   :  { %288 = vsyncpa [#allocation3], 1 }
  0xd3   :  { %290 = vsyncpa [#allocation3 + $0x1], 1 }

// kernel: enhanced_cnn_forward.4
= control target key start
LH: loop header
LB: loop body
LE: loop exit
PB: predicated region body
PF: predicated region fallthrough
CT: control target
= control target key end

     0   :  { %s2969_s18 = smov 0   ;;  %s3898_s0 = inlined_call_operand.vmem [shape: bf16[2,88,128], index: 0, kind: input, shape index: {}]   ;;  %s3899_s1 = inlined_call_operand.vmem [shape: bf16[2,88,128], index: 1, kind: input, shape index: {}]   ;;  %s3900_s2 = inlined_call_operand.vmem [shape: bf16[9,128,128], index: 2, kind: input, shape index: {}]   ;;  %s3901_s3 = inlined_call_operand.vmem [shape: f32[1,128], index: 3, kind: input, shape index: {}]   ;;  %s3902_s4 = inlined_call_operand.vmem [shape: f32[1,128], index: 4, kind: input, shape index: {}]   ;;  %s3903_s5 = inlined_call_operand.vmem [shape: bf16[2,4,4,128], index: 5, kind: output, shape index: {}]  }
   0x1 LB: > { %s2147_s19 = sadd.s32 4294967295, %s2937_s18   ;;  %p2151_p0 = scmp.ge.s32.totalorder %s2937_s18, 1  ;;  %s2937_s18 = sphi %s2969_s18, %s15_s18  }
   0x2   : > { %p197_p1 = scmp.lt.s32.totalorder %s2937_s18, 3 }
   0x4   : > { %p198_p2 = pnand %p2151_p0, %p197_p1 }
   0x6   : > { %201 = sbr.rel (%p198_p2) target bundleno = 476 (0x1dc), region = 40 }
   0xb   : > { %v2980_v0 = vld [vmem:[%s3900_s2 + $0x78] sm:$0xff]  ;;  %v2992_v2 = vld [vmem:[%s3900_s2 + $0x70] sm:$0xff]  ;;  %v3006_v4 = vld [vmem:[%s3900_s2 + $0x68] sm:$0xff]  ;;  %p230_p3 = scmp.lt.s32.totalorder %s2147_s19, 1  ;;  %vm547_vm0 = vsmask.f32 7424 }
   0xc   : > { %v2985_v1 = vld [vmem:[%s3900_s2 + $0x38] sm:$0xff]  ;;  %2879 = vmatpush.bf16.msra.mxu2 %v2980_v0  ;;  %v2997_v3 = vld [vmem:[%s3900_s2 + $0x30] sm:$0xff]  ;;  %368 = vmatpush.bf16.msra.mxu0 %v2980_v0  ;;  %v3011_v5 = vld [vmem:[%s3900_s2 + $0x28] sm:$0xff] }
   0xd   : > { %2887 = vmatpush.bf16.msra.mxu3 %v2985_v1  ;;  %469 = vmatpush.bf16.msra.mxu1 %v2985_v1  ;;  %v3018_v6 = vld [vmem:[%s3900_s2 + $0x60] sm:$0xff]  ;;  %v3034_v8 = vld [vmem:[%s3900_s2 + $0x58] sm:$0xff]  ;;  %v3050_v10 = vld [vmem:[%s3900_s2 + $0x50] sm:$0xff]  ;;  %s3997_s19 = smov (!%p230_p3, %s2147_s19), 1 }
   0xe   : > { %v3025_v7 = vld [vmem:[%s3900_s2 + $0x20] sm:$0xff]  ;;  %v3039_v9 = vld [vmem:[%s3900_s2 + $0x18] sm:$0xff]  ;;  %v3055_v11 = vld [vmem:[%s3900_s2 + $0x10] sm:$0xff]  ;;  %s2906_s25 = smul.u32 44, %s3997_s19  ;;  %s2638_s22 = sshll.u32 %s3997_s19, 3 }
   0xf   : > { %v3068_v12 = vld [vmem:[%s3900_s2 + $0x48] sm:$0xff]  ;;  %v3083_v14 = vld [vmem:[%s3900_s2 + $0x40] sm:$0xff]  ;;  %v3105_v16 = vld [vmem:[%s3900_s2 + $0xb8] sm:$0xff] }
  0x10   : > { %2880 = vmatpush.bf16.msra.mxu2 %v2992_v2  ;;  %369 = vmatpush.bf16.msra.mxu0 %v2992_v2  ;;  %v3073_v13 = vld [vmem:[%s3900_s2 + $0x8] sm:$0xff]  ;;  %v3088_v15 = vld [vmem:[%s3900_s2] sm:$0xff]  ;;  %s3093_s7 = scalar_lea.vmem %s3899_s1, %s2906_s25  ;;  %s3098_s10 = scalar_lea.vmem %s3898_s0, %s2906_s25  ;;  %v3110_v17 = vld [vmem:[%s3900_s2 + $0xf8] sm:$0xff] }
  0x11   : > { %2888 = vmatpush.bf16.msra.mxu3 %v2997_v3  ;;  %470 = vmatpush.bf16.msra.mxu1 %v2997_v3  ;;  %v3113_v18 = vld [vmem:[%s3093_s7 + $0x10] sm:$0xff]  ;;  %v3119_v20 = vld [vmem:[%s3093_s7] sm:$0xff]  ;;  %v3127_v22 = vld [vmem:[%s3900_s2 + $0x138] sm:$0xff]  ;;  %s3851_s25 = scalar_lea.vmem %s3903_s5, %s2638_s22 }
  0x12   : > { %3934 = vst [vmem:[#allocation2_spill] sm:$0xff] %v3113_v18  ;;  %v2641_v19 = vld [vmem:[%s3098_s10 + $0x10] sm:$0xff]  ;;  %v2639_v21 = vld [vmem:[%s3098_s10] sm:$0xff]  ;;  %v3132_v23 = vld [vmem:[%s3900_s2 + $0x178] sm:$0xff] }
  0x13   : > { %3935 = vst [vmem:[#allocation3_spill] sm:$0xff] %v3119_v20  ;;  %v3135_v24 = vld [vmem:[%s3093_s7] sm:$0xff]   ;;  %v3145_v26 = vld [vmem:[%s3900_s2 + $0xb0] sm:$0xff]  ;;  %v3171_v30 = vld [vmem:[%s3900_s2 + $0xa8] sm:$0xff] }
  0x14   : > { %2881 = vmatpush.bf16.msra.mxu2 %v3006_v4  ;;  %370 = vmatpush.bf16.msra.mxu0 %v3006_v4  ;;  %3936 = vst [vmem:[#allocation4_spill] sm:$0xff] %v3135_v24  ;;  %v3138_v25 = vld [vmem:[%s3093_s7 + $0x4] sm:$0xf]  ;;  %v3150_v27 = vld [vmem:[%s3900_s2 + $0xf0] sm:$0xff]  ;;  %v3176_v31 = vld [vmem:[%s3900_s2 + $0xe8] sm:$0xff] }
  0x15   : > { %2889 = vmatpush.bf16.msra.mxu3 %v3011_v5  ;;  %471 = vmatpush.bf16.msra.mxu1 %v3011_v5  ;;  %v3159_v28 = vld [vmem:[%s3900_s2 + $0x130] sm:$0xff]  ;;  %v3183_v32 = vld [vmem:[%s3900_s2 + $0x128] sm:$0xff]  ;;  %v3195_v34 = vld [vmem:[%s3900_s2 + $0xa0] sm:$0xff] }
  0x16   : > { %v3164_v29 = vld [vmem:[%s3900_s2 + $0x170] sm:$0xff]  ;;  %v3188_v33 = vld [vmem:[%s3900_s2 + $0x168] sm:$0xff]  ;;  %v3200_v35 = vld [vmem:[%s3900_s2 + $0xe0] sm:$0xff] }
  0x17   : > { %3937 = vst [vmem:[#allocation5_spill] sm:$0xff] %v3188_v33  ;;  %v3207_v36 = vld [vmem:[%s3900_s2 + $0x120] sm:$0xff]  ;;  %v3219_v38 = vld [vmem:[%s3900_s2 + $0x98] sm:$0xff]  ;;  %v3231_v42 = vld [vmem:[%s3093_s7 + $0x8] sm:$0xff] }
  0x18   : > { %2882 = vmatpush.bf16.msra.mxu2 %v3018_v6  ;;  %371 = vmatpush.bf16.msra.mxu0 %v3018_v6  ;;  %v3212_v37 = vld [vmem:[%s3900_s2 + $0x160] sm:$0xff]  ;;  %v3224_v39 = vld [vmem:[%s3900_s2 + $0xd8] sm:$0xff]  ;;  %3940 = vst [vmem:[#allocation8_spill] sm:$0xff] %v3231_v42  ;;  %v2640_v43 = vld [vmem:[%s3098_s10 + $0x8] sm:$0xff] }
  0x19   : > { %2890 = vmatpush.bf16.msra.mxu3 %v3025_v7  ;;  %472 = vmatpush.bf16.msra.mxu1 %v3025_v7  ;;  %3938 = vst [vmem:[#allocation6_spill] sm:$0xff] %v3212_v37  ;;  %v3227_v40 = vld [vmem:[%s3093_s7 + $0x18] sm:$0xff]  ;;  %v2728_v46 = vld [vmem:[%s3098_s10] sm:$0xff]   ;;  %v3253_v48 = vld [vmem:[%s3900_s2 + $0x90] sm:$0xff] }
  0x1a   : > { %3939 = vst [vmem:[#allocation7_spill] sm:$0xff] %v3227_v40  ;;  %v2642_v41 = vld [vmem:[%s3098_s10 + $0x18] sm:$0xff]  ;;  %v2902_v47 = vld [vmem:[%s3098_s10 + $0x4] sm:$0xff]   ;;  %v3258_v49 = vld [vmem:[%s3900_s2 + $0xd0] sm:$0xff]  ;;  %v551_v51 = vshll.u32 %v2728_v46, 16  ;;  %v549_v58 = vshrl.u32 %v2728_v46, 16 }
  0x1b   : > { %v3237_v44 = vld [vmem:[%s3900_s2 + $0x118] sm:$0xff]  ;;  %v3265_v50 = vld [vmem:[%s3900_s2 + $0x110] sm:$0xff]  ;;  %v3275_v53 = vld [vmem:[%s3098_s10 + $0x8] sm:$0xff]   ;;  %v972_v55 = vshll.u32 %v2902_v47, 16 }
  0x1c   : > { %2883 = vmatpush.bf16.msra.mxu2 %v3034_v8  ;;  %372 = vmatpush.bf16.msra.mxu0 %v3034_v8  ;;  %v3244_v45 = vld [vmem:[%s3900_s2 + $0x158] sm:$0xff]  ;;  %v3272_v52 = vld [vmem:[%s3900_s2 + $0x150] sm:$0xff]  ;;  %v3285_v56 = vld [vmem:[%s3900_s2 + $0x88] sm:$0xff]  ;;  %v553_v59 = vrot.slane %v551_v51, 1  ;;  %v556_v60 = vshll.u32 %v3275_v53, 16 }
  0x1d   : > { %2891 = vmatpush.bf16.msra.mxu3 %v3039_v9  ;;  %473 = vmatpush.bf16.msra.mxu1 %v3039_v9  ;;  %3941 = vst [vmem:[#allocation9_spill] sm:$0xff] %v3244_v45  ;;  %v3278_v54 = vld [vmem:[%s3098_s10 + $0xc] sm:$0xff]   ;;  %v3315_v46 = vld [vmem:[%s3900_s2 + $0x80] sm:$0xff] }
  0x1e   : > { %3942 = vst [vmem:[#allocation10_spill] sm:$0xff] %v3272_v52  ;;  %v3290_v57 = vld [vmem:[%s3900_s2 + $0xc8] sm:$0xff]  ;;  %v3320_v51 = vld [vmem:[%s3900_s2 + $0xc0] sm:$0xff] }
  0x1f   : > { %v3298_v61 = vld [vmem:[%s3900_s2 + $0x108] sm:$0xff] }
  0x20   : > { %2884 = vmatpush.bf16.msra.mxu2 %v3050_v10  ;;  %373 = vmatpush.bf16.msra.mxu0 %v3050_v10  ;;  %v3303_v62 = vld [vmem:[%s3900_s2 + $0x148] sm:$0xff] }
  0x21   : > { %2892 = vmatpush.bf16.msra.mxu3 %v3055_v11  ;;  %474 = vmatpush.bf16.msra.mxu1 %v3055_v11  ;;  %3943 = vst [vmem:[#allocation11_spill] sm:$0xff] %v3303_v62  ;;  %v3306_v63 = vld [vmem:[%s3093_s7 + $0x8] sm:$0xff]  }
  0x24   : > { %2885 = vmatpush.bf16.msra.mxu2 %v3068_v12  ;;  %374 = vmatpush.bf16.msra.mxu0 %v3068_v12 }
  0x25   : > { %2893 = vmatpush.bf16.msra.mxu3 %v3073_v13  ;;  %475 = vmatpush.bf16.msra.mxu1 %v3073_v13 }
  0x28   : > { %2886 = vmatpush.bf16.msra.mxu2 %v3083_v14  ;;  %375 = vmatpush.bf16.msra.mxu0 %v3083_v14 }
  0x29   : > { %2894 = vmatpush.bf16.msra.mxu3 %v3088_v15  ;;  %476 = vmatpush.bf16.msra.mxu1 %v3088_v15 }
  0x2b   : > { %386 = vmatmul.bf16.vlgmr.msra.gmra.mxu2 %v3113_v18  ;;  %376 = vmatmul.bf16.vlgmr.msra.gmra.mxu0 %v3119_v20  ;;  %v558_v18 = vrot.slane %v556_v60, 1  ;;  %v3342_v20 = vld [vmem:[%s3900_s2 + $0x140] sm:$0xff] }
  0x2c   : > { %636 = vmatpush.bf16.msrb.mxu2 %v3105_v16  ;;  %487 = vmatmul.bf16.vlgmr.msra.gmra.mxu3 %v2641_v19  ;;  %v2927_v19 = vld [vmem:[%s3093_s7 + $0x4] sm:$0xf0]   ;;  %3944 = vst [vmem:[#allocation12_spill] sm:$0xff] %v3342_v20 }
  0x2d   : > { %749 = vmatpush.bf16.msrb.mxu3 %v3110_v17  ;;  %477 = vmatmul.bf16.vlgmr.msra.gmra.mxu1 %v2639_v21  ;;  %v970_v21 = vshrl.u32 %v2902_v47, 16  ;;  %v3325_v47 = vld [vmem:[%s3900_s2 + $0x1b8] sm:$0xff] }
  0x2e   : > { %883 = vmatpush.bf16.msrb.mxu0 %v3127_v22  ;;  %1057 = vmatpush.bf16.msrb.mxu1 %v3132_v23 }
  0x30   : > { %637 = vmatpush.bf16.msrb.mxu2 %v3145_v26 }
  0x31   : > { %750 = vmatpush.bf16.msrb.mxu3 %v3150_v27 }
  0x32   : > { %884 = vmatpush.bf16.msrb.mxu0 %v3159_v28  ;;  %1058 = vmatpush.bf16.msrb.mxu1 %v3164_v29 }
  0x34   : > { %638 = vmatpush.bf16.msrb.mxu2 %v3171_v30 }
  0x35   : > { %751 = vmatpush.bf16.msrb.mxu3 %v3176_v31 }
  0x36   : > { %885 = vmatpush.bf16.msrb.mxu0 %v3183_v32  ;;  %1059 = vmatpush.bf16.msrb.mxu1 %v3188_v33 }
  0x38   : > { %639 = vmatpush.bf16.msrb.mxu2 %v3195_v34 }
  0x39   : > { %752 = vmatpush.bf16.msrb.mxu3 %v3200_v35 }
  0x3a   : > { %886 = vmatpush.bf16.msrb.mxu0 %v3207_v36  ;;  %1060 = vmatpush.bf16.msrb.mxu1 %v3212_v37  ;;  %v3424_v37 = vld [vmem:[%s3900_s2 + $0x1e0] sm:$0xff] }
  0x3b   : > { %391 = vmatmul.bf16.gmra.mxu2 %v3227_v40  ;;  %381 = vmatmul.bf16.gmra.mxu0 %v3231_v42  ;;  %v554_v40 = vor.u32 %v553_v59, %v549_v58  ;;  %v3337_v42 = vld [vmem:[%s3900_s2 + $0x100] sm:$0xff]  ;;  %v3349_v58 = vld [vmem:[%s3900_s2 + $0x238] sm:$0xff]  ;;  %3953 = vst [vmem:[#allocation21_spill] sm:$0xff] %v3424_v37 }
  0x3c   : > { %640 = vmatpush.bf16.msrb.mxu2 %v3219_v38  ;;  %492 = vmatmul.bf16.gmra.mxu3 %v2642_v41  ;;  %v974_v41 = vrot.slane %v972_v55, 1  ;;  %v3330_v55 = vld [vmem:[%s3900_s2 + $0x1f8] sm:$0xff]  ;;  %v2837_v59 = vld [vmem:[%s3098_s10 + $0x4] sm:$0xff]  }
  0x3d   : > { %753 = vmatpush.bf16.msrb.mxu3 %v3224_v39  ;;  %482 = vmatmul.bf16.gmra.mxu1 %v2640_v43  ;;  %v977_v43 = vshll.u32 %v3278_v54, 16  ;;  %v3355_v60 = vsel %vm547_vm0, %v554_v40, %v558_v18  ;;  %v3373_v40 = vld [vmem:[%s3900_s2 + $0x1f0] sm:$0xff] }
  0x3e   : > { %887 = vmatpush.bf16.msrb.mxu0 %v3237_v44  ;;  %1061 = vmatpush.bf16.msrb.mxu1 %v3244_v45  ;;  %v975_v24 = vor.u32 %v974_v41, %v970_v21  ;;  %v3358_v21 = vor.u32 %v2927_v19, %v3138_v25  ;;  %3947 = vst [vmem:[#allocation15_spill] sm:$0xff] %v3373_v40  ;;  %v3380_v25 = vld [vmem:[%s3900_s2 + $0x230] sm:$0xff]  ;;  %v3398_v19 = vld [vmem:[%s3900_s2 + $0x1e8] sm:$0xff] }
  0x3f   : > { %3948 = vst [vmem:[#allocation16_spill] sm:$0xff] %v3380_v25 }
  0x40   : > { %641 = vmatpush.bf16.msrb.mxu2 %v3253_v48  ;;  %3945 = vst [vmem:[#allocation13_spill] sm:$0xff] %v3358_v21 }
  0x41   : > { %754 = vmatpush.bf16.msrb.mxu3 %v3258_v49  ;;  %3950 = vst [vmem:[#allocation18_spill] sm:$0xff] %v3398_v19 }
  0x42   : > { %888 = vmatpush.bf16.msrb.mxu0 %v3265_v50  ;;  %1062 = vmatpush.bf16.msrb.mxu1 %v3272_v52  ;;  %v979_v52 = vrot.slane %v977_v43, 1  ;;  %v3368_v43 = vld [vmem:[%s3900_s2 + $0x1b0] sm:$0xff] }
  0x44   : > { %642 = vmatpush.bf16.msrb.mxu2 %v3285_v56  ;;  %v3363_v41 = vsel %vm547_vm0, %v975_v24, %v979_v52  ;;  %v3386_v24 = vld [vmem:[%s3098_s10 + $0x10] sm:$0xff]  }
  0x45   : > { %755 = vmatpush.bf16.msrb.mxu3 %v3290_v57  ;;  %3946 = vst [vmem:[#allocation14_spill] sm:$0xff] %v3363_v41 }
  0x46   : > { %889 = vmatpush.bf16.msrb.mxu0 %v3298_v61  ;;  %1063 = vmatpush.bf16.msrb.mxu1 %v3303_v62  ;;  %v981_v62 = vshrl.u32 %v3278_v54, 16  ;;  %v3431_v54 = vld [vmem:[%s3900_s2 + $0x220] sm:$0xff] }
  0x48   : > { %643 = vmatpush.bf16.msrb.mxu2 %v3315_v46  ;;  %v983_v33 = vor.u32 %v981_v62, %v979_v52  ;;  %v3458_v52 = vld [vmem:[%s3900_s2 + $0x218] sm:$0xff]  ;;  %v2839_v62 = vld [vmem:[%s3098_s10 + $0xc] sm:$0xff]  }
  0x49   : > { %756 = vmatpush.bf16.msrb.mxu3 %v3320_v51  ;;  %3957 = vst [vmem:[#allocation25_spill] sm:$0xff] %v3458_v52 }
  0x4a   : > { %890 = vmatpush.bf16.msrb.mxu0 %v3337_v42  ;;  %1064 = vmatpush.bf16.msrb.mxu1 %v3342_v20  ;;  %v564_v20 = vshll.u32 %v3386_v24, 16 }
  0x4b   : > { %644 = vmatmul.bf16.vlgmr.msrb.gmra.mxu2 %v3355_v60 }
  0x4c   : > { %1170 = vmatpush.bf16.msra.mxu2 %v3325_v47  ;;  %757 = vmatmul.bf16.vlgmr.msrb.gmra.mxu3 %v2837_v59  ;;  %v3401_v59 = vld [vmem:[%s3098_s10 + $0x14] sm:$0xff]  }
  0x4d   : > { %1304 = vmatpush.bf16.msra.mxu3 %v3330_v55  ;;  %891 = vmatmul.bf16.vlgmr.msrb.gmra.mxu0 %v3358_v21  ;;  %v560_v21 = vshrl.u32 %v3275_v53, 16  ;;  %v985_v45 = vshll.u32 %v3401_v59, 16 }
  0x4e   : > { %1478 = vmatpush.bf16.msra.mxu0 %v3349_v58  ;;  %1545 = vmatpush.bf16.msra.mxu1 %v2980_v0  ;;  %v3393_v0 = vld [vmem:[%s3900_s2 + $0x1a8] sm:$0xff] }
  0x4f   : > { %1065 = vmatmul.bf16.vlgmr.msrb.gmra.mxu1 %v3363_v41  ;;  %3949 = vst [vmem:[#allocation17_spill] sm:$0xff] %v3393_v0  ;;  %v3408_v41 = vld [vmem:[%s3900_s2 + $0x228] sm:$0xff] }
  0x50   : > { %1171 = vmatpush.bf16.msra.mxu2 %v3368_v43  ;;  %3951 = vst [vmem:[#allocation19_spill] sm:$0xff] %v3408_v41 }
  0x51   : > { %1305 = vmatpush.bf16.msra.mxu3 %v3373_v40  ;;  %v3446_v40 = vld [vmem:[%s3098_s10 + $0x18] sm:$0xff]  }
  0x52   : > { %1479 = vmatpush.bf16.msra.mxu0 %v3380_v25  ;;  %1546 = vmatpush.bf16.msra.mxu1 %v2992_v2  ;;  %v3419_v2 = vld [vmem:[%s3900_s2 + $0x1a0] sm:$0xff]  ;;  %v987_v25 = vrot.slane %v985_v45, 1 }
  0x53   : > { %3952 = vst [vmem:[#allocation20_spill] sm:$0xff] %v3419_v2  ;;  %v2934_v45 = vld [vmem:[%s3098_s10 + $0x1c] sm:$0xf0]  }
  0x54   : > { %1172 = vmatpush.bf16.msra.mxu2 %v3393_v0  ;;  %v566_v0 = vrot.slane %v564_v20, 1  ;;  %v3451_v20 = vld [vmem:[%s3098_s10 + $0x20] sm:$0xff]  }
  0x55   : > { %1306 = vmatpush.bf16.msra.mxu3 %v3398_v19  ;;  %v562_v19 = vor.u32 %v560_v21, %v558_v18  ;;  %v2933_v18 = vld [vmem:[%s3098_s10 + $0x1c] sm:$0xf]  ;;  %3956 = vst [vmem:[#allocation24_spill] sm:$0xff] %v3451_v20  ;;  %v3480_v20 = vld [vmem:[%s3900_s2 + $0x1d0] sm:$0xff] }
  0x56   : > { %1480 = vmatpush.bf16.msra.mxu0 %v3408_v41  ;;  %1547 = vmatpush.bf16.msra.mxu1 %v3006_v4  ;;  %v3438_v41 = vld [vmem:[%s3900_s2 + $0x198] sm:$0xff]  ;;  %3961 = vst [vmem:[#allocation29_spill] sm:$0xff] %v3480_v20 }
  0x57   : > { %3954 = vst [vmem:[#allocation22_spill] sm:$0xff] %v3438_v41  ;;  %v3443_v4 = vld [vmem:[%s3900_s2 + $0x1d8] sm:$0xff]  ;;  %v3462_v21 = vsel %vm547_vm0, %v562_v19, %v566_v0  ;;  %v2932_v19 = vor.u32 %v2934_v45, %v2933_v18  ;;  %v3509_v18 = vld [vmem:[%s3900_s2 + $0x208] sm:$0xff]  ;;  %v568_v45 = vshrl.u32 %v3386_v24, 16 }
  0x58   : > { %1173 = vmatpush.bf16.msra.mxu2 %v3419_v2  ;;  %3955 = vst [vmem:[#allocation23_spill] sm:$0xff] %v3443_v4  ;;  %v3468_v2 = vsel %vm547_vm0, %v983_v33, %v987_v25  ;;  %v3490_v33 = vld [vmem:[%s3900_s2 + $0x210] sm:$0xff] }
  0x59   : > { %1307 = vmatpush.bf16.msra.mxu3 %v3424_v37  ;;  %v3465_v37 = vld [vmem:[%s3093_s7 + $0xc] sm:$0xff]   ;;  %3959 = vst [vmem:[#allocation27_spill] sm:$0xff] %v3468_v2 }
  0x5a   : > { %1481 = vmatpush.bf16.msra.mxu0 %v3431_v54  ;;  %1548 = vmatpush.bf16.msra.mxu1 %v3018_v6  ;;  %3958 = vst [vmem:[#allocation26_spill] sm:$0xff] %v3465_v37  ;;  %v3475_v6 = vld [vmem:[%s3900_s2 + $0x190] sm:$0xff] }
  0x5b   : > { %3960 = vst [vmem:[#allocation28_spill] sm:$0xff] %v3475_v6  ;;  %649 = vmatmul.bf16.gmra.mxu2 %v3462_v21 }
  0x5c   : > { %1174 = vmatpush.bf16.msra.mxu2 %v3438_v41  ;;  %762 = vmatmul.bf16.gmra.mxu3 %v2839_v62  ;;  %3962 = vst [vmem:[#allocation30_spill] sm:$0xff] %v3490_v33  ;;  %v3502_v62 = vld [vmem:[%s3900_s2 + $0x1c8] sm:$0xff]  ;;  %v928_v41 = vld [vmem:[%s3098_s10 + $0x24] sm:$0x1] }
  0x5d   : > { %1308 = vmatpush.bf16.msra.mxu3 %v3443_v4  ;;  %896 = vmatmul.bf16.gmra.mxu0 %v3465_v37  ;;  %3964 = vst [vmem:[#allocation32_spill] sm:$0xff] %v3502_v62  ;;  %v989_v37 = vshrl.u32 %v3401_v59, 16  ;;  %v3531_v59 = vld [vmem:[%s3900_s2 + $0x200] sm:$0xff] }
  0x5e   : > { %1482 = vmatpush.bf16.msra.mxu0 %v3458_v52  ;;  %1549 = vmatpush.bf16.msra.mxu1 %v3034_v8  ;;  %v3497_v8 = vld [vmem:[%s3900_s2 + $0x188] sm:$0xff]  ;;  %v506_v4 = vld [vmem:[%s3098_s10 + $0x20] sm:$0x1] }
  0x5f   : > { %1070 = vmatmul.bf16.gmra.mxu1 %v3468_v2  ;;  %3963 = vst [vmem:[#allocation31_spill] sm:$0xff] %v3497_v8  ;;  %v572_v2 = vshll.u32 %v3446_v40, 16 }
  0x60   : > { %1175 = vmatpush.bf16.msra.mxu2 %v3475_v6  ;;  %v991_v6 = vor.u32 %v989_v37, %v987_v25  ;;  %v3546_v37 = vld [vmem:[%s3093_s7 + $0x14] sm:$0xff]   ;;  %v541_v25 = vunpack.c.l.b16 %v506_v4  ;;  %v3976_v4 = vld [vmem:[#allocation23_spill] sm:$0xff] }
  0x61   : > { %1309 = vmatpush.bf16.msra.mxu3 %v3480_v20  ;;  %v993_v20 = vshll.u32 %v2932_v19, 16 }
  0x62   : > { %1483 = vmatpush.bf16.msra.mxu0 %v3490_v33  ;;  %1550 = vmatpush.bf16.msra.mxu1 %v3050_v10  ;;  %v3519_v10 = vld [vmem:[%s3900_s2 + $0x180] sm:$0xff] }
  0x63   : > { %v3524_v33 = vld [vmem:[%s3900_s2 + $0x1c0] sm:$0xff]  ;;  %v995_v52 = vrot.slane %v993_v20, 1  ;;  %v963_v20 = vunpack.c.l.b16 %v928_v41  ;;  %v2711_v41 = vld [vmem:[%s3098_s10 + $0x8] sm:$0xff] }
  0x64   : > { %1176 = vmatpush.bf16.msra.mxu2 %v3497_v8  ;;  %v574_v8 = vrot.slane %v572_v2, 1 }
  0x65   : > { %1310 = vmatpush.bf16.msra.mxu3 %v3502_v62  ;;  %v570_v62 = vor.u32 %v568_v45, %v566_v0  ;;  %v3551_v2 = vsel %vm547_vm0, %v991_v6, %v995_v52 }
  0x66   : > { %1484 = vmatpush.bf16.msra.mxu0 %v3509_v18  ;;  %1551 = vmatpush.bf16.msra.mxu1 %v3068_v12  ;;  %v2841_v12 = vld [vmem:[%s3098_s10 + $0x14] sm:$0xff]  }
  0x67   : > { %v3543_v0 = vsel %vm547_vm0, %v570_v62, %v574_v8 }
  0x68   : > { %1177 = vmatpush.bf16.msra.mxu2 %v3519_v10 }
  0x69   : > { %1311 = vmatpush.bf16.msra.mxu3 %v3524_v33 }
  0x6a   : > { %1485 = vmatpush.bf16.msra.mxu0 %v3531_v59  ;;  %1552 = vmatpush.bf16.msra.mxu1 %v3083_v14  ;;  %v968_v14 = vpack.c.b16 %v963_v20, %v963_v20  ;;  %v1349_v20 = vld [vmem:[%s3098_s10 + $0x28] sm:$0x1] }
  0x6b   : > { %654 = vmatmul.bf16.gmra.mxu2 %v3543_v0 }
  0x6c   : > { %1574 = vmatpush.bf16.msrb.mxu2 %v2985_v1  ;;  %767 = vmatmul.bf16.gmra.mxu3 %v2841_v12  ;;  %v546_v1 = vpack.c.b16 %v541_v25, %v541_v25  ;;  %v3982_v12 = vld [vmem:[#allocation11_spill] sm:$0xff] }
  0x6d   : > { %1654 = vmatpush.bf16.msrb.mxu3 %v3105_v16  ;;  %901 = vmatmul.bf16.gmra.mxu0 %v3546_v37  ;;  %v576_v16 = vshrl.u32 %v3446_v40, 16  ;;  %v3983_v25 = vld [vmem:[#allocation31_spill] sm:$0xff] }
  0x6e   : > { %1691 = vmatpush.bf16.msrb.mxu0 %v3110_v17  ;;  %1728 = vmatpush.bf16.msrb.mxu1 %v3127_v22  ;;  %v997_v17 = vshrl.u32 %v2932_v19, 16  ;;  %v1001_v22 = vshll.u32 %v968_v14, 16  ;;  %v3979_v19 = vld [vmem:[#allocation28_spill] sm:$0xff]  ;;  %v3649_v14 = vld [vmem:[%s3093_s7 + $0x18] sm:$0xff]  }
  0x6f   : > { %1075 = vmatmul.bf16.gmra.mxu1 %v3551_v2 }
  0x70   : > { %1575 = vmatpush.bf16.msrb.mxu2 %v2997_v3  ;;  %v580_v3 = vshll.u32 %v546_v1, 16  ;;  %v3984_v1 = vld [vmem:[#allocation32_spill] sm:$0xff] }
  0x71   : > { %1655 = vmatpush.bf16.msrb.mxu3 %v3145_v26  ;;  %v578_v26 = vor.u32 %v576_v16, %v574_v8  ;;  %v3980_v8 = vld [vmem:[#allocation29_spill] sm:$0xff] }
  0x72   : > { %1692 = vmatpush.bf16.msrb.mxu0 %v3150_v27  ;;  %1729 = vmatpush.bf16.msrb.mxu1 %v3159_v28  ;;  %v999_v27 = vor.u32 %v997_v17, %v995_v52  ;;  %v1003_v28 = vrot.slane %v1001_v22, 1  ;;  %v3977_v52 = vld [vmem:[#allocation25_spill] sm:$0xff]  ;;  %v1384_v22 = vunpack.c.l.b16 %v1349_v20 }
  0x74   : > { %1576 = vmatpush.bf16.msrb.mxu2 %v3011_v5  ;;  %v582_v5 = vrot.slane %v580_v3, 1 }
  0x75   : > { %1656 = vmatpush.bf16.msrb.mxu3 %v3171_v30  ;;  %v2842_v30 = vld [vmem:[%s3098_s10 + $0x1c] sm:$0xff] }
  0x76   : > { %1693 = vmatpush.bf16.msrb.mxu0 %v3176_v31  ;;  %1730 = vmatpush.bf16.msrb.mxu1 %v3183_v32  ;;  %v3572_v31 = vsel %vm547_vm0, %v578_v26, %v582_v5  ;;  %v3578_v32 = vsel %vm547_vm0, %v999_v27, %v1003_v28  ;;  %v3985_v26 = vld [vmem:[#allocation12_spill] sm:$0xff] }
  0x78   : > { %1577 = vmatpush.bf16.msrb.mxu2 %v3025_v7  ;;  %v3575_v7 = vld [vmem:[%s3093_s7 + $0x1c] sm:$0xff] }
  0x79   : > { %1657 = vmatpush.bf16.msrb.mxu3 %v3195_v34  ;;  %v1393_v34 = vshll.u32 %v2711_v41, 16 }
  0x7a   : > { %1694 = vmatpush.bf16.msrb.mxu0 %v3200_v35  ;;  %1731 = vmatpush.bf16.msrb.mxu1 %v3207_v36 }
  0x7b   : > { %659 = vmatmul.bf16.gmra.mxu2 %v3572_v31  ;;  %v1395_v35 = vrot.slane %v1393_v34, 1 }
  0x7c   : > { %1578 = vmatpush.bf16.msrb.mxu2 %v3039_v9  ;;  %772 = vmatmul.bf16.gmra.mxu3 %v2842_v30  ;;  %v2712_v9 = vld [vmem:[%s3098_s10 + $0x10] sm:$0xff] }
  0x7d   : > { %1658 = vmatpush.bf16.msrb.mxu3 %v3219_v38  ;;  %906 = vmatmul.bf16.gmra.mxu0 %v3575_v7  ;;  %v1398_v36 = vshll.u32 %v2712_v9, 16 }
  0x7e   : > { %1695 = vmatpush.bf16.msrb.mxu0 %v3224_v39  ;;  %1732 = vmatpush.bf16.msrb.mxu1 %v3237_v44 }
  0x7f   : > { %1080 = vmatmul.bf16.gmra.mxu1 %v3578_v32  ;;  %v1400_v39 = vrot.slane %v1398_v36, 1 }
  0x80   : > { %1579 = vmatpush.bf16.msrb.mxu2 %v3055_v11  ;;  %v1391_v11 = vshrl.u32 %v2711_v41, 16 }
  0x81   : > { %1659 = vmatpush.bf16.msrb.mxu3 %v3253_v48  ;;  %v3965_v48 = vld [vmem:[#allocation15_spill] sm:$0xff] }
  0x82   : > { %1696 = vmatpush.bf16.msrb.mxu0 %v3258_v49  ;;  %1733 = vmatpush.bf16.msrb.mxu1 %v3265_v50  ;;  %v1396_v38 = vor.u32 %v1395_v35, %v1391_v11  ;;  %v3966_v49 = vld [vmem:[#allocation16_spill] sm:$0xff] }
  0x84   : > { %1580 = vmatpush.bf16.msrb.mxu2 %v3073_v13  ;;  %v3601_v13 = vsel %vm547_vm0, %v1396_v38, %v1400_v39  ;;  %v3667_v38 = vld [vmem:[%s3093_s7 + $0x20] sm:$0xff]  }
  0x85   : > { %1660 = vmatpush.bf16.msrb.mxu3 %v3285_v56  ;;  %v3968_v56 = vld [vmem:[#allocation17_spill] sm:$0xff] }
  0x86   : > { %1697 = vmatpush.bf16.msrb.mxu0 %v3290_v57  ;;  %1734 = vmatpush.bf16.msrb.mxu1 %v3298_v61  ;;  %v3969_v57 = vld [vmem:[#allocation18_spill] sm:$0xff]  ;;  %v3970_v61 = vld [vmem:[#allocation19_spill] sm:$0xff] }
  0x88   : > { %1581 = vmatpush.bf16.msrb.mxu2 %v3088_v15  ;;  %v2713_v15 = vld [vmem:[%s3098_s10 + $0x18] sm:$0xff] }
  0x89   : > { %1661 = vmatpush.bf16.msrb.mxu3 %v3315_v46  ;;  %v1406_v44 = vshll.u32 %v2713_v15, 16  ;;  %v3621_v46 = vld [vmem:[%s3093_s7 + $0x10] sm:$0xff]  }
  0x8a   : > { %1698 = vmatpush.bf16.msrb.mxu0 %v3320_v51  ;;  %1735 = vmatpush.bf16.msrb.mxu1 %v3337_v42  ;;  %v1402_v42 = vshrl.u32 %v2712_v9, 16  ;;  %v3971_v51 = vld [vmem:[#allocation6_spill] sm:$0xff] }
  0x8b   : > { %1178 = vmatmul.bf16.vlgmr.msra.gmra.mxu2 %v3275_v53  ;;  %v3967_v53 = vld [vmem:[#allocation5_spill] sm:$0xff] }
  0x8c   : > { %1312 = vmatmul.bf16.vlgmr.msra.gmra.mxu3 %v3306_v63  ;;  %1816 = vmatpush.bf16.msra.mxu2 %v3132_v23  ;;  %v1404_v50 = vor.u32 %v1402_v42, %v1400_v39  ;;  %v1408_v23 = vrot.slane %v1406_v44, 1  ;;  %v3986_v44 = vld [vmem:[#allocation24_spill] sm:$0xff] }
  0x8d   : > { %1486 = vmatmul.bf16.vlgmr.msra.gmra.mxu0 %v3601_v13  ;;  %1853 = vmatpush.bf16.msra.mxu3 %v3325_v47  ;;  %v3972_v47 = vld [vmem:[#allocation20_spill] sm:$0xff] }
  0x8e   : > { %1890 = vmatpush.bf16.msra.mxu0 %v3330_v55  ;;  %v3973_v55 = vld [vmem:[#allocation21_spill] sm:$0xff] }
  0x8f   : > { %1553 = vmatmul.bf16.vlgmr.msra.gmra.mxu1 %v3355_v60  ;;  %v3974_v60 = vld [vmem:[#allocation9_spill] sm:$0xff] }
  0x90   : > { %1999 = vmatpush.bf16.msra.mxu1 %v3349_v58  ;;  %1817 = vmatpush.bf16.msra.mxu2 %v3164_v29  ;;  %v3624_v29 = vsel %vm547_vm0, %v1404_v50, %v1408_v23  ;;  %v2714_v58 = vld [vmem:[%s3098_s10 + $0x20] sm:$0xff] }
  0x91   : > { %1854 = vmatpush.bf16.msra.mxu3 %v3368_v43  ;;  %v3975_v43 = vld [vmem:[#allocation22_spill] sm:$0xff]  ;;  %v1414_v6 = vshll.u32 %v2714_v58, 16  ;;  %v1418_v9 = vshrl.u32 %v2714_v58, 16 }
  0x92   : > { %1891 = vmatpush.bf16.msra.mxu0 %v3965_v48  ;;  %v3987_v48 = vld [vmem:[#allocation4_spill] sm:$0xff] }
  0x93   : > { %v1416_v45 = vrot.slane %v1414_v6, 1 }
  0x94   : > { %2000 = vmatpush.bf16.msra.mxu1 %v3966_v49  ;;  %1818 = vmatpush.bf16.msra.mxu2 %v3967_v53  ;;  %v1617_v49 = vshll.u32 %v3987_v48, 16 }
  0x95   : > { %1855 = vmatpush.bf16.msra.mxu3 %v3968_v56  ;;  %v1615_v56 = vshrl.u32 %v3987_v48, 16 }
  0x96   : > { %1892 = vmatpush.bf16.msra.mxu0 %v3969_v57  ;;  %v1619_v57 = vrot.slane %v1617_v49, 1  ;;  %v1638_v49 = vshll.u32 %v3649_v14, 16 }
  0x98   : > { %2001 = vmatpush.bf16.msra.mxu1 %v3970_v61  ;;  %1819 = vmatpush.bf16.msra.mxu2 %v3971_v51  ;;  %v1622_v61 = vshll.u32 %v3306_v63, 16  ;;  %v1620_v58 = vor.u32 %v1619_v57, %v1615_v56 }
  0x99   : > { %1856 = vmatpush.bf16.msra.mxu3 %v3972_v47 }
  0x9a   : > { %1893 = vmatpush.bf16.msra.mxu0 %v3973_v55 }
  0x9b   : > { %1183 = vmatmul.bf16.gmra.mxu2 %v3386_v24  ;;  %v3978_v24 = vld [vmem:[#allocation10_spill] sm:$0xff] }
  0x9c   : > { %2002 = vmatpush.bf16.msra.mxu1 %v3431_v54  ;;  %1317 = vmatmul.bf16.gmra.mxu3 %v3621_v46  ;;  %v1410_v54 = vshrl.u32 %v2713_v15, 16 }
  0x9d   : > { %1491 = vmatmul.bf16.gmra.mxu0 %v3624_v29  ;;  %1820 = vmatpush.bf16.msra.mxu2 %v3974_v60  ;;  %v1624_v60 = vrot.slane %v1622_v61, 1 }
  0x9e   : > { %1857 = vmatpush.bf16.msra.mxu3 %v3975_v43  ;;  %1894 = vmatpush.bf16.msra.mxu0 %v3976_v4  ;;  %v1412_v62 = vor.u32 %v1410_v54, %v1408_v23 }
  0x9f   : > { %1558 = vmatmul.bf16.gmra.mxu1 %v3462_v21  ;;  %v3981_v21 = vld [vmem:[#allocation30_spill] sm:$0xff] }
  0xa0   : > { %2003 = vmatpush.bf16.msra.mxu1 %v3977_v52  ;;  %v3652_v17 = vsel %vm547_vm0, %v1412_v62, %v1416_v45 }
  0xa1   : > { %1821 = vmatpush.bf16.msra.mxu2 %v3978_v24  ;;  %v3988_v24 = vld [vmem:[#allocation3_spill] sm:$0xff] }
  0xa2   : > { %1858 = vmatpush.bf16.msra.mxu3 %v3979_v19  ;;  %1895 = vmatpush.bf16.msra.mxu0 %v3980_v8  ;;  %v3989_v19 = vld [vmem:[#allocation13_spill] sm:$0xff]  ;;  %v3990_v8 = vld [vmem:[#allocation14_spill] sm:$0xff] }
  0xa4   : > { %2004 = vmatpush.bf16.msra.mxu1 %v3981_v21 }
  0xa5   : > { %1822 = vmatpush.bf16.msra.mxu2 %v3982_v12  ;;  %v1626_v12 = vshrl.u32 %v3306_v63, 16 }
  0xa6   : > { %1859 = vmatpush.bf16.msra.mxu3 %v3983_v25  ;;  %1896 = vmatpush.bf16.msra.mxu0 %v3984_v1  ;;  %v1630_v25 = vshll.u32 %v3621_v46, 16 }
  0xa8   : > { %2005 = vmatpush.bf16.msra.mxu1 %v3509_v18  ;;  %v377_v16 = vpop.f32.mrf.mxu0  ;;  %v1389_v18 = vpack.c.b16 %v1384_v22, %v1384_v22  ;;  %v1628_v22 = vor.u32 %v1626_v12, %v1624_v60 }
  0xa9   : > { %1823 = vmatpush.bf16.msra.mxu2 %v3985_v26  ;;  %v1632_v26 = vrot.slane %v1630_v25, 1  ;;  %v1642_v25 = vshrl.u32 %v3649_v14, 16 }
  0xaa   : > { %v478_v3 = vpop.f32.mrf.mxu1  ;;  %1860 = vmatpush.bf16.msra.mxu3 %v3519_v10  ;;  %1897 = vmatpush.bf16.msra.mxu0 %v3524_v33  ;;  %v1422_v33 = vshll.u32 %v1389_v18, 16 }
  0xab   : > { %v479_v5 = vadd.f32 %v478_v3, %v377_v16  ;;  %1188 = vmatmul.bf16.gmra.mxu2 %v3446_v40 }
  0xac   : > { %2006 = vmatpush.bf16.msra.mxu1 %v3531_v59  ;;  %1322 = vmatmul.bf16.gmra.mxu3 %v3649_v14  ;;  %v1420_v59 = vor.u32 %v1418_v9, %v1416_v45  ;;  %v1424_v11 = vrot.slane %v1422_v33, 1 }
  0xad   : > { %1496 = vmatmul.bf16.gmra.mxu0 %v3652_v17 }
  0xae   : > { %v387_v27 = vpop.f32.mrf.mxu2  ;;  %v3670_v15 = vsel %vm547_vm0, %v1420_v59, %v1424_v11  ;;  %v3991_v11 = vld [vmem:[#allocation8_spill] sm:$0xff] }
  0xaf   : > { %1563 = vmatmul.bf16.gmra.mxu1 %v3543_v0  ;;  %v488_v28 = vpop.f32.mrf.mxu3 }
  0xb0   : > { %v3662_v30 = vadd.f32 %v488_v28, %v387_v27  ;;  %v379_v10 = vpop.f32.mrf.mxu0 }
  0xb2   : > { %v480_v41 = vpop.f32.mrf.mxu1 }
  0xb3   : > { %v481_v34 = vadd.f32 %v480_v41, %v379_v10  ;;  %v1633_v41 = vsel %vm547_vm0, %v1628_v22, %v1632_v26 }
  0xb6   : > { %v389_v40 = vpop.f32.mrf.mxu2 }
  0xb7   : > { %v490_v35 = vpop.f32.mrf.mxu3 }
  0xb8   : > { %v3664_v36 = vadd.f32 %v490_v35, %v389_v40  ;;  %v382_v39 = vpop.f32.mrf.mxu0  ;;  %v3992_v40 = vld [vmem:[#allocation26_spill] sm:$0xff]  ;;  %v3993_v35 = vld [vmem:[#allocation27_spill] sm:$0xff] }
  0xba   : > { %v483_v0 = vpop.f32.mrf.mxu1 }
  0xbb   : > { %v484_v42 = vadd.f32 %v483_v0, %v382_v39  ;;  %1193 = vmatmul.bf16.gmra.mxu2 %v3986_v44 }
  0xbc   : > { %1327 = vmatmul.bf16.gmra.mxu3 %v3667_v38 }
  0xbd   : > { %1501 = vmatmul.bf16.gmra.mxu0 %v3670_v15 }
  0xbe   : > { %v392_v50 = vpop.f32.mrf.mxu2 }
  0xbf   : > { %1568 = vmatmul.bf16.gmra.mxu1 %v3572_v31  ;;  %v493_v23 = vpop.f32.mrf.mxu3  ;;  %v1625_v31 = vsel %vm547_vm0, %v1620_v58, %v1624_v60 }
  0xc0   : > { %v3677_v53 = vadd.f32 %v493_v23, %v392_v50  ;;  %v384_v51 = vpop.f32.mrf.mxu0 }
  0xc2   : > { %v485_v47 = vpop.f32.mrf.mxu1 }
  0xc3   : > { %v486_v55 = vadd.f32 %v485_v47, %v384_v51  ;;  %v1640_v51 = vrot.slane %v1638_v49, 1  ;;  %v1604_v47 = vld [vmem:[%s3093_s7 + $0x20] sm:$0x1] }
  0xc6   : > { %v394_v43 = vpop.f32.mrf.mxu2 }
  0xc7   : > { %v495_v4 = vpop.f32.mrf.mxu3 }
  0xc8   : > { %v3681_v52 = vadd.f32 %v495_v4, %v394_v43 }
  0xca   : > { %v892_v54 = vpop.f32.mrf.mxu0 }
  0xcb   : > { %1582 = vmatmul.bf16.vlgmr.msrb.gmra.mxu2 %v3988_v24 }
  0xcc   : > { %v1066_v6 = vpop.f32.mrf.mxu1  ;;  %1662 = vmatmul.bf16.vlgmr.msrb.gmra.mxu3 %v1625_v31 }
  0xcd   : > { %1699 = vmatmul.bf16.vlgmr.msrb.gmra.mxu0 %v3989_v19 }
  0xce   : > { %v645_v21 = vpop.f32.mrf.mxu2 }
  0xcf   : > { %1736 = vmatmul.bf16.vlgmr.msrb.gmra.mxu1 %v3990_v8  ;;  %v758_v62 = vpop.f32.mrf.mxu3  ;;  %v665_v45 = vadd.f32 %v645_v21, %v479_v5  ;;  %v3994_v8 = vld [vmem:[#allocation2_spill] sm:$0xff] }
  0xd1   : > { %v778_v20 = vadd.f32 %v758_v62, %v665_v45 }
  0xd2   : > { %v894_v1 = vpop.f32.mrf.mxu0 }
  0xd3   : > { %v912_v3 = vadd.f32 %v892_v54, %v778_v20  ;;  %v1608_v54 = vunpack.c.l.b16 %v1604_v47 }
  0xd4   : > { %v1068_v16 = vpop.f32.mrf.mxu1 }
  0xd5   : > { %v3689_v18 = vadd.f32 %v1066_v6, %v912_v3  ;;  %v1613_v21 = vpack.c.b16 %v1608_v54, %v1608_v54 }
  0xd6   : > { %v647_v27 = vpop.f32.mrf.mxu2 }
  0xd7   : > { %v760_v28 = vpop.f32.mrf.mxu3  ;;  %v666_v10 = vadd.f32 %v647_v27, %v481_v34  ;;  %v1634_v34 = vshrl.u32 %v3621_v46, 16  ;;  %v1646_v20 = vshll.u32 %v1613_v21, 16 }
  0xd9   : > { %v779_v9 = vadd.f32 %v760_v28, %v666_v10  ;;  %v1636_v61 = vor.u32 %v1634_v34, %v1632_v26  ;;  %v1644_v26 = vor.u32 %v1642_v25, %v1640_v51 }
  0xda   : > { %v897_v33 = vpop.f32.mrf.mxu0 }
  0xdb   : > { %v913_v59 = vadd.f32 %v894_v1, %v779_v9  ;;  %1587 = vmatmul.bf16.gmra.mxu2 %v3991_v11  ;;  %v1641_v31 = vsel %vm547_vm0, %v1636_v61, %v1640_v51 }
  0xdc   : > { %v1071_v5 = vpop.f32.mrf.mxu1  ;;  %1667 = vmatmul.bf16.gmra.mxu3 %v1633_v41  ;;  %v2873_v41 = vld [vmem:[%s3093_s7 + $0x4] sm:$0xff]  }
  0xdd   : > { %1704 = vmatmul.bf16.gmra.mxu0 %v3992_v40  ;;  %v3695_v39 = vadd.f32 %v1068_v16, %v913_v59  ;;  %v2723_v59 = vld [vmem:[%s3093_s7 + $0x8] sm:$0xff] }
  0xde   : > { %v650_v0 = vpop.f32.mrf.mxu2  ;;  %v3995_v40 = vld [vmem:[#allocation7_spill] sm:$0xff] }
  0xdf   : > { %1741 = vmatmul.bf16.gmra.mxu1 %v3993_v35  ;;  %v763_v44 = vpop.f32.mrf.mxu3  ;;  %v667_v48 = vadd.f32 %v650_v0, %v484_v42  ;;  %v2875_v35 = vld [vmem:[%s3093_s7 + $0xc] sm:$0xff]   ;;  %v1779_v0 = vshll.u32 %v2873_v41, 16 }
  0xe1   : > { %v780_v50 = vadd.f32 %v763_v44, %v667_v48  ;;  %v2724_v44 = vld [vmem:[%s3093_s7 + $0x10] sm:$0xff]  ;;  %v1962_v48 = vshll.u32 %v2723_v59, 16 }
  0xe2   : > { %v899_v23 = vpop.f32.mrf.mxu0 }
  0xe3   : > { %v914_v57 = vadd.f32 %v897_v33, %v780_v50 }
  0xe4   : > { %v1073_v56 = vpop.f32.mrf.mxu1 }
  0xe5   : > { %v3700_v58 = vadd.f32 %v1071_v5, %v914_v57  ;;  %v1784_v57 = vshll.u32 %v2875_v35, 16 }
  0xe6   : > { %v652_v60 = vpop.f32.mrf.mxu2 }
  0xe7   : > { %v765_v43 = vpop.f32.mrf.mxu3  ;;  %v668_v4 = vadd.f32 %v652_v60, %v486_v55  ;;  %v1960_v60 = vshrl.u32 %v2723_v59, 16 }
  0xe9   : > { %v781_v42 = vadd.f32 %v765_v43, %v668_v4  ;;  %v1967_v43 = vshll.u32 %v2724_v44, 16 }
  0xea   : > { %v902_v6 = vpop.f32.mrf.mxu0 }
  0xeb   : > { %v915_v19 = vadd.f32 %v899_v23, %v781_v42  ;;  %1592 = vmatmul.bf16.gmra.mxu2 %v3994_v8  ;;  %v1777_v23 = vshrl.u32 %v2873_v41, 16  ;;  %v1969_v42 = vrot.slane %v1967_v43, 1 }
  0xec   : > { %v1076_v24 = vpop.f32.mrf.mxu1  ;;  %1672 = vmatmul.bf16.gmra.mxu3 %v1641_v31  ;;  %v1786_v31 = vrot.slane %v1784_v57, 1 }
  0xed   : > { %1709 = vmatmul.bf16.gmra.mxu0 %v3546_v37  ;;  %v3706_v62 = vadd.f32 %v1073_v56, %v915_v19  ;;  %v1648_v37 = vrot.slane %v1646_v20, 1  ;;  %v1781_v56 = vrot.slane %v1779_v0, 1  ;;  %v2877_v20 = vld [vmem:[%s3093_s7 + $0x14] sm:$0xff]  }
  0xee   : > { %v655_v45 = vpop.f32.mrf.mxu2  ;;  %v1796_v57 = vshrl.u32 %v2877_v20, 16 }
  0xef   : > { %1746 = vmatmul.bf16.gmra.mxu1 %v3551_v2  ;;  %v768_v55 = vpop.f32.mrf.mxu3  ;;  %v669_v12 = vadd.f32 %v655_v45, %v3662_v30  ;;  %v1649_v30 = vsel %vm547_vm0, %v1644_v26, %v1648_v37  ;;  %v1782_v4 = vor.u32 %v1781_v56, %v1777_v23  ;;  %v1788_v26 = vshrl.u32 %v2875_v35, 16 }
  0xf0   : > { %v1792_v37 = vshll.u32 %v2877_v20, 16 }
  0xf1   : > { %v782_v1 = vadd.f32 %v768_v55, %v669_v12  ;;  %v1787_v8 = vsel %vm547_vm0, %v1782_v4, %v1786_v31 }
  0xf2   : > { %v904_v16 = vpop.f32.mrf.mxu0 }
  0xf3   : > { %v916_v22 = vadd.f32 %v902_v6, %v782_v1  ;;  %v2725_v1 = vld [vmem:[%s3093_s7 + $0x18] sm:$0xff] }
  0xf4   : > { %v1078_v3 = vpop.f32.mrf.mxu1  ;;  %v1975_v41 = vshll.u32 %v2725_v1, 16 }
  0xf5   : > { %v3710_v2 = vadd.f32 %v1076_v24, %v916_v22 }
  0xf6   : > { %v657_v27 = vpop.f32.mrf.mxu2 }
  0xf7   : > { %v770_v28 = vpop.f32.mrf.mxu3  ;;  %v670_v10 = vadd.f32 %v657_v27, %v3664_v36 }
  0xf9   : > { %v783_v9 = vadd.f32 %v770_v28, %v670_v10 }
  0xfa   : > { %v907_v33 = vpop.f32.mrf.mxu0 }
  0xfb   : > { %v917_v11 = vadd.f32 %v904_v16, %v783_v9  ;;  %1597 = vmatmul.bf16.gmra.mxu2 %v3995_v40  ;;  %v1794_v9 = vrot.slane %v1792_v37, 1 }
  0xfc   : > { %v1081_v5 = vpop.f32.mrf.mxu1  ;;  %1677 = vmatmul.bf16.gmra.mxu3 %v1649_v30  ;;  %v1971_v30 = vshrl.u32 %v2724_v44, 16 }
  0xfd   : > { %1714 = vmatmul.bf16.gmra.mxu0 %v3575_v7  ;;  %v3721_v36 = vadd.f32 %v1078_v3, %v917_v11  ;;  %v1964_v7 = vrot.slane %v1962_v48, 1 }
  0xfe   : > { %v660_v34 = vpop.f32.mrf.mxu2 }
  0xff   : > { %1751 = vmatmul.bf16.gmra.mxu1 %v3578_v32  ;;  %v773_v49 = vpop.f32.mrf.mxu3  ;;  %v671_v50 = vadd.f32 %v660_v34, %v3677_v53  ;;  %v1965_v54 = vor.u32 %v1964_v7, %v1960_v60  ;;  %v1979_v7 = vshrl.u32 %v2725_v1, 16 }
 0x101   : > { %v784_v61 = vadd.f32 %v773_v49, %v671_v50  ;;  %v1970_v12 = vsel %vm547_vm0, %v1965_v54, %v1969_v42  ;;  %v2878_v49 = vld [vmem:[%s3093_s7 + $0x1c] sm:$0xff]   ;;  %v1766_v54 = vld [vmem:[%s3093_s7 + $0x24] sm:$0x1] }
 0x102   : > { %v909_v51 = vpop.f32.mrf.mxu0  ;;  %v2726_v50 = vld [vmem:[%s3093_s7 + $0x20] sm:$0xff]  ;;  %v1804_v37 = vshrl.u32 %v2878_v49, 16 }
 0x103   : > { %v918_v32 = vadd.f32 %v907_v33, %v784_v61  ;;  %v1973_v33 = vor.u32 %v1971_v30, %v1969_v42  ;;  %v1800_v61 = vshll.u32 %v2878_v49, 16  ;;  %v1983_v43 = vshll.u32 %v2726_v50, 16 }
 0x104   : > { %v1083_v47 = vpop.f32.mrf.mxu1 }
 0x105   : > { %v3724_v6 = vadd.f32 %v1081_v5, %v918_v32  ;;  %v1977_v5 = vrot.slane %v1975_v41, 1  ;;  %v1802_v32 = vrot.slane %v1800_v61, 1 }
 0x106   : > { %v662_v24 = vpop.f32.mrf.mxu2 }
 0x107   : > { %v775_v53 = vpop.f32.mrf.mxu3  ;;  %v672_v19 = vadd.f32 %v662_v24, %v3681_v52  ;;  %v1978_v44 = vsel %vm547_vm0, %v1973_v33, %v1977_v5  ;;  %v1981_v4 = vor.u32 %v1979_v7, %v1977_v5 }
 0x109   : > { %v785_v21 = vadd.f32 %v775_v53, %v672_v19  ;;  %v1935_v53 = vld [vmem:[%s3093_s7 + $0x28] sm:$0x1] }
 0x10a   : > { %v1487_v45 = vpop.f32.mrf.mxu0  ;;  %v1953_v20 = vunpack.c.l.b16 %v1935_v53 }
 0x10b   : > { %v919_v25 = vadd.f32 %v909_v51, %v785_v21  ;;  %1824 = vmatmul.bf16.vlgmr.msra.gmra.mxu2 %v1787_v8  ;;  %v1770_v8 = vunpack.c.l.b16 %v1766_v54 }
 0x10c   : > { %v3728_v55 = vpop.f32.mrf.mxu1  ;;  %1861 = vmatmul.bf16.vlgmr.msra.gmra.mxu3 %v3306_v63 }
 0x10d   : > { %1898 = vmatmul.bf16.vlgmr.msra.gmra.mxu0 %v3601_v13  ;;  %v3735_v16 = vadd.f32 %v1083_v47, %v919_v25  ;;  %v1790_v13 = vor.u32 %v1788_v26, %v1786_v31  ;;  %v1985_v31 = vrot.slane %v1983_v43, 1 }
 0x10e   : > { %v1179_v52 = vpop.f32.mrf.mxu2 }
 0x10f   : > { %2007 = vmatmul.bf16.vlgmr.msra.gmra.mxu1 %v1970_v12  ;;  %v1313_v3 = vpop.f32.mrf.mxu3  ;;  %v1199_v22 = vadd.f32 %v1179_v52, %v3689_v18  ;;  %v1795_v40 = vsel %vm547_vm0, %v1790_v13, %v1794_v9  ;;  %v1986_v25 = vsel %vm547_vm0, %v1981_v4, %v1985_v31  ;;  %v1775_v52 = vpack.c.b16 %v1770_v8, %v1770_v8 }
 0x110   : > { %v1987_v13 = vshrl.u32 %v2726_v50, 16 }
 0x111   : > { %v1333_v27 = vadd.f32 %v1313_v3, %v1199_v22 }
 0x112   : > { %v1489_v28 = vpop.f32.mrf.mxu0 }
 0x113   : > { %v3740_v63 = vadd.f32 %v1487_v45, %v1333_v27  ;;  %v1808_v27 = vshll.u32 %v1775_v52, 16 }
 0x114   : > { %v3738_v10 = vpop.f32.mrf.mxu1 }
 0x115   : > { %v1810_v5 = vrot.slane %v1808_v27, 1 }
 0x116   : > { %v1181_v59 = vpop.f32.mrf.mxu2 }
 0x117   : > { %v1315_v11 = vpop.f32.mrf.mxu3  ;;  %v1200_v18 = vadd.f32 %v1181_v59, %v3695_v39 }
 0x119   : > { %v1334_v35 = vadd.f32 %v1315_v11, %v1200_v18 }
 0x11a   : > { %v1492_v0 = vpop.f32.mrf.mxu0 }
 0x11b   : > { %v3747_v34 = vadd.f32 %v1489_v28, %v1334_v35  ;;  %1829 = vmatmul.bf16.gmra.mxu2 %v1795_v40 }
 0x11c   : > { %v3744_v48 = vpop.f32.mrf.mxu1  ;;  %1866 = vmatmul.bf16.gmra.mxu3 %v3621_v46 }
 0x11d   : > { %1903 = vmatmul.bf16.gmra.mxu0 %v3624_v29  ;;  %v1798_v29 = vor.u32 %v1796_v57, %v1794_v9 }
 0x11e   : > { %v1184_v39 = vpop.f32.mrf.mxu2 }
 0x11f   : > { %2012 = vmatmul.bf16.gmra.mxu1 %v1978_v44  ;;  %v1318_v23 = vpop.f32.mrf.mxu3  ;;  %v1201_v56 = vadd.f32 %v1184_v39, %v3700_v58  ;;  %v1803_v19 = vsel %vm547_vm0, %v1798_v29, %v1802_v32 }
 0x121   : > { %v1335_v51 = vadd.f32 %v1318_v23, %v1201_v56 }
 0x122   : > { %v1494_v47 = vpop.f32.mrf.mxu0 }
 0x123   : > { %v3756_v46 = vadd.f32 %v1492_v0, %v1335_v51 }
 0x124   : > { %v3754_v60 = vpop.f32.mrf.mxu1 }
 0x126   : > { %v1186_v42 = vpop.f32.mrf.mxu2 }
 0x127   : > { %v1320_v24 = vpop.f32.mrf.mxu3  ;;  %v1202_v58 = vadd.f32 %v1186_v42, %v3706_v62  ;;  %v1958_v62 = vpack.c.b16 %v1953_v20, %v1953_v20 }
 0x129   : > { %v1336_v21 = vadd.f32 %v1320_v24, %v1202_v58  ;;  %v1991_v9 = vshll.u32 %v1958_v62, 16 }
 0x12a   : > { %v1497_v45 = vpop.f32.mrf.mxu0 }
 0x12b   : > { %v3765_v1 = vadd.f32 %v1494_v47, %v1336_v21  ;;  %1834 = vmatmul.bf16.gmra.mxu2 %v1803_v19  ;;  %v1993_v59 = vrot.slane %v1991_v9, 1 }
 0x12c   : > { %v3762_v12 = vpop.f32.mrf.mxu1  ;;  %1871 = vmatmul.bf16.gmra.mxu3 %v3649_v14  ;;  %v1806_v14 = vor.u32 %v1804_v37, %v1802_v32 }
 0x12d   : > { %1908 = vmatmul.bf16.gmra.mxu0 %v3652_v17  ;;  %v1989_v17 = vor.u32 %v1987_v13, %v1985_v31 }
 0x12e   : > { %v1189_v3 = vpop.f32.mrf.mxu2 }
 0x12f   : > { %2017 = vmatmul.bf16.gmra.mxu1 %v1986_v25  ;;  %v1323_v22 = vpop.f32.mrf.mxu3  ;;  %v1203_v26 = vadd.f32 %v1189_v3, %v3710_v2  ;;  %v1811_v2 = vsel %vm547_vm0, %v1806_v14, %v1810_v5  ;;  %v1994_v49 = vsel %vm547_vm0, %v1989_v17, %v1993_v59 }
 0x131   : > { %v1337_v28 = vadd.f32 %v1323_v22, %v1203_v26 }
 0x132   : > { %v1499_v30 = vpop.f32.mrf.mxu0 }
 0x133   : > { %v3772_v33 = vadd.f32 %v1497_v45, %v1337_v28 }
 0x134   : > { %v3770_v41 = vpop.f32.mrf.mxu1 }
 0x136   : > { %v1191_v11 = vpop.f32.mrf.mxu2 }
 0x137   : > { %v1325_v18 = vpop.f32.mrf.mxu3  ;;  %v1204_v40 = vadd.f32 %v1191_v11, %v3721_v36 }
 0x139   : > { %v1338_v35 = vadd.f32 %v1325_v18, %v1204_v40 }
 0x13a   : > { %v1502_v0 = vpop.f32.mrf.mxu0 }
 0x13b   : > { %v3777_v39 = vadd.f32 %v1499_v30, %v1338_v35  ;;  %1839 = vmatmul.bf16.gmra.mxu2 %v1811_v2 }
 0x13c   : > { %v1569_v44 = vpop.f32.mrf.mxu1  ;;  %1876 = vmatmul.bf16.gmra.mxu3 %v3667_v38 }
 0x13d   : > { %1913 = vmatmul.bf16.gmra.mxu0 %v3670_v15 }
 0x13e   : > { %v1194_v50 = vpop.f32.mrf.mxu2 }
 0x13f   : > { %2022 = vmatmul.bf16.gmra.mxu1 %v1994_v49  ;;  %v1328_v23 = vpop.f32.mrf.mxu3  ;;  %v1205_v56 = vadd.f32 %v1194_v50, %v3724_v6 }
 0x141   : > { %v1339_v36 = vadd.f32 %v1328_v23, %v1205_v56 }
 0x142   : > { %v1504_v57 = vpop.f32.mrf.mxu0 }
 0x143   : > { %v3784_v51 = vadd.f32 %v1502_v0, %v1339_v36 }
 0x144   : > { %v3782_v61 = vpop.f32.mrf.mxu1 }
 0x146   : > { %v1196_v47 = vpop.f32.mrf.mxu2 }
 0x147   : > { %v1330_v7 = vpop.f32.mrf.mxu3  ;;  %v1206_v43 = vadd.f32 %v1196_v47, %v3735_v16 }
 0x149   : > { %v1340_v29 = vadd.f32 %v1330_v7, %v1206_v43 }
 0x14a   : > { %v1700_v32 = vpop.f32.mrf.mxu0 }
 0x14b   : > { %v3787_v4 = vadd.f32 %v1504_v57, %v1340_v29 }
 0x14c   : > { %v1737_v38 = vpop.f32.mrf.mxu1 }
 0x14e   : > { %v1583_v15 = vpop.f32.mrf.mxu2 }
 0x14f   : > { %v1663_v31 = vpop.f32.mrf.mxu3  ;;  %v1584_v54 = vadd.f32 %v1583_v15, %v3728_v55 }
 0x151   : > { %v1683_v6 = vadd.f32 %v1663_v31, %v1584_v54 }
 0x152   : > { %v1702_v42 = vpop.f32.mrf.mxu0 }
 0x153   : > { %v1720_v53 = vadd.f32 %v1700_v32, %v1683_v6 }
 0x154   : > { %v1739_v24 = vpop.f32.mrf.mxu1 }
 0x155   : > { %v1757_v58 = vadd.f32 %v1737_v38, %v1720_v53 }
 0x156   : > { %v1585_v19 = vpop.f32.mrf.mxu2 }
 0x157   : > { %v1665_v8 = vpop.f32.mrf.mxu3  ;;  %v1586_v7 = vadd.f32 %v1585_v19, %v3738_v10  ;;  %v3829_v10 = vld [vmem:[%s3902_s4] ss:$0 sm:$0xff] }
 0x159   : > { %v1684_v32 = vadd.f32 %v1665_v8, %v1586_v7 }
 0x15a   : > { %v1705_v21 = vpop.f32.mrf.mxu0 }
 0x15b   : > { %v1721_v54 = vadd.f32 %v1702_v42, %v1684_v32 }
 0x15c   : > { %v1742_v45 = vpop.f32.mrf.mxu1 }
 0x15e   : > { %v1588_v25 = vpop.f32.mrf.mxu2 }
 0x15f   : > { %v1668_v16 = vpop.f32.mrf.mxu3  ;;  %v1589_v20 = vadd.f32 %v1588_v25, %v3744_v48  ;;  %v1758_v25 = vadd.f32 %v1739_v24, %v1721_v54 }
 0x161   : > { %v1685_v52 = vadd.f32 %v1668_v16, %v1589_v20 }
 0x162   : > { %v3791_v62 = vpop.f32.mrf.mxu0 }
 0x163   : > { %v1722_v22 = vadd.f32 %v1705_v21, %v1685_v52 }
 0x164   : > { %v3793_v3 = vpop.f32.mrf.mxu1 }
 0x165   : > { %v3795_v55 = vadd.f32 %v1742_v45, %v1722_v22 }
 0x166   : > { %v1590_v26 = vpop.f32.mrf.mxu2 }
 0x167   : > { %v1670_v37 = vpop.f32.mrf.mxu3  ;;  %v1591_v22 = vadd.f32 %v1590_v26, %v3754_v60 }
 0x16a   : > { %v1710_v27 = vpop.f32.mrf.mxu0 }
 0x16c   : > { %v1747_v28 = vpop.f32.mrf.mxu1 }
 0x16e   : > { %v1593_v30 = vpop.f32.mrf.mxu2 }
 0x16f   : > { %v1673_v13 = vpop.f32.mrf.mxu3  ;;  %v1594_v9 = vadd.f32 %v1593_v30, %v3762_v12 }
 0x171   : > { %v1687_v14 = vadd.f32 %v1673_v13, %v1594_v9 }
 0x172   : > { %v3798_v5 = vpop.f32.mrf.mxu0 }
 0x173   : > { %v1724_v17 = vadd.f32 %v1710_v27, %v1687_v14 }
 0x174   : > { %v3800_v48 = vpop.f32.mrf.mxu1 }
 0x175   : > { %v3802_v59 = vadd.f32 %v1747_v28, %v1724_v17  ;;  %v1686_v17 = vadd.f32 %v1670_v37, %v1591_v22 }
 0x176   : > { %v3804_v11 = vpop.f32.mrf.mxu2 }
 0x177   : > { %v3806_v18 = vpop.f32.mrf.mxu3 }
 0x17a   : > { %v1715_v40 = vpop.f32.mrf.mxu0 }
 0x17c   : > { %v1752_v2 = vpop.f32.mrf.mxu1 }
 0x17e   : > { %v1598_v35 = vpop.f32.mrf.mxu2 }
 0x17f   : > { %v1678_v0 = vpop.f32.mrf.mxu3  ;;  %v1599_v49 = vadd.f32 %v1598_v35, %v1569_v44  ;;  %v3822_v44 = vld [vmem:[%s3901_s3] ss:$0 sm:$0xff] }
 0x180   : > { %v1518_v45 = vmul.f32 %v3822_v44, %v3740_v63  ;;  %v1519_v9 = vmul.f32 %v3822_v44, %v3747_v34  ;;  %v1520_v37 = vmul.f32 %v3822_v44, %v3756_v46  ;;  %v1596_v46 = vadd.f32 %v3804_v11, %v3770_v41 }
 0x181   : > { %v1689_v50 = vadd.f32 %v1678_v0, %v1599_v49 }
 0x182   : > { %v3808_v23 = vpop.f32.mrf.mxu0  ;;  %v1529_v52 = vadd.f32 %v3829_v10, %v1518_v45  ;;  %v1530_v49 = vadd.f32 %v3829_v10, %v1519_v9 }
 0x183   : > { %v1726_v56 = vadd.f32 %v1715_v40, %v1689_v50  ;;  %v1723_v50 = vadd.f32 %v3791_v62, %v1686_v17  ;;  %v1531_v62 = vadd.f32 %v3829_v10, %v1520_v37 }
 0x184   : > { %v3810_v12 = vpop.f32.mrf.mxu1  ;;  %v1537_v13 = vmax.f32 %v1529_v52, 0.0 }
 0x185   : > { %v3812_v36 = vadd.f32 %v1752_v2, %v1726_v56  ;;  %v1760_v54 = vadd.f32 %v3793_v3, %v1723_v50 }
 0x186   : > { %v3814_v57 = vpop.f32.mrf.mxu2 }
 0x187   : > { %v3816_v47 = vpop.f32.mrf.mxu3 }
 0x18a   : > { %v1899_v43 = vpop.f32.mrf.mxu0 }
 0x18c   : > { %v2008_v29 = vpop.f32.mrf.mxu1 }
 0x18e   : > { %v1825_v38 = vpop.f32.mrf.mxu2 }
 0x18f   : > { %v1862_v15 = vpop.f32.mrf.mxu3  ;;  %v1845_v31 = vadd.f32 %v1825_v38, %v1757_v58 }
 0x191   : > { %v1882_v6 = vadd.f32 %v1862_v15, %v1845_v31 }
 0x192   : > { %v1901_v53 = vpop.f32.mrf.mxu0 }
 0x193   : > { %v1919_v19 = vadd.f32 %v1899_v43, %v1882_v6  ;;  %v1538_v43 = vmax.f32 %v1530_v49, 0.0 }
 0x194   : > { %v2010_v21 = vpop.f32.mrf.mxu1 }
 0x195   : > { %v2028_v8 = vadd.f32 %v2008_v29, %v1919_v19 }
 0x196   : > { %v1827_v16 = vpop.f32.mrf.mxu2 }
 0x197   : > { %v1864_v20 = vpop.f32.mrf.mxu3  ;;  %v2036_v42 = vmul.f32 %v3822_v44, %v2028_v8  ;;  %v1846_v58 = vadd.f32 %v1827_v16, %v1758_v25  ;;  %v1539_v25 = vmax.f32 %v1531_v62, 0.0  ;;  %v1521_v16 = vmul.f32 %v3822_v44, %v3765_v1 }
 0x199   : > { %v2044_v27 = vadd.f32 %v3829_v10, %v2036_v42  ;;  %v1883_v63 = vadd.f32 %v1864_v20, %v1846_v58  ;;  %v1688_v58 = vadd.f32 %v3806_v18, %v1596_v46  ;;  %v1532_v41 = vadd.f32 %v3829_v10, %v1521_v16 }
 0x19a   : > { %v1904_v28 = vpop.f32.mrf.mxu0  ;;  %v1522_v18 = vmul.f32 %v3822_v44, %v3772_v33  ;;  %v1601_v33 = vadd.f32 %v3814_v57, %v3782_v61 }
 0x19b   : > { %v2052_v14 = vmax.f32 %v2044_v27, 0.0  ;;  %v1920_v24 = vadd.f32 %v1901_v53, %v1883_v63  ;;  %v1725_v9 = vadd.f32 %v3798_v5, %v1688_v58 }
 0x19c   : > { %v2013_v30 = vpop.f32.mrf.mxu1 }
 0x19d   : > { %v2060_v40 = vmax.f32 %v1537_v13, %v2052_v14  ;;  %v2029_v2 = vadd.f32 %v2010_v21, %v1920_v24  ;;  %v1540_v24 = vmax.f32 %v1532_v41, 0.0  ;;  %v1762_v49 = vadd.f32 %v3800_v48, %v1725_v9 }
 0x19e   : > { %v1830_v35 = vpop.f32.mrf.mxu2  ;;  %v1523_v48 = vmul.f32 %v3822_v44, %v3777_v39  ;;  %v1525_v41 = vmul.f32 %v3822_v44, %v3787_v4 }
 0x19f   : > { %v1867_v0 = vpop.f32.mrf.mxu3  ;;  %v2037_v60 = vmul.f32 %v3822_v44, %v2029_v2  ;;  %v1847_v26 = vadd.f32 %v1830_v35, %v3795_v55 }
 0x1a0   : > { %v1534_v62 = vadd.f32 %v3829_v10, %v1523_v48 }
 0x1a1   : > { %v2045_v56 = vadd.f32 %v3829_v10, %v2037_v60  ;;  %v1884_v7 = vadd.f32 %v1867_v0, %v1847_v26 }
 0x1a2   : > { %v1906_v34 = vpop.f32.mrf.mxu0 }
 0x1a3   : > { %v2053_v29 = vmax.f32 %v2045_v56, 0.0  ;;  %v1921_v32 = vadd.f32 %v1904_v28, %v1884_v7 }
 0x1a4   : > { %v2015_v38 = vpop.f32.mrf.mxu1 }
 0x1a5   : > { %v2061_v15 = vmax.f32 %v1538_v43, %v2053_v29  ;;  %v2030_v31 = vadd.f32 %v2013_v30, %v1921_v32 }
 0x1a6   : > { %v1832_v6 = vpop.f32.mrf.mxu2 }
 0x1a7   : > { %v1869_v55 = vpop.f32.mrf.mxu3  ;;  %v2068_v53 = vmax.f32 %v2060_v40, %v2061_v15  ;;  %v2038_v21 = vmul.f32 %v3822_v44, %v2030_v31  ;;  %v1848_v45 = vadd.f32 %v1832_v6, %v1760_v54  ;;  %v1690_v15 = vadd.f32 %v3816_v47, %v1601_v33 }
 0x1a8   : > { %v1524_v47 = vmul.f32 %v3822_v44, %v3784_v51 }
 0x1a9   : > { %v2072_v19 = vpack.c.bf16 %v2068_v53, %v2068_v53  ;;  %v2046_v3 = vadd.f32 %v3829_v10, %v2038_v21  ;;  %v1885_v8 = vadd.f32 %v1869_v55, %v1848_v45  ;;  %v1727_v21 = vadd.f32 %v3808_v23, %v1690_v15 }
 0x1aa   : > { %v1909_v42 = vpop.f32.mrf.mxu0 }
 0x1ab   : > { %2076 = vst [vmem:[%s3851_s25] sm:$0x3] %v2072_v19  ;;  %v2054_v20 = vmax.f32 %v2046_v3, 0.0  ;;  %v1922_v52 = vadd.f32 %v1906_v34, %v1885_v8  ;;  %v1542_v19 = vmax.f32 %v1534_v62, 0.0 }
 0x1ac   : > { %v2018_v63 = vpop.f32.mrf.mxu1 }
 0x1ad   : > { %v2062_v22 = vmax.f32 %v1539_v25, %v2054_v20  ;;  %v2031_v27 = vadd.f32 %v2015_v38, %v1922_v52  ;;  %v1764_v20 = vadd.f32 %v3810_v12, %v1727_v21 }
 0x1ae   : > { %v1835_v28 = vpop.f32.mrf.mxu2 }
 0x1af   : > { %v1872_v30 = vpop.f32.mrf.mxu3  ;;  %v2039_v11 = vmul.f32 %v3822_v44, %v2031_v27  ;;  %v1849_v13 = vadd.f32 %v1835_v28, %v3802_v59  ;;  %v1533_v59 = vadd.f32 %v3829_v10, %v1522_v18 }
 0x1b1   : > { %v2047_v1 = vadd.f32 %v3829_v10, %v2039_v11  ;;  %v1886_v14 = vadd.f32 %v1872_v30, %v1849_v13  ;;  %v1541_v29 = vmax.f32 %v1533_v59, 0.0 }
 0x1b2   : > { %v1911_v0 = vpop.f32.mrf.mxu0 }
 0x1b3   : > { %v2055_v17 = vmax.f32 %v2047_v1, 0.0  ;;  %v1923_v40 = vadd.f32 %v1909_v42, %v1886_v14  ;;  %v1536_v14 = vadd.f32 %v3829_v10, %v1525_v41 }
 0x1b4   : > { %v2020_v7 = vpop.f32.mrf.mxu1 }
 0x1b5   : > { %v2063_v2 = vmax.f32 %v1540_v24, %v2055_v17  ;;  %v2032_v35 = vadd.f32 %v2018_v63, %v1923_v40  ;;  %v1544_v17 = vmax.f32 %v1536_v14, 0.0 }
 0x1b6   : > { %v1837_v60 = vpop.f32.mrf.mxu2 }
 0x1b7   : > { %v1874_v26 = vpop.f32.mrf.mxu3  ;;  %v2069_v5 = vmax.f32 %v2062_v22, %v2063_v2  ;;  %v2040_v50 = vmul.f32 %v3822_v44, %v2032_v35  ;;  %v1850_v56 = vadd.f32 %v1837_v60, %v1762_v49 }
 0x1b9   : > { %v2073_v34 = vpack.c.bf16 %v2069_v5, %v2069_v5  ;;  %v2048_v43 = vadd.f32 %v3829_v10, %v2040_v50  ;;  %v1887_v37 = vadd.f32 %v1874_v26, %v1850_v56 }
 0x1ba   : > { %v1914_v53 = vpop.f32.mrf.mxu0 }
 0x1bb   : > { %2077 = vst [vmem:[%s3851_s25 + $0x2] sm:$0x3] %v2073_v34  ;;  %v2056_v32 = vmax.f32 %v2048_v43, 0.0  ;;  %v1924_v38 = vadd.f32 %v1911_v0, %v1887_v37 }
 0x1bc   : > { %v2023_v46 = vpop.f32.mrf.mxu1 }
 0x1bd   : > { %v2064_v31 = vmax.f32 %v1541_v29, %v2056_v32  ;;  %v2033_v54 = vadd.f32 %v2020_v7, %v1924_v38 }
 0x1be   : > { %v1840_v6 = vpop.f32.mrf.mxu2 }
 0x1bf   : > { %v1877_v55 = vpop.f32.mrf.mxu3  ;;  %v2041_v61 = vmul.f32 %v3822_v44, %v2033_v54  ;;  %v1851_v57 = vadd.f32 %v1840_v6, %v3812_v36  ;;  %v1535_v36 = vadd.f32 %v3829_v10, %v1524_v47 }
 0x1c1   : > { %v2049_v39 = vadd.f32 %v3829_v10, %v2041_v61  ;;  %v1888_v45 = vadd.f32 %v1877_v55, %v1851_v57  ;;  %v1543_v30 = vmax.f32 %v1535_v36, 0.0 }
 0x1c2   : > { %v1916_v51 = vpop.f32.mrf.mxu0 }
 0x1c3   : > { %v2057_v3 = vmax.f32 %v2049_v39, 0.0  ;;  %v1925_v8 = vadd.f32 %v1914_v53, %v1888_v45 }
 0x1c4   : > { %v2025_v13 = vpop.f32.mrf.mxu1 }
 0x1c5   : > { %v2065_v25 = vmax.f32 %v1542_v19, %v2057_v3  ;;  %v2034_v16 = vadd.f32 %v2023_v46, %v1925_v8 }
 0x1c6   : > { %v1842_v52 = vpop.f32.mrf.mxu2 }
 0x1c7   : > { %v2070_v42 = vmax.f32 %v2064_v31, %v2065_v25  ;;  %v2042_v23 = vmul.f32 %v3822_v44, %v2034_v16  ;;  %v1852_v58 = vadd.f32 %v1842_v52, %v1764_v20  ;;  %v1879_v22 = vpop.f32.mrf.mxu3 }
 0x1c9   : > { %v2074_v27 = vpack.c.bf16 %v2070_v42, %v2070_v42  ;;  %v2050_v63 = vadd.f32 %v3829_v10, %v2042_v23  ;;  %v1889_v28 = vadd.f32 %v1879_v22, %v1852_v58 }
 0x1cb   : > { %2078 = vst [vmem:[%s3851_s25 + $0x4] sm:$0x3] %v2074_v27  ;;  %v2058_v12 = vmax.f32 %v2050_v63, 0.0  ;;  %v1926_v11 = vadd.f32 %v1916_v51, %v1889_v28 }
 0x1cd   : > { %v2066_v9 = vmax.f32 %v1543_v30, %v2058_v12  ;;  %v2035_v1 = vadd.f32 %v2025_v13, %v1926_v11 }
 0x1cf   : > { %v2043_v24 = vmul.f32 %v3822_v44, %v2035_v1 }
 0x1d1   : > { %v2051_v18 = vadd.f32 %v3829_v10, %v2043_v24 }
 0x1d3   : > { %v2059_v40 = vmax.f32 %v2051_v18, 0.0 }
 0x1d5   : > { %v2067_v2 = vmax.f32 %v1544_v17, %v2059_v40 }
 0x1d7   : > { %v2071_v35 = vmax.f32 %v2066_v9, %v2067_v2 }
 0x1d9   : > { %v2075_v0 = vpack.c.bf16 %v2071_v35, %v2071_v35 }
 0x1db   : > { %2079 = vst [vmem:[%s3851_s25 + $0x6] sm:$0x3] %v2075_v0 }
 0x1dc PF: > { %s15_s18 = sadd.s32 1, %s2937_s18  }
 0x1dd   : > { %p12_p4 = scmp.ge.s32.totalorder %s15_s18, 4  }
 0x1df   :  { %14 = sbr.rel (!%p12_p4) target bundleno = 1 (0x1), region = 81 }

// kernel: enhanced_cnn_forward.3
= control target key start
LH: loop header
LB: loop body
LE: loop exit
PB: predicated region body
PF: predicated region fallthrough
CT: control target
= control target key end

     0   :  { %s6168_s18 = smov 0   ;;  %s7422_s0 = inlined_call_operand.vmem [shape: bf16[2,304,4], index: 0, kind: input, shape index: {}]   ;;  %s7423_s1 = inlined_call_operand.vmem [shape: bf16[2,304,4], index: 1, kind: input, shape index: {}]   ;;  %s7424_s2 = inlined_call_operand.vmem [shape: bf16[9,4,128], index: 2, kind: input, shape index: {}]   ;;  %s7425_s3 = inlined_call_operand.vmem [shape: f32[1,128], index: 3, kind: input, shape index: {}]   ;;  %s7426_s4 = inlined_call_operand.vmem [shape: f32[1,128], index: 4, kind: input, shape index: {}]   ;;  %s7427_s5 = inlined_call_operand.vmem [shape: bf16[2,8,8,128], index: 5, kind: output, shape index: {}]  }
   0x1 LB: > { %s4778_s19 = sadd.s32 4294967295, %s6136_s18   ;;  %p4782_p0 = scmp.ge.s32.totalorder %s6136_s18, 1  ;;  %s6136_s18 = sphi %s6168_s18, %s15_s18  }
   0x2   : > { %p197_p1 = scmp.lt.s32.totalorder %s6136_s18, 3 }
   0x4   : > { %p198_p2 = pnand %p4782_p0, %p197_p1 }
   0x6   : > { %201 = sbr.rel (%p198_p2) target bundleno = 1308 (0x51c), region = 40 }
   0xb   : > { %v4787_v0 = vld [vmem:[%s7424_s2 + $0x2] sm:$0x3]  ;;  %vm444_vm0 = vcmask 1041408   ;;  %v280_v1 = vld [vmem:[%s7424_s2] sm:$0x3]  ;;  %p230_p3 = scmp.lt.s32.totalorder %s4778_s19, 1 }
   0xc   : > { %v446_v2 = vsel %vm444_vm0, %v4787_v0, 0  ;;  %v6184_v3 = vsel %vm444_vm0, %v280_v1, 0  ;;  %v4948_v4 = vld [vmem:[%s7424_s2 + $0x4] sm:$0x3]  ;;  %v5029_v6 = vld [vmem:[%s7424_s2 + $0x6] sm:$0x3] }
   0xd   : > { %6069 = vmatpush.bf16.msra.mxu2 %v446_v2  ;;  %6070 = vmatpush.bf16.msra.mxu3 %v6184_v3  ;;  %s7486_s19 = smov (!%p230_p3, %s4778_s19), 1  ;;  %v6193_v5 = vsel %vm444_vm0, %v4948_v4, 0  ;;  %v5110_v7 = vld [vmem:[%s7424_s2 + $0x8] sm:$0x3]  ;;  %v6203_v8 = vsel %vm444_vm0, %v5029_v6, 0  ;;  %vm395_vm1 = vcmask 31744  }
   0xe   : > { %455 = vmatpush.bf16.msra.mxu0 %v446_v2  ;;  %v6206_v9 = vsel %vm444_vm0, %v5110_v7, 0  ;;  %v5191_v10 = vld [vmem:[%s7424_s2 + $0xa] sm:$0x3]  ;;  %s6071_s7 = smul.u32 152, %s7486_s19  ;;  %659 = vmatpush.bf16.msra.mxu1 %v6184_v3  ;;  %v5272_v40 = vld [vmem:[%s7424_s2 + $0xc] sm:$0x3] }
   0xf   : > { %v6215_v11 = vsel %vm444_vm0, %v5191_v10, 0  ;;  %v6289_v41 = vsel %vm444_vm0, %v5272_v40, 0  ;;  %v5353_v42 = vld [vmem:[%s7424_s2 + $0xe] sm:$0x3]  ;;  %v5434_v44 = vld [vmem:[%s7424_s2 + $0x10] sm:$0x3] }
  0x10   : > { %s6222_s10 = scalar_lea.vmem %s7423_s1, %s6071_s7  ;;  %s6227_s13 = scalar_lea.vmem %s7422_s0, %s6071_s7  ;;  %v6296_v43 = vsel %vm444_vm0, %v5353_v42, 0  ;;  %v6303_v45 = vsel %vm444_vm0, %v5434_v44, 0  ;;  %vm843_vm2 = vsmask.f32 7424 }
  0x11   : > { %1034 = vmatpush.bf16.msrb.mxu2 %v6193_v5  ;;  %1288 = vmatpush.bf16.msrb.mxu3 %v6203_v8  ;;  %v5878_v12 = vld [vmem:[%s6222_s10 + $0x40] sm:$0xff]  ;;  %v5879_v16 = vld [vmem:[%s6222_s10 + $0x48] sm:$0xff]  ;;  %v5880_v20 = vld [vmem:[%s6222_s10 + $0x50] sm:$0xff]  ;;  %s5853_s26 = sshll.u32 %s7486_s19, 5 }
  0x12   : > { %1542 = vmatpush.bf16.msrb.mxu0 %v6206_v9  ;;  %1932 = vmatpush.bf16.msrb.mxu1 %v6215_v11  ;;  %v5862_v13 = vld [vmem:[%s6227_s13 + $0x40] sm:$0xff]  ;;  %v5863_v17 = vld [vmem:[%s6227_s13 + $0x48] sm:$0xff]  ;;  %v5864_v21 = vld [vmem:[%s6227_s13 + $0x50] sm:$0xff]  ;;  %s7305_s29 = scalar_lea.vmem %s7427_s5, %s5853_s26 }
  0x13   : > { %v5870_v14 = vld [vmem:[%s6222_s10] sm:$0xff]  ;;  %4860 = vmatmul.msk.bf16.vlgmr.msra.gmra.mxu2 %vm395_vm1, %v5878_v12  ;;  %4940 = vmatmul.msk.bf16.vlgmr.msra.gmra.mxu3 %vm395_vm1, %v5862_v13  ;;  %v5871_v18 = vld [vmem:[%s6222_s10 + $0x8] sm:$0xff]  ;;  %v5872_v22 = vld [vmem:[%s6222_s10 + $0x10] sm:$0xff] }
  0x14   : > { %v5854_v15 = vld [vmem:[%s6227_s13] sm:$0xff]  ;;  %4852 = vmatmul.msk.bf16.vlgmr.msra.gmra.mxu0 %vm395_vm1, %v5870_v14  ;;  %v5855_v19 = vld [vmem:[%s6227_s13 + $0x8] sm:$0xff]  ;;  %v5856_v23 = vld [vmem:[%s6227_s13 + $0x10] sm:$0xff] }
  0x15   : > { %4932 = vmatmul.msk.bf16.vlgmr.msra.gmra.mxu1 %vm395_vm1, %v5854_v15  ;;  %v5881_v24 = vld [vmem:[%s6222_s10 + $0x58] sm:$0xff]  ;;  %v5882_v28 = vld [vmem:[%s6222_s10 + $0x60] sm:$0xff]  ;;  %v5883_v32 = vld [vmem:[%s6222_s10 + $0x68] sm:$0xff]  ;;  %2186 = vmatpush.bf16.msra.mxu2 %v6289_v41 }
  0x16   : > { %2973 = vmatpush.bf16.msra.mxu1 %v446_v2  ;;  %v5865_v25 = vld [vmem:[%s6227_s13 + $0x58] sm:$0xff]  ;;  %v5866_v29 = vld [vmem:[%s6227_s13 + $0x60] sm:$0xff]  ;;  %v5867_v33 = vld [vmem:[%s6227_s13 + $0x68] sm:$0xff]  ;;  %2440 = vmatpush.bf16.msra.mxu3 %v6296_v43 }
  0x17   : > { %v5873_v26 = vld [vmem:[%s6222_s10 + $0x18] sm:$0xff]  ;;  %v5874_v30 = vld [vmem:[%s6222_s10 + $0x20] sm:$0xff]  ;;  %v5875_v34 = vld [vmem:[%s6222_s10 + $0x28] sm:$0xff]  ;;  %2830 = vmatpush.bf16.msra.mxu0 %v6303_v45 }
  0x18   : > { %v5857_v27 = vld [vmem:[%s6227_s13 + $0x18] sm:$0xff]  ;;  %v5858_v31 = vld [vmem:[%s6227_s13 + $0x20] sm:$0xff]  ;;  %v5859_v35 = vld [vmem:[%s6227_s13 + $0x28] sm:$0xff] }
  0x19   : > { %v5884_v36 = vld [vmem:[%s6222_s10 + $0x70] sm:$0xff]  ;;  %v5885_v46 = vld [vmem:[%s6222_s10 + $0x78] sm:$0xff]  ;;  %v5886_v50 = vld [vmem:[%s6227_s13] sm:$0xff] }
  0x1a   : > { %v5868_v37 = vld [vmem:[%s6227_s13 + $0x70] sm:$0xff]  ;;  %v5869_v47 = vld [vmem:[%s6227_s13 + $0x78] sm:$0xff]  ;;  %v5934_v51 = vld [vmem:[%s6227_s13 + $0x8] sm:$0xff]  ;;  %v847_v53 = vshll.u32 %v5886_v50, 16  ;;  %v845_v56 = vshrl.u32 %v5886_v50, 16 }
  0x1b   : > { %v5876_v38 = vld [vmem:[%s6222_s10 + $0x30] sm:$0xff]  ;;  %v5877_v48 = vld [vmem:[%s6222_s10 + $0x38] sm:$0xff]  ;;  %v5887_v52 = vld [vmem:[%s6227_s13 + $0x8] sm:$0xff]  ;;  %v1745_v55 = vshll.u32 %v5934_v51, 16  ;;  %v1743_v59 = vshrl.u32 %v5934_v51, 16 }
  0x1c   : > { %v5860_v39 = vld [vmem:[%s6227_s13 + $0x30] sm:$0xff]  ;;  %v5861_v49 = vld [vmem:[%s6227_s13 + $0x38] sm:$0xff]  ;;  %v849_v57 = vrot.slane %v847_v53, 1  ;;  %v852_v58 = vshll.u32 %v5887_v52, 16  ;;  %v5902_v2 = vld [vmem:[%s6227_s13 + $0x8] sm:$0xff] }
  0x1d   : > { %v5935_v54 = vld [vmem:[%s6227_s13 + $0x10] sm:$0xff]  ;;  %v1747_v60 = vrot.slane %v1745_v55, 1  ;;  %v5918_v6 = vld [vmem:[%s6222_s10 + $0x8] sm:$0xff]  ;;  %v5936_v15 = vld [vmem:[%s6227_s13 + $0x18] sm:$0xff] }
  0x1e   : > { %v1750_v61 = vshll.u32 %v5935_v54, 16  ;;  %v850_v62 = vor.u32 %v849_v57, %v845_v56  ;;  %v854_v63 = vrot.slane %v852_v58, 1  ;;  %v5888_v14 = vld [vmem:[%s6227_s13 + $0x10] sm:$0xff]  ;;  %v5920_v56 = vld [vmem:[%s6222_s10 + $0x18] sm:$0xff] }
  0x1f   : > { %v1748_v0 = vor.u32 %v1747_v60, %v1743_v59 }
  0x20   : > { %v1752_v1 = vrot.slane %v1750_v61, 1  ;;  %v6320_v4 = vsel %vm843_vm2, %v850_v62, %v854_v63  ;;  %v5890_v61 = vld [vmem:[%s6227_s13 + $0x20] sm:$0xff]  ;;  %v5938_v62 = vld [vmem:[%s6227_s13 + $0x28] sm:$0xff] }
  0x22   : > { %v6324_v12 = vsel %vm843_vm2, %v1748_v0, %v1752_v1 }
  0x23   : > { %4861 = vmatmul.msk.bf16.gmra.mxu2 %vm395_vm1, %v5879_v16  ;;  %4941 = vmatmul.msk.bf16.gmra.mxu3 %vm395_vm1, %v5863_v17 }
  0x24   : > { %4853 = vmatmul.msk.bf16.gmra.mxu0 %vm395_vm1, %v5871_v18 }
  0x25   : > { %4933 = vmatmul.msk.bf16.gmra.mxu1 %vm395_vm1, %v5855_v19  ;;  %v856_v19 = vshrl.u32 %v5887_v52, 16 }
  0x33   : > { %4862 = vmatmul.msk.bf16.gmra.mxu2 %vm395_vm1, %v5880_v20  ;;  %4942 = vmatmul.msk.bf16.gmra.mxu3 %vm395_vm1, %v5864_v21  ;;  %v860_v20 = vshll.u32 %v5888_v14, 16 }
  0x34   : > { %4854 = vmatmul.msk.bf16.gmra.mxu0 %vm395_vm1, %v5872_v22 }
  0x35   : > { %4934 = vmatmul.msk.bf16.gmra.mxu1 %vm395_vm1, %v5856_v23  ;;  %v1754_v23 = vshrl.u32 %v5935_v54, 16  ;;  %v5904_v54 = vld [vmem:[%s6227_s13 + $0x18] sm:$0xff] }
  0x43   : > { %4863 = vmatmul.msk.bf16.gmra.mxu2 %vm395_vm1, %v5881_v24  ;;  %4943 = vmatmul.msk.bf16.gmra.mxu3 %vm395_vm1, %v5865_v25  ;;  %v1758_v24 = vshll.u32 %v5936_v15, 16  ;;  %v858_v25 = vor.u32 %v856_v19, %v854_v63 }
  0x44   : > { %4855 = vmatmul.msk.bf16.gmra.mxu0 %vm395_vm1, %v5873_v26 }
  0x45   : > { %4935 = vmatmul.msk.bf16.gmra.mxu1 %vm395_vm1, %v5857_v27  ;;  %v1760_v26 = vrot.slane %v1758_v24, 1 }
  0x53   : > { %4864 = vmatmul.msk.bf16.gmra.mxu2 %vm395_vm1, %v5882_v28  ;;  %4944 = vmatmul.msk.bf16.gmra.mxu3 %vm395_vm1, %v5866_v29  ;;  %v5919_v29 = vld [vmem:[%s6222_s10 + $0x10] sm:$0xff] }
  0x54   : > { %4856 = vmatmul.msk.bf16.gmra.mxu0 %vm395_vm1, %v5874_v30 }
  0x55   : > { %4936 = vmatmul.msk.bf16.gmra.mxu1 %vm395_vm1, %v5858_v31 }
  0x63   : > { %4865 = vmatmul.msk.bf16.gmra.mxu2 %vm395_vm1, %v5883_v32  ;;  %4945 = vmatmul.msk.bf16.gmra.mxu3 %vm395_vm1, %v5867_v33 }
  0x64   : > { %4857 = vmatmul.msk.bf16.gmra.mxu0 %vm395_vm1, %v5875_v34  ;;  %v5889_v34 = vld [vmem:[%s6227_s13 + $0x18] sm:$0xff] }
  0x65   : > { %4937 = vmatmul.msk.bf16.gmra.mxu1 %vm395_vm1, %v5859_v35  ;;  %v5937_v35 = vld [vmem:[%s6227_s13 + $0x20] sm:$0xff]  ;;  %v868_v40 = vshll.u32 %v5889_v34, 16 }
  0x73   : > { %4866 = vmatmul.msk.bf16.gmra.mxu2 %vm395_vm1, %v5884_v36  ;;  %4946 = vmatmul.msk.bf16.gmra.mxu3 %vm395_vm1, %v5868_v37 }
  0x74   : > { %4858 = vmatmul.msk.bf16.gmra.mxu0 %vm395_vm1, %v5876_v38 }
  0x75   : > { %4938 = vmatmul.msk.bf16.gmra.mxu1 %vm395_vm1, %v5860_v39  ;;  %v864_v39 = vshrl.u32 %v5888_v14, 16  ;;  %v1770_v14 = vshrl.u32 %v5937_v35, 16 }
  0x83   : > { %4867 = vmatmul.msk.bf16.gmra.mxu2 %vm395_vm1, %v5885_v46  ;;  %4947 = vmatmul.msk.bf16.gmra.mxu3 %vm395_vm1, %v5869_v47  ;;  %v1762_v46 = vshrl.u32 %v5936_v15, 16  ;;  %v1766_v47 = vshll.u32 %v5937_v35, 16  ;;  %v1774_v15 = vshll.u32 %v5938_v62, 16 }
  0x84   : > { %4859 = vmatmul.msk.bf16.gmra.mxu0 %vm395_vm1, %v5877_v48 }
  0x85   : > { %4939 = vmatmul.msk.bf16.gmra.mxu1 %vm395_vm1, %v5861_v49  ;;  %v870_v49 = vrot.slane %v868_v40, 1  ;;  %v1764_v50 = vor.u32 %v1762_v46, %v1760_v26  ;;  %v1768_v51 = vrot.slane %v1766_v47, 1 }
  0x87   : > { %v6368_v59 = vsel %vm843_vm2, %v1764_v50, %v1768_v51  ;;  %v1772_v19 = vor.u32 %v1770_v14, %v1768_v51  ;;  %v5906_v50 = vld [vmem:[%s6227_s13 + $0x28] sm:$0xff] }
  0x91   : > { %v457_v7 = vpop.f32.mrf.mxu0 }
  0x92   : > { %v661_v10 = vpop.f32.mrf.mxu1 }
  0x93   : > { %v6326_v13 = vadd.f32 %v661_v10, %v457_v7  ;;  %5013 = vmatmul.msk.bf16.vlgmr.msrb.gmra.mxu2 %vm395_vm1, %v6320_v4  ;;  %5094 = vmatmul.msk.bf16.vlgmr.msrb.gmra.mxu3 %vm395_vm1, %v5902_v2  ;;  %v872_v2 = vshrl.u32 %v5889_v34, 16  ;;  %v880_v34 = vshrl.u32 %v5890_v61, 16 }
  0x94   : > { %5175 = vmatmul.msk.bf16.vlgmr.msrb.gmra.mxu0 %vm395_vm1, %v5918_v6  ;;  %3046 = vmatpush.bf16.msrb.mxu2 %v6184_v3  ;;  %v862_v3 = vrot.slane %v860_v20, 1  ;;  %v876_v6 = vshll.u32 %v5890_v61, 16  ;;  %v1776_v20 = vrot.slane %v1774_v15, 1  ;;  %v5940_v61 = vld [vmem:[%s6227_s13 + $0x38] sm:$0xff] }
  0x95   : > { %5256 = vmatmul.msk.bf16.vlgmr.msrb.gmra.mxu1 %vm395_vm1, %v6324_v12  ;;  %3415 = vmatpush.bf16.msrb.mxu3 %v6193_v5  ;;  %v1756_v5 = vor.u32 %v1754_v23, %v1752_v1  ;;  %v5905_v23 = vld [vmem:[%s6227_s13 + $0x20] sm:$0xff]  ;;  %v1790_v15 = vshll.u32 %v5940_v61, 16 }
  0x96   : > { %v489_v16 = vpop.f32.mrf.mxu2  ;;  %v693_v17 = vpop.f32.mrf.mxu3  ;;  %3504 = vmatpush.bf16.msrb.mxu0 %v6203_v8  ;;  %3593 = vmatpush.bf16.msrb.mxu1 %v6206_v9  ;;  %v5903_v8 = vld [vmem:[%s6227_s13 + $0x10] sm:$0xff]  ;;  %v6344_v9 = vsel %vm843_vm2, %v858_v25, %v862_v3  ;;  %v866_v48 = vor.u32 %v864_v39, %v862_v3  ;;  %v5921_v25 = vld [vmem:[%s6222_s10 + $0x20] sm:$0xff]  ;;  %v1778_v39 = vshrl.u32 %v5938_v62, 16 }
  0x97   : > { %v6340_v18 = vadd.f32 %v693_v17, %v489_v16  ;;  %v6348_v32 = vsel %vm843_vm2, %v1756_v5, %v1760_v26  ;;  %v874_v16 = vor.u32 %v872_v2, %v870_v49  ;;  %v878_v17 = vrot.slane %v876_v6, 1 }
  0x98   : > { %v6364_v55 = vsel %vm843_vm2, %v866_v48, %v870_v49  ;;  %v6388_v26 = vsel %vm843_vm2, %v1772_v19, %v1776_v20  ;;  %v1780_v46 = vor.u32 %v1778_v39, %v1776_v20  ;;  %v1792_v20 = vrot.slane %v1790_v15, 1 }
  0x99   : > { %v459_v21 = vpop.f32.mrf.mxu0  ;;  %v6384_v24 = vsel %vm843_vm2, %v874_v16, %v878_v17  ;;  %7441 = vst [vmem:[#allocation2_spill] sm:$0xff] %v6388_v26 }
  0x9a   : > { %v663_v22 = vpop.f32.mrf.mxu1 }
  0x9e   : > { %v491_v27 = vpop.f32.mrf.mxu2  ;;  %v695_v28 = vpop.f32.mrf.mxu3 }
  0x9f   : > { %v5891_v28 = vld [vmem:[%s6227_s13 + $0x28] sm:$0xff] }
  0xa0   : > { %v884_v35 = vshll.u32 %v5891_v28, 16  ;;  %v888_v2 = vshrl.u32 %v5891_v28, 16 }
  0xa1   : > { %v461_v30 = vpop.f32.mrf.mxu0 }
  0xa2   : > { %v665_v31 = vpop.f32.mrf.mxu1 }
  0xa3   : > { %v6350_v33 = vadd.f32 %v665_v31, %v461_v30  ;;  %5014 = vmatmul.msk.bf16.gmra.mxu2 %vm395_vm1, %v6344_v9  ;;  %5095 = vmatmul.msk.bf16.gmra.mxu3 %vm395_vm1, %v5903_v8  ;;  %v5939_v8 = vld [vmem:[%s6227_s13 + $0x30] sm:$0xff] }
  0xa4   : > { %5176 = vmatmul.msk.bf16.gmra.mxu0 %vm395_vm1, %v5919_v29  ;;  %v1782_v40 = vshll.u32 %v5939_v8, 16  ;;  %v1786_v14 = vshrl.u32 %v5939_v8, 16 }
  0xa5   : > { %5257 = vmatmul.msk.bf16.gmra.mxu1 %vm395_vm1, %v6348_v32 }
  0xa6   : > { %v493_v36 = vpop.f32.mrf.mxu2  ;;  %v697_v37 = vpop.f32.mrf.mxu3  ;;  %v1784_v47 = vrot.slane %v1782_v40, 1 }
  0xa7   : > { %v6360_v38 = vadd.f32 %v697_v37, %v493_v36 }
  0xa8   : > { %v1788_v19 = vor.u32 %v1786_v14, %v1784_v47  ;;  %v5942_v14 = vld [vmem:[%s6227_s13 + $0x48] sm:$0xff] }
  0xa9   : > { %v463_v42 = vpop.f32.mrf.mxu0 }
  0xaa   : > { %v667_v44 = vpop.f32.mrf.mxu1  ;;  %v882_v42 = vor.u32 %v880_v34, %v878_v17  ;;  %v5941_v34 = vld [vmem:[%s6227_s13 + $0x40] sm:$0xff] }
  0xab   : > { %v886_v44 = vrot.slane %v884_v35, 1 }
  0xad   : > { %v6404_v51 = vsel %vm843_vm2, %v882_v42, %v886_v44  ;;  %v890_v16 = vor.u32 %v888_v2, %v886_v44  ;;  %v5924_v2 = vld [vmem:[%s6222_s10 + $0x38] sm:$0xff] }
  0xae   : > { %v495_v52 = vpop.f32.mrf.mxu2  ;;  %v699_v53 = vpop.f32.mrf.mxu3 }
  0xaf   : > { %v5922_v52 = vld [vmem:[%s6222_s10 + $0x28] sm:$0xff] }
  0xb1   : > { %v465_v57 = vpop.f32.mrf.mxu0 }
  0xb2   : > { %v669_v58 = vpop.f32.mrf.mxu1 }
  0xb3   : > { %v6370_v60 = vadd.f32 %v669_v58, %v465_v57  ;;  %5015 = vmatmul.msk.bf16.gmra.mxu2 %vm395_vm1, %v6364_v55  ;;  %5096 = vmatmul.msk.bf16.gmra.mxu3 %vm395_vm1, %v5904_v54  ;;  %v5892_v58 = vld [vmem:[%s6227_s13 + $0x30] sm:$0xff] }
  0xb4   : > { %5177 = vmatmul.msk.bf16.gmra.mxu0 %vm395_vm1, %v5920_v56  ;;  %v6408_v56 = vsel %vm843_vm2, %v1780_v46, %v1784_v47  ;;  %v892_v6 = vshll.u32 %v5892_v58, 16  ;;  %v896_v39 = vshrl.u32 %v5892_v58, 16  ;;  %v1794_v46 = vshrl.u32 %v5940_v61, 16 }
  0xb5   : > { %5258 = vmatmul.msk.bf16.gmra.mxu1 %vm395_vm1, %v6368_v59  ;;  %7442 = vst [vmem:[#allocation3_spill] sm:$0xff] %v6408_v56  ;;  %v1798_v47 = vshll.u32 %v5941_v34, 16 }
  0xb6   : > { %v497_v63 = vpop.f32.mrf.mxu2  ;;  %v701_v0 = vpop.f32.mrf.mxu3  ;;  %v894_v17 = vrot.slane %v892_v6, 1 }
  0xb7   : > { %v6380_v1 = vadd.f32 %v701_v0, %v497_v63 }
  0xb9   : > { %v467_v7 = vpop.f32.mrf.mxu0 }
  0xba   : > { %v671_v10 = vpop.f32.mrf.mxu1 }
  0xbe   : > { %v499_v21 = vpop.f32.mrf.mxu2  ;;  %v703_v22 = vpop.f32.mrf.mxu3 }
  0xc1   : > { %v469_v3 = vpop.f32.mrf.mxu0 }
  0xc2   : > { %v673_v5 = vpop.f32.mrf.mxu1 }
  0xc3   : > { %v6390_v27 = vadd.f32 %v673_v5, %v469_v3  ;;  %5016 = vmatmul.msk.bf16.gmra.mxu2 %vm395_vm1, %v6384_v24  ;;  %5097 = vmatmul.msk.bf16.gmra.mxu3 %vm395_vm1, %v5905_v23  ;;  %v5907_v23 = vld [vmem:[%s6227_s13 + $0x30] sm:$0xff] }
  0xc4   : > { %5178 = vmatmul.msk.bf16.gmra.mxu0 %vm395_vm1, %v5921_v25  ;;  %v6424_v25 = vsel %vm843_vm2, %v890_v16, %v894_v17  ;;  %v5923_v3 = vld [vmem:[%s6222_s10 + $0x30] sm:$0xff] }
  0xc5   : > { %5259 = vmatmul.msk.bf16.gmra.mxu1 %vm395_vm1, %v6388_v26 }
  0xc6   : > { %v501_v29 = vpop.f32.mrf.mxu2  ;;  %v705_v30 = vpop.f32.mrf.mxu3 }
  0xc7   : > { %v6400_v31 = vadd.f32 %v705_v30, %v501_v29  ;;  %v6428_v29 = vsel %vm843_vm2, %v1788_v19, %v1792_v20  ;;  %v5893_v30 = vld [vmem:[%s6227_s13 + $0x38] sm:$0xff] }
  0xc8   : > { %7443 = vst [vmem:[#allocation4_spill] sm:$0xff] %v6428_v29  ;;  %v900_v40 = vshll.u32 %v5893_v30, 16  ;;  %v904_v19 = vshrl.u32 %v5893_v30, 16 }
  0xc9   : > { %v471_v36 = vpop.f32.mrf.mxu0 }
  0xca   : > { %v675_v37 = vpop.f32.mrf.mxu1 }
  0xce   : > { %v503_v48 = vpop.f32.mrf.mxu2  ;;  %v707_v49 = vpop.f32.mrf.mxu3 }
  0xcf   : > { %v898_v48 = vor.u32 %v896_v39, %v894_v17  ;;  %v902_v49 = vrot.slane %v900_v40, 1 }
  0xd1   : > { %v473_v53 = vpop.f32.mrf.mxu0 }
  0xd2   : > { %v677_v54 = vpop.f32.mrf.mxu1 }
  0xd3   : > { %v6410_v57 = vadd.f32 %v677_v54, %v473_v53  ;;  %5017 = vmatmul.msk.bf16.gmra.mxu2 %vm395_vm1, %v6404_v51  ;;  %5098 = vmatmul.msk.bf16.gmra.mxu3 %vm395_vm1, %v5906_v50  ;;  %v1796_v50 = vor.u32 %v1794_v46, %v1792_v20  ;;  %v5925_v46 = vld [vmem:[%s6222_s10 + $0x40] sm:$0xff] }
  0xd4   : > { %5179 = vmatmul.msk.bf16.gmra.mxu0 %vm395_vm1, %v5922_v52  ;;  %v1800_v52 = vrot.slane %v1798_v47, 1 }
  0xd5   : > { %5260 = vmatmul.msk.bf16.gmra.mxu1 %vm395_vm1, %v6408_v56 }
  0xd6   : > { %v505_v62 = vpop.f32.mrf.mxu2  ;;  %v709_v63 = vpop.f32.mrf.mxu3 }
  0xd7   : > { %v6420_v0 = vadd.f32 %v709_v63, %v505_v62  ;;  %v5908_v62 = vld [vmem:[%s6227_s13 + $0x38] sm:$0xff]  ;;  %v6444_v63 = vsel %vm843_vm2, %v898_v48, %v902_v49 }
  0xd9   : > { %v475_v7 = vpop.f32.mrf.mxu0 }
  0xda   : > { %v679_v10 = vpop.f32.mrf.mxu1  ;;  %v6448_v7 = vsel %vm843_vm2, %v1796_v50, %v1800_v52  ;;  %v5943_v50 = vld [vmem:[%s6227_s13 + $0x50] sm:$0xff] }
  0xdb   : > { %7444 = vst [vmem:[#allocation5_spill] sm:$0xff] %v6448_v7  ;;  %v5894_v10 = vld [vmem:[%s6227_s13 + $0x40] sm:$0xff] }
  0xdc   : > { %v908_v20 = vshll.u32 %v5894_v10, 16 }
  0xde   : > { %v507_v21 = vpop.f32.mrf.mxu2  ;;  %v711_v22 = vpop.f32.mrf.mxu3 }
  0xe1   : > { %v477_v5 = vpop.f32.mrf.mxu0 }
  0xe2   : > { %v681_v28 = vpop.f32.mrf.mxu1 }
  0xe3   : > { %v6430_v8 = vadd.f32 %v681_v28, %v477_v5  ;;  %5018 = vmatmul.msk.bf16.gmra.mxu2 %vm395_vm1, %v6424_v25  ;;  %5099 = vmatmul.msk.bf16.gmra.mxu3 %vm395_vm1, %v5907_v23  ;;  %v1802_v23 = vshrl.u32 %v5941_v34, 16  ;;  %v906_v5 = vor.u32 %v904_v19, %v902_v49  ;;  %v910_v28 = vrot.slane %v908_v20, 1  ;;  %v5895_v49 = vld [vmem:[%s6227_s13 + $0x48] sm:$0xff] }
  0xe4   : > { %5180 = vmatmul.msk.bf16.gmra.mxu0 %vm395_vm1, %v5923_v3  ;;  %v1806_v3 = vshll.u32 %v5942_v14, 16 }
  0xe5   : > { %5261 = vmatmul.msk.bf16.gmra.mxu1 %vm395_vm1, %v6428_v29 }
  0xe6   : > { %v509_v35 = vpop.f32.mrf.mxu2  ;;  %v713_v36 = vpop.f32.mrf.mxu3 }
  0xe7   : > { %v6440_v37 = vadd.f32 %v713_v36, %v509_v35  ;;  %v1804_v35 = vor.u32 %v1802_v23, %v1800_v52  ;;  %v1808_v36 = vrot.slane %v1806_v3, 1 }
  0xe9   : > { %v479_v42 = vpop.f32.mrf.mxu0  ;;  %v6468_v48 = vsel %vm843_vm2, %v1804_v35, %v1808_v36 }
  0xea   : > { %v683_v44 = vpop.f32.mrf.mxu1  ;;  %v5909_v42 = vld [vmem:[%s6227_s13 + $0x40] sm:$0xff]  ;;  %7445 = vst [vmem:[#allocation6_spill] sm:$0xff] %v6468_v48 }
  0xeb   : > { %v6464_v44 = vsel %vm843_vm2, %v906_v5, %v910_v28  ;;  %v5910_v5 = vld [vmem:[%s6227_s13 + $0x48] sm:$0xff] }
  0xee   : > { %v511_v53 = vpop.f32.mrf.mxu2  ;;  %v715_v54 = vpop.f32.mrf.mxu3 }
  0xf1   : > { %v481_v6 = vpop.f32.mrf.mxu0 }
  0xf2   : > { %v685_v58 = vpop.f32.mrf.mxu1 }
  0xf3   : > { %v6450_v61 = vadd.f32 %v685_v58, %v481_v6  ;;  %5019 = vmatmul.msk.bf16.gmra.mxu2 %vm395_vm1, %v6444_v63  ;;  %5100 = vmatmul.msk.bf16.gmra.mxu3 %vm395_vm1, %v5908_v62  ;;  %v912_v62 = vshrl.u32 %v5894_v10, 16 }
  0xf4   : > { %5181 = vmatmul.msk.bf16.gmra.mxu0 %vm395_vm1, %v5924_v2  ;;  %v916_v2 = vshll.u32 %v5895_v49, 16 }
  0xf5   : > { %5262 = vmatmul.msk.bf16.gmra.mxu1 %vm395_vm1, %v6448_v7  ;;  %v914_v19 = vor.u32 %v912_v62, %v910_v28  ;;  %v5944_v28 = vld [vmem:[%s6227_s13 + $0x58] sm:$0xff] }
  0xf6   : > { %v513_v15 = vpop.f32.mrf.mxu2  ;;  %v717_v16 = vpop.f32.mrf.mxu3  ;;  %v918_v20 = vrot.slane %v916_v2, 1 }
  0xf7   : > { %v6460_v17 = vadd.f32 %v717_v16, %v513_v15  ;;  %v1810_v15 = vshrl.u32 %v5942_v14, 16  ;;  %v1814_v16 = vshll.u32 %v5943_v50, 16  ;;  %v5896_v14 = vld [vmem:[%s6227_s13 + $0x50] sm:$0xff] }
  0xf8   : > { %v6484_v35 = vsel %vm843_vm2, %v914_v19, %v918_v20 }
  0xf9   : > { %v483_v21 = vpop.f32.mrf.mxu0 }
  0xfa   : > { %v687_v22 = vpop.f32.mrf.mxu1  ;;  %v1812_v21 = vor.u32 %v1810_v15, %v1808_v36 }
  0xfb   : > { %v1816_v22 = vrot.slane %v1814_v16, 1 }
  0xfe   : > { %v515_v39 = vpop.f32.mrf.mxu2  ;;  %v719_v40 = vpop.f32.mrf.mxu3 }
  0xff   : > { %v5926_v39 = vld [vmem:[%s6222_s10 + $0x48] sm:$0xff] }
 0x101   : > { %v485_v47 = vpop.f32.mrf.mxu0 }
 0x102   : > { %v689_v30 = vpop.f32.mrf.mxu1 }
 0x103   : > { %v6470_v34 = vadd.f32 %v689_v30, %v485_v47  ;;  %5020 = vmatmul.msk.bf16.gmra.mxu2 %vm395_vm1, %v6464_v44  ;;  %5101 = vmatmul.msk.bf16.gmra.mxu3 %vm395_vm1, %v5909_v42  ;;  %v6488_v42 = vsel %vm843_vm2, %v1812_v21, %v1816_v22  ;;  %v920_v30 = vshrl.u32 %v5895_v49, 16 }
 0x104   : > { %5182 = vmatmul.msk.bf16.gmra.mxu0 %vm395_vm1, %v5925_v46  ;;  %7446 = vst [vmem:[#allocation7_spill] sm:$0xff] %v6488_v42 }
 0x105   : > { %5263 = vmatmul.msk.bf16.gmra.mxu1 %vm395_vm1, %v6468_v48  ;;  %v922_v16 = vor.u32 %v920_v30, %v918_v20  ;;  %v5897_v20 = vld [vmem:[%s6227_s13 + $0x58] sm:$0xff] }
 0x106   : > { %v517_v52 = vpop.f32.mrf.mxu2  ;;  %v721_v53 = vpop.f32.mrf.mxu3 }
 0x107   : > { %v6480_v54 = vadd.f32 %v721_v53, %v517_v52  ;;  %v924_v52 = vshll.u32 %v5896_v14, 16 }
 0x109   : > { %v487_v6 = vpop.f32.mrf.mxu0  ;;  %v926_v19 = vrot.slane %v924_v52, 1  ;;  %v928_v52 = vshrl.u32 %v5896_v14, 16 }
 0x10a   : > { %v691_v58 = vpop.f32.mrf.mxu1  ;;  %v1818_v6 = vshrl.u32 %v5943_v50, 16 }
 0x10b   : > { %v1822_v58 = vshll.u32 %v5944_v28, 16  ;;  %v6503_v49 = vsel %vm843_vm2, %v922_v16, %v926_v19 }
 0x10c   : > { %v1820_v21 = vor.u32 %v1818_v6, %v1816_v22  ;;  %v5945_v22 = vld [vmem:[%s6227_s13 + $0x60] sm:$0xff] }
 0x10e   : > { %v519_v23 = vpop.f32.mrf.mxu2  ;;  %v723_v3 = vpop.f32.mrf.mxu3 }
 0x10f   : > { %v1824_v23 = vrot.slane %v1822_v58, 1  ;;  %v1826_v58 = vshrl.u32 %v5944_v28, 16 }
 0x111   : > { %v1544_v40 = vpop.f32.mrf.mxu0  ;;  %v6507_v50 = vsel %vm843_vm2, %v1820_v21, %v1824_v23  ;;  %v930_v21 = vor.u32 %v928_v52, %v926_v19  ;;  %v5898_v19 = vld [vmem:[%s6227_s13 + $0x60] sm:$0xff]  ;;  %v936_v52 = vshrl.u32 %v5897_v20, 16 }
 0x112   : > { %v1934_v10 = vpop.f32.mrf.mxu1  ;;  %7447 = vst [vmem:[#allocation8_spill] sm:$0xff] %v6507_v50 }
 0x113   : > { %5021 = vmatmul.msk.bf16.gmra.mxu2 %vm395_vm1, %v6484_v35  ;;  %5102 = vmatmul.msk.bf16.gmra.mxu3 %vm395_vm1, %v5910_v5 }
 0x114   : > { %5183 = vmatmul.msk.bf16.gmra.mxu0 %vm395_vm1, %v5926_v39  ;;  %v5911_v39 = vld [vmem:[%s6227_s13 + $0x50] sm:$0xff] }
 0x115   : > { %5264 = vmatmul.msk.bf16.gmra.mxu1 %vm395_vm1, %v6488_v42 }
 0x116   : > { %v1036_v36 = vpop.f32.mrf.mxu2  ;;  %v1290_v46 = vpop.f32.mrf.mxu3 }
 0x117   : > { %v1100_v47 = vadd.f32 %v1036_v36, %v6326_v13  ;;  %v5927_v36 = vld [vmem:[%s6222_s10 + $0x50] sm:$0xff] }
 0x119   : > { %v1354_v53 = vadd.f32 %v1290_v46, %v1100_v47  ;;  %v1546_v62 = vpop.f32.mrf.mxu0 }
 0x11a   : > { %v1936_v2 = vpop.f32.mrf.mxu1 }
 0x11b   : > { %v1608_v15 = vadd.f32 %v1544_v40, %v1354_v53  ;;  %v932_v53 = vshll.u32 %v5897_v20, 16 }
 0x11d   : > { %v6499_v3 = vadd.f32 %v1934_v10, %v1608_v15  ;;  %v1830_v15 = vshll.u32 %v5945_v22, 16 }
 0x11e   : > { %v1038_v5 = vpop.f32.mrf.mxu2  ;;  %v1292_v13 = vpop.f32.mrf.mxu3 }
 0x11f   : > { %v934_v5 = vrot.slane %v932_v53, 1  ;;  %v1828_v13 = vor.u32 %v1826_v58, %v1824_v23  ;;  %v5946_v23 = vld [vmem:[%s6227_s13 + $0x68] sm:$0xff]  ;;  %v940_v53 = vshll.u32 %v5898_v19, 16 }
 0x121   : > { %v1548_v46 = vpop.f32.mrf.mxu0  ;;  %v6522_v14 = vsel %vm843_vm2, %v930_v21, %v934_v5 }
 0x122   : > { %v1938_v47 = vpop.f32.mrf.mxu1 }
 0x123   : > { %5022 = vmatmul.msk.bf16.gmra.mxu2 %vm395_vm1, %v6503_v49  ;;  %5103 = vmatmul.msk.bf16.gmra.mxu3 %vm395_vm1, %v5911_v39  ;;  %v1832_v39 = vrot.slane %v1830_v15, 1  ;;  %v1834_v15 = vshrl.u32 %v5945_v22, 16 }
 0x124   : > { %5184 = vmatmul.msk.bf16.gmra.mxu0 %vm395_vm1, %v5927_v36 }
 0x125   : > { %5265 = vmatmul.msk.bf16.gmra.mxu1 %vm395_vm1, %v6507_v50  ;;  %v6526_v28 = vsel %vm843_vm2, %v1828_v13, %v1832_v39  ;;  %v938_v13 = vor.u32 %v936_v52, %v934_v5  ;;  %v5947_v5 = vld [vmem:[%s6227_s13 + $0x70] sm:$0xff]  ;;  %v944_v52 = vshrl.u32 %v5898_v19, 16 }
 0x126   : > { %v1040_v40 = vpop.f32.mrf.mxu2  ;;  %v1294_v10 = vpop.f32.mrf.mxu3  ;;  %7448 = vst [vmem:[#allocation9_spill] sm:$0xff] %v6526_v28 }
 0x127   : > { %v1101_v30 = vadd.f32 %v1040_v40, %v6350_v33  ;;  %v5912_v40 = vld [vmem:[%s6227_s13 + $0x58] sm:$0xff] }
 0x129   : > { %v1355_v62 = vadd.f32 %v1294_v10, %v1101_v30  ;;  %v1550_v2 = vpop.f32.mrf.mxu0  ;;  %v5928_v10 = vld [vmem:[%s6222_s10 + $0x58] sm:$0xff] }
 0x12a   : > { %v1940_v6 = vpop.f32.mrf.mxu1 }
 0x12b   : > { %v1609_v16 = vadd.f32 %v1548_v46, %v1355_v62 }
 0x12d   : > { %v6518_v36 = vadd.f32 %v1938_v47, %v1609_v16  ;;  %v1838_v16 = vshll.u32 %v5946_v23, 16 }
 0x12e   : > { %v1042_v50 = vpop.f32.mrf.mxu2  ;;  %v1296_v33 = vpop.f32.mrf.mxu3 }
 0x12f   : > { %v942_v33 = vrot.slane %v940_v53, 1 }
 0x131   : > { %v1552_v30 = vpop.f32.mrf.mxu0  ;;  %v6541_v20 = vsel %vm843_vm2, %v938_v13, %v942_v33 }
 0x132   : > { %v1942_v2 = vpop.f32.mrf.mxu1 }
 0x133   : > { %5023 = vmatmul.msk.bf16.gmra.mxu2 %vm395_vm1, %v6522_v14  ;;  %5104 = vmatmul.msk.bf16.gmra.mxu3 %vm395_vm1, %v5912_v40  ;;  %v1836_v40 = vor.u32 %v1834_v15, %v1832_v39 }
 0x134   : > { %5185 = vmatmul.msk.bf16.gmra.mxu0 %vm395_vm1, %v5928_v10  ;;  %v1840_v10 = vrot.slane %v1838_v16, 1  ;;  %v1842_v16 = vshrl.u32 %v5946_v23, 16 }
 0x135   : > { %5266 = vmatmul.msk.bf16.gmra.mxu1 %vm395_vm1, %v6526_v28 }
 0x136   : > { %v1044_v46 = vpop.f32.mrf.mxu2  ;;  %v1298_v47 = vpop.f32.mrf.mxu3  ;;  %v6545_v22 = vsel %vm843_vm2, %v1836_v40, %v1840_v10  ;;  %v946_v40 = vor.u32 %v944_v52, %v942_v33  ;;  %v5948_v33 = vld [vmem:[%s6227_s13 + $0x78] sm:$0xff] }
 0x137   : > { %v1102_v50 = vadd.f32 %v1044_v46, %v6370_v60  ;;  %v5913_v46 = vld [vmem:[%s6227_s13 + $0x60] sm:$0xff]  ;;  %7449 = vst [vmem:[#allocation10_spill] sm:$0xff] %v6545_v22 }
 0x139   : > { %v1356_v62 = vadd.f32 %v1298_v47, %v1102_v50  ;;  %v1554_v6 = vpop.f32.mrf.mxu0  ;;  %v5929_v47 = vld [vmem:[%s6222_s10 + $0x60] sm:$0xff] }
 0x13a   : > { %v1944_v58 = vpop.f32.mrf.mxu1 }
 0x13b   : > { %v1610_v21 = vadd.f32 %v1552_v30, %v1356_v62 }
 0x13d   : > { %v6537_v28 = vadd.f32 %v1942_v2, %v1610_v21  ;;  %v1846_v21 = vshll.u32 %v5947_v5, 16 }
 0x13e   : > { %v1046_v42 = vpop.f32.mrf.mxu2  ;;  %v1300_v60 = vpop.f32.mrf.mxu3 }
 0x13f   : > { %v5899_v42 = vld [vmem:[%s6227_s13 + $0x68] sm:$0xff] }
 0x140   : > { %v948_v53 = vshll.u32 %v5899_v42, 16  ;;  %v952_v52 = vshrl.u32 %v5899_v42, 16 }
 0x141   : > { %v1556_v50 = vpop.f32.mrf.mxu0 }
 0x142   : > { %v1946_v6 = vpop.f32.mrf.mxu1  ;;  %v950_v60 = vrot.slane %v948_v53, 1 }
 0x143   : > { %5024 = vmatmul.msk.bf16.gmra.mxu2 %vm395_vm1, %v6541_v20  ;;  %5105 = vmatmul.msk.bf16.gmra.mxu3 %vm395_vm1, %v5913_v46  ;;  %v1844_v46 = vor.u32 %v1842_v16, %v1840_v10 }
 0x144   : > { %5186 = vmatmul.msk.bf16.gmra.mxu0 %vm395_vm1, %v5929_v47  ;;  %v1848_v47 = vrot.slane %v1846_v21, 1  ;;  %v6560_v19 = vsel %vm843_vm2, %v946_v40, %v950_v60  ;;  %v1850_v21 = vshrl.u32 %v5947_v5, 16 }
 0x145   : > { %5267 = vmatmul.msk.bf16.gmra.mxu1 %vm395_vm1, %v6545_v22 }
 0x146   : > { %v1048_v39 = vpop.f32.mrf.mxu2  ;;  %v1302_v30 = vpop.f32.mrf.mxu3  ;;  %v6564_v23 = vsel %vm843_vm2, %v1844_v46, %v1848_v47  ;;  %v954_v46 = vor.u32 %v952_v52, %v950_v60  ;;  %v5949_v60 = vld [vmem:[%s6227_s13 + $0x80] sm:$0xff] }
 0x147   : > { %v1103_v2 = vadd.f32 %v1048_v39, %v6390_v27  ;;  %v5914_v39 = vld [vmem:[%s6227_s13 + $0x68] sm:$0xff]  ;;  %7450 = vst [vmem:[#allocation11_spill] sm:$0xff] %v6564_v23 }
 0x149   : > { %v1357_v62 = vadd.f32 %v1302_v30, %v1103_v2  ;;  %v1558_v58 = vpop.f32.mrf.mxu0  ;;  %v5930_v30 = vld [vmem:[%s6222_s10 + $0x68] sm:$0xff] }
 0x14a   : > { %v1948_v15 = vpop.f32.mrf.mxu1 }
 0x14b   : > { %v1611_v13 = vadd.f32 %v1556_v50, %v1357_v62 }
 0x14d   : > { %v6556_v22 = vadd.f32 %v1946_v6, %v1611_v13  ;;  %v1854_v13 = vshll.u32 %v5948_v33, 16 }
 0x14e   : > { %v1050_v48 = vpop.f32.mrf.mxu2  ;;  %v1304_v27 = vpop.f32.mrf.mxu3 }
 0x14f   : > { %v5900_v48 = vld [vmem:[%s6227_s13 + $0x70] sm:$0xff] }
 0x150   : > { %v956_v53 = vshll.u32 %v5900_v48, 16  ;;  %v960_v52 = vshrl.u32 %v5900_v48, 16  ;;  %v1656_v48 = vld [vmem:[%s6227_s13 + $0x88] sm:$0x1] }
 0x151   : > { %v1560_v2 = vpop.f32.mrf.mxu0 }
 0x152   : > { %v1950_v58 = vpop.f32.mrf.mxu1  ;;  %v958_v27 = vrot.slane %v956_v53, 1 }
 0x153   : > { %5025 = vmatmul.msk.bf16.gmra.mxu2 %vm395_vm1, %v6560_v19  ;;  %5106 = vmatmul.msk.bf16.gmra.mxu3 %vm395_vm1, %v5914_v39  ;;  %v1852_v39 = vor.u32 %v1850_v21, %v1848_v47 }
 0x154   : > { %5187 = vmatmul.msk.bf16.gmra.mxu0 %vm395_vm1, %v5930_v30  ;;  %v1856_v30 = vrot.slane %v1854_v13, 1  ;;  %v6579_v42 = vsel %vm843_vm2, %v954_v46, %v958_v27  ;;  %v1858_v13 = vshrl.u32 %v5948_v33, 16 }
 0x155   : > { %5268 = vmatmul.msk.bf16.gmra.mxu1 %vm395_vm1, %v6564_v23 }
 0x156   : > { %v1052_v10 = vpop.f32.mrf.mxu2  ;;  %v1306_v50 = vpop.f32.mrf.mxu3  ;;  %v6583_v5 = vsel %vm843_vm2, %v1852_v39, %v1856_v30  ;;  %v962_v39 = vor.u32 %v960_v52, %v958_v27  ;;  %v1724_v27 = vunpack.c.l.b16 %v1656_v48 }
 0x157   : > { %v1104_v6 = vadd.f32 %v1052_v10, %v6410_v57  ;;  %v5915_v10 = vld [vmem:[%s6227_s13 + $0x70] sm:$0xff]  ;;  %7451 = vst [vmem:[#allocation12_spill] sm:$0xff] %v6583_v5 }
 0x159   : > { %v1358_v62 = vadd.f32 %v1306_v50, %v1104_v6  ;;  %v1562_v15 = vpop.f32.mrf.mxu0  ;;  %v5931_v50 = vld [vmem:[%s6222_s10 + $0x70] sm:$0xff] }
 0x15a   : > { %v1952_v16 = vpop.f32.mrf.mxu1 }
 0x15b   : > { %v1612_v40 = vadd.f32 %v1560_v2, %v1358_v62 }
 0x15d   : > { %v6575_v23 = vadd.f32 %v1950_v58, %v1612_v40  ;;  %v1862_v40 = vshll.u32 %v5949_v60, 16 }
 0x15e   : > { %v1054_v7 = vpop.f32.mrf.mxu2  ;;  %v1308_v57 = vpop.f32.mrf.mxu3 }
 0x15f   : > { %v5901_v7 = vld [vmem:[%s6227_s13 + $0x78] sm:$0xff] }
 0x160   : > { %v964_v53 = vshll.u32 %v5901_v7, 16 }
 0x161   : > { %v1564_v6 = vpop.f32.mrf.mxu0 }
 0x162   : > { %v1954_v15 = vpop.f32.mrf.mxu1  ;;  %v966_v57 = vrot.slane %v964_v53, 1  ;;  %v968_v53 = vshrl.u32 %v5901_v7, 16 }
 0x163   : > { %5026 = vmatmul.msk.bf16.gmra.mxu2 %vm395_vm1, %v6579_v42  ;;  %5107 = vmatmul.msk.bf16.gmra.mxu3 %vm395_vm1, %v5915_v10  ;;  %v1860_v10 = vor.u32 %v1858_v13, %v1856_v30  ;;  %v1741_v30 = vpack.c.b16 %v1724_v27, %v1724_v27 }
 0x164   : > { %5188 = vmatmul.msk.bf16.gmra.mxu0 %vm395_vm1, %v5931_v50  ;;  %v1864_v50 = vrot.slane %v1862_v40, 1  ;;  %v6600_v26 = vsel %vm843_vm2, %v962_v39, %v966_v57 }
 0x165   : > { %5269 = vmatmul.msk.bf16.gmra.mxu1 %vm395_vm1, %v6583_v5  ;;  %v757_v5 = vld [vmem:[%s6227_s13 + $0x80] sm:$0x1]  ;;  %v1870_v39 = vshll.u32 %v1741_v30, 16 }
 0x166   : > { %v1056_v47 = vpop.f32.mrf.mxu2  ;;  %v1310_v2 = vpop.f32.mrf.mxu3 }
 0x167   : > { %v1105_v58 = vadd.f32 %v1056_v47, %v6430_v8  ;;  %v5916_v47 = vld [vmem:[%s6227_s13 + $0x78] sm:$0xff] }
 0x169   : > { %v1359_v62 = vadd.f32 %v1310_v2, %v1105_v58  ;;  %v1566_v16 = vpop.f32.mrf.mxu0  ;;  %v5932_v2 = vld [vmem:[%s6222_s10 + $0x78] sm:$0xff]  ;;  %v825_v58 = vunpack.c.l.b16 %v757_v5 }
 0x16a   : > { %v1956_v21 = vpop.f32.mrf.mxu1 }
 0x16b   : > { %v1613_v46 = vadd.f32 %v1564_v6, %v1359_v62  ;;  %v6604_v6 = vsel %vm843_vm2, %v1860_v10, %v1864_v50 }
 0x16d   : > { %v6595_v29 = vadd.f32 %v1954_v15, %v1613_v46  ;;  %v1866_v46 = vshrl.u32 %v5949_v60, 16 }
 0x16e   : > { %v1058_v56 = vpop.f32.mrf.mxu2  ;;  %v1312_v8 = vpop.f32.mrf.mxu3 }
 0x16f   : > { %v842_v56 = vpack.c.b16 %v825_v58, %v825_v58  ;;  %v970_v8 = vor.u32 %v968_v53, %v966_v57  ;;  %v5983_v57 = vld [vmem:[%s6227_s13 + $0x18] sm:$0xff] }
 0x171   : > { %v1568_v16 = vpop.f32.mrf.mxu0  ;;  %v972_v62 = vshll.u32 %v842_v56, 16  ;;  %v5933_v56 = vld [vmem:[%s6222_s10 + $0x80] sm:$0xff] }
 0x172   : > { %v1958_v33 = vpop.f32.mrf.mxu1 }
 0x173   : > { %5027 = vmatmul.msk.bf16.gmra.mxu2 %vm395_vm1, %v6600_v26  ;;  %5108 = vmatmul.msk.bf16.gmra.mxu3 %vm395_vm1, %v5916_v47  ;;  %v974_v48 = vrot.slane %v972_v62, 1  ;;  %v1868_v47 = vor.u32 %v1866_v46, %v1864_v50 }
 0x174   : > { %5189 = vmatmul.msk.bf16.gmra.mxu0 %vm395_vm1, %v5932_v2  ;;  %v1872_v2 = vrot.slane %v1870_v39, 1  ;;  %v2648_v39 = vshll.u32 %v5983_v57, 16 }
 0x175   : > { %5270 = vmatmul.msk.bf16.gmra.mxu1 %vm395_vm1, %v6604_v6  ;;  %v6617_v7 = vsel %vm843_vm2, %v970_v8, %v974_v48 }
 0x176   : > { %v1060_v15 = vpop.f32.mrf.mxu2  ;;  %v1314_v5 = vpop.f32.mrf.mxu3  ;;  %v6621_v60 = vsel %vm843_vm2, %v1868_v47, %v1872_v2  ;;  %v2650_v48 = vrot.slane %v2648_v39, 1  ;;  %v5951_v39 = vld [vmem:[%s6227_s13 + $0x18] sm:$0xff] }
 0x177   : > { %v1106_v52 = vadd.f32 %v1060_v15, %v6450_v61  ;;  %v5917_v15 = vld [vmem:[%s6227_s13 + $0x80] sm:$0xff]  ;;  %7452 = vst [vmem:[#allocation13_spill] sm:$0xff] %v6621_v60 }
 0x179   : > { %v1360_v21 = vadd.f32 %v1314_v5, %v1106_v52  ;;  %v1570_v13 = vpop.f32.mrf.mxu0 }
 0x17a   : > { %v1960_v40 = vpop.f32.mrf.mxu1 }
 0x17b   : > { %v1614_v10 = vadd.f32 %v1568_v16, %v1360_v21  ;;  %v5982_v16 = vld [vmem:[%s6227_s13 + $0x10] sm:$0xff] }
 0x17c   : > { %v2643_v50 = vshll.u32 %v5982_v16, 16  ;;  %v2641_v40 = vshrl.u32 %v5982_v16, 16 }
 0x17d   : > { %v6613_v58 = vadd.f32 %v1958_v33, %v1614_v10 }
 0x17e   : > { %v1062_v27 = vpop.f32.mrf.mxu2  ;;  %v1316_v61 = vpop.f32.mrf.mxu3  ;;  %v2645_v46 = vrot.slane %v2643_v50, 1 }
 0x17f   : > { %v5950_v61 = vld [vmem:[%s6227_s13 + $0x10] sm:$0xff] }
 0x180   : > { %v2646_v8 = vor.u32 %v2645_v46, %v2641_v40 }
 0x181   : > { %v1572_v5 = vpop.f32.mrf.mxu0 }
 0x182   : > { %v1962_v52 = vpop.f32.mrf.mxu1 }
 0x183   : > { %5028 = vmatmul.msk.bf16.gmra.mxu2 %vm395_vm1, %v6617_v7  ;;  %5109 = vmatmul.msk.bf16.gmra.mxu3 %vm395_vm1, %v5917_v15  ;;  %v5966_v15 = vld [vmem:[%s6222_s10 + $0x10] sm:$0xff] }
 0x184   : > { %5190 = vmatmul.msk.bf16.gmra.mxu0 %vm395_vm1, %v5933_v56 }
 0x185   : > { %5271 = vmatmul.msk.bf16.gmra.mxu1 %vm395_vm1, %v6621_v60 }
 0x186   : > { %v1064_v33 = vpop.f32.mrf.mxu2  ;;  %v1318_v30 = vpop.f32.mrf.mxu3 }
 0x187   : > { %v1107_v53 = vadd.f32 %v1064_v33, %v6470_v34  ;;  %v6637_v34 = vsel %vm843_vm2, %v2646_v8, %v2650_v48 }
 0x189   : > { %v1361_v62 = vadd.f32 %v1318_v30, %v1107_v53  ;;  %v1574_v21 = vpop.f32.mrf.mxu0 }
 0x18a   : > { %v1964_v13 = vpop.f32.mrf.mxu1 }
 0x18b   : > { %v1615_v10 = vadd.f32 %v1572_v5, %v1361_v62  ;;  %v5984_v5 = vld [vmem:[%s6227_s13 + $0x20] sm:$0xff]  ;;  %v2652_v62 = vshrl.u32 %v5983_v57, 16 }
 0x18d   : > { %v6632_v47 = vadd.f32 %v1962_v52, %v1615_v10  ;;  %v5967_v10 = vld [vmem:[%s6222_s10 + $0x18] sm:$0xff] }
 0x18e   : > { %v1066_v2 = vpop.f32.mrf.mxu2  ;;  %v1320_v27 = vpop.f32.mrf.mxu3 }
 0x191   : > { %v1576_v56 = vpop.f32.mrf.mxu0 }
 0x192   : > { %v1966_v60 = vpop.f32.mrf.mxu1 }
 0x193   : > { %5337 = vmatmul.msk.bf16.vlgmr.msra.gmra.mxu2 %vm395_vm1, %v5950_v61  ;;  %5418 = vmatmul.msk.bf16.vlgmr.msra.gmra.mxu3 %vm395_vm1, %v5966_v15  ;;  %v2660_v15 = vshrl.u32 %v5984_v5, 16 }
 0x194   : > { %5499 = vmatmul.msk.bf16.vlgmr.msra.gmra.mxu0 %vm395_vm1, %v6637_v34  ;;  %3978 = vmatpush.bf16.msra.mxu2 %v6215_v11  ;;  %v2654_v11 = vor.u32 %v2652_v62, %v2650_v48  ;;  %v5968_v62 = vld [vmem:[%s6222_s10 + $0x20] sm:$0xff] }
 0x195   : > { %5515 = vmatmul.msk.bf16.vlgmr.msra.gmra.mxu1 %vm395_vm1, %v6320_v4  ;;  %4067 = vmatpush.bf16.msra.mxu3 %v6289_v41  ;;  %v2656_v4 = vshll.u32 %v5984_v5, 16 }
 0x196   : > { %v1068_v52 = vpop.f32.mrf.mxu2  ;;  %v1322_v16 = vpop.f32.mrf.mxu3  ;;  %4156 = vmatpush.bf16.msra.mxu0 %v6296_v43  ;;  %4541 = vmatpush.bf16.msra.mxu1 %v6303_v45 }
 0x197   : > { %v1108_v50 = vadd.f32 %v1068_v52, %v6340_v18  ;;  %v2658_v13 = vrot.slane %v2656_v4, 1  ;;  %v5985_v18 = vld [vmem:[%s6227_s13 + $0x28] sm:$0xff] }
 0x199   : > { %v1362_v33 = vadd.f32 %v1322_v16, %v1108_v50  ;;  %v1578_v30 = vpop.f32.mrf.mxu0  ;;  %v6656_v45 = vsel %vm843_vm2, %v2654_v11, %v2658_v13  ;;  %v2662_v16 = vor.u32 %v2660_v15, %v2658_v13  ;;  %v5969_v15 = vld [vmem:[%s6222_s10 + $0x28] sm:$0xff] }
 0x19a   : > { %v1968_v53 = vpop.f32.mrf.mxu1 }
 0x19b   : > { %v1616_v21 = vadd.f32 %v1576_v56, %v1362_v33  ;;  %v2664_v56 = vshll.u32 %v5985_v18, 16  ;;  %v5952_v53 = vld [vmem:[%s6227_s13 + $0x20] sm:$0xff] }
 0x19d   : > { %v6651_v41 = vadd.f32 %v1966_v60, %v1616_v21  ;;  %v2666_v50 = vrot.slane %v2664_v56, 1 }
 0x19e   : > { %v1070_v40 = vpop.f32.mrf.mxu2  ;;  %v1324_v46 = vpop.f32.mrf.mxu3 }
 0x19f   : > { %v6671_v11 = vsel %vm843_vm2, %v2662_v16, %v2666_v50 }
 0x1a1   : > { %v1580_v43 = vpop.f32.mrf.mxu0 }
 0x1a2   : > { %v1970_v8 = vpop.f32.mrf.mxu1 }
 0x1a3   : > { %5338 = vmatmul.msk.bf16.gmra.mxu2 %vm395_vm1, %v5951_v39  ;;  %5419 = vmatmul.msk.bf16.gmra.mxu3 %vm395_vm1, %v5967_v10 }
 0x1a4   : > { %5500 = vmatmul.msk.bf16.gmra.mxu0 %vm395_vm1, %v6656_v45 }
 0x1a5   : > { %5516 = vmatmul.msk.bf16.gmra.mxu1 %vm395_vm1, %v6344_v9 }
 0x1a6   : > { %v1072_v60 = vpop.f32.mrf.mxu2  ;;  %v1326_v57 = vpop.f32.mrf.mxu3 }
 0x1a7   : > { %v1109_v48 = vadd.f32 %v1072_v60, %v6360_v38  ;;  %v5986_v38 = vld [vmem:[%s6227_s13 + $0x30] sm:$0xff] }
 0x1a9   : > { %v1363_v2 = vadd.f32 %v1326_v57, %v1109_v48  ;;  %v1582_v27 = vpop.f32.mrf.mxu0 }
 0x1aa   : > { %v1972_v61 = vpop.f32.mrf.mxu1 }
 0x1ab   : > { %v1617_v52 = vadd.f32 %v1580_v43, %v1363_v2  ;;  %v2668_v43 = vshrl.u32 %v5985_v18, 16  ;;  %v5953_v61 = vld [vmem:[%s6227_s13 + $0x28] sm:$0xff] }
 0x1ad   : > { %v6666_v33 = vadd.f32 %v1970_v8, %v1617_v52  ;;  %v2672_v8 = vshll.u32 %v5986_v38, 16  ;;  %v2670_v57 = vor.u32 %v2668_v43, %v2666_v50  ;;  %v5970_v43 = vld [vmem:[%s6222_s10 + $0x30] sm:$0xff] }
 0x1ae   : > { %v1074_v30 = vpop.f32.mrf.mxu2  ;;  %v1328_v9 = vpop.f32.mrf.mxu3 }
 0x1af   : > { %v2674_v48 = vrot.slane %v2672_v8, 1 }
 0x1b1   : > { %v1584_v4 = vpop.f32.mrf.mxu0  ;;  %v6686_v16 = vsel %vm843_vm2, %v2670_v57, %v2674_v48 }
 0x1b2   : > { %v1974_v21 = vpop.f32.mrf.mxu1 }
 0x1b3   : > { %5339 = vmatmul.msk.bf16.gmra.mxu2 %vm395_vm1, %v5952_v53  ;;  %5420 = vmatmul.msk.bf16.gmra.mxu3 %vm395_vm1, %v5968_v62 }
 0x1b4   : > { %5501 = vmatmul.msk.bf16.gmra.mxu0 %vm395_vm1, %v6671_v11 }
 0x1b5   : > { %5517 = vmatmul.msk.bf16.gmra.mxu1 %vm395_vm1, %v6364_v55 }
 0x1b6   : > { %v1076_v5 = vpop.f32.mrf.mxu2  ;;  %v1330_v13 = vpop.f32.mrf.mxu3 }
 0x1b7   : > { %v1110_v40 = vadd.f32 %v1076_v5, %v6380_v1  ;;  %v5987_v1 = vld [vmem:[%s6227_s13 + $0x38] sm:$0xff] }
 0x1b9   : > { %v1364_v46 = vadd.f32 %v1330_v13, %v1110_v40  ;;  %v1586_v39 = vpop.f32.mrf.mxu0 }
 0x1ba   : > { %v1976_v10 = vpop.f32.mrf.mxu1 }
 0x1bb   : > { %v1618_v60 = vadd.f32 %v1584_v4, %v1364_v46  ;;  %v2676_v4 = vshrl.u32 %v5986_v38, 16  ;;  %v5954_v10 = vld [vmem:[%s6227_s13 + $0x30] sm:$0xff] }
 0x1bd   : > { %v6681_v2 = vadd.f32 %v1974_v21, %v1618_v60  ;;  %v2680_v21 = vshll.u32 %v5987_v1, 16  ;;  %v2678_v13 = vor.u32 %v2676_v4, %v2674_v48  ;;  %v5971_v4 = vld [vmem:[%s6222_s10 + $0x38] sm:$0xff] }
 0x1be   : > { %v1078_v27 = vpop.f32.mrf.mxu2  ;;  %v1332_v55 = vpop.f32.mrf.mxu3 }
 0x1bf   : > { %v2682_v40 = vrot.slane %v2680_v21, 1 }
 0x1c1   : > { %v1588_v56 = vpop.f32.mrf.mxu0  ;;  %v6701_v57 = vsel %vm843_vm2, %v2678_v13, %v2682_v40 }
 0x1c2   : > { %v1978_v52 = vpop.f32.mrf.mxu1 }
 0x1c3   : > { %5340 = vmatmul.msk.bf16.gmra.mxu2 %vm395_vm1, %v5953_v61  ;;  %5421 = vmatmul.msk.bf16.gmra.mxu3 %vm395_vm1, %v5969_v15 }
 0x1c4   : > { %5502 = vmatmul.msk.bf16.gmra.mxu0 %vm395_vm1, %v6686_v16 }
 0x1c5   : > { %5518 = vmatmul.msk.bf16.gmra.mxu1 %vm395_vm1, %v6384_v24 }
 0x1c6   : > { %v1080_v18 = vpop.f32.mrf.mxu2  ;;  %v1334_v50 = vpop.f32.mrf.mxu3 }
 0x1c7   : > { %v1111_v30 = vadd.f32 %v1080_v18, %v6400_v31  ;;  %v5988_v31 = vld [vmem:[%s6227_s13 + $0x40] sm:$0xff] }
 0x1c9   : > { %v1365_v9 = vadd.f32 %v1334_v50, %v1111_v30  ;;  %v1590_v53 = vpop.f32.mrf.mxu0 }
 0x1ca   : > { %v1980_v62 = vpop.f32.mrf.mxu1 }
 0x1cb   : > { %v1619_v5 = vadd.f32 %v1588_v56, %v1365_v9  ;;  %v2684_v56 = vshrl.u32 %v5987_v1, 16  ;;  %v5955_v62 = vld [vmem:[%s6227_s13 + $0x38] sm:$0xff] }
 0x1cd   : > { %v6696_v46 = vadd.f32 %v1978_v52, %v1619_v5  ;;  %v2688_v52 = vshll.u32 %v5988_v31, 16  ;;  %v2686_v50 = vor.u32 %v2684_v56, %v2682_v40  ;;  %v5972_v56 = vld [vmem:[%s6222_s10 + $0x40] sm:$0xff] }
 0x1ce   : > { %v1082_v39 = vpop.f32.mrf.mxu2  ;;  %v1336_v24 = vpop.f32.mrf.mxu3 }
 0x1cf   : > { %v2690_v30 = vrot.slane %v2688_v52, 1 }
 0x1d1   : > { %v1592_v8 = vpop.f32.mrf.mxu0  ;;  %v6716_v13 = vsel %vm843_vm2, %v2686_v50, %v2690_v30 }
 0x1d2   : > { %v1982_v60 = vpop.f32.mrf.mxu1 }
 0x1d3   : > { %5341 = vmatmul.msk.bf16.gmra.mxu2 %vm395_vm1, %v5954_v10  ;;  %5422 = vmatmul.msk.bf16.gmra.mxu3 %vm395_vm1, %v5970_v43 }
 0x1d4   : > { %5503 = vmatmul.msk.bf16.gmra.mxu0 %vm395_vm1, %v6701_v57 }
 0x1d5   : > { %5519 = vmatmul.msk.bf16.gmra.mxu1 %vm395_vm1, %v6404_v51 }
 0x1d6   : > { %v1084_v38 = vpop.f32.mrf.mxu2  ;;  %v1338_v48 = vpop.f32.mrf.mxu3 }
 0x1d7   : > { %v1112_v27 = vadd.f32 %v1084_v38, %v6420_v0  ;;  %v5989_v0 = vld [vmem:[%s6227_s13 + $0x48] sm:$0xff] }
 0x1d9   : > { %v1366_v55 = vadd.f32 %v1338_v48, %v1112_v27  ;;  %v1594_v61 = vpop.f32.mrf.mxu0 }
 0x1da   : > { %v1984_v15 = vpop.f32.mrf.mxu1 }
 0x1db   : > { %v1620_v18 = vadd.f32 %v1592_v8, %v1366_v55  ;;  %v2692_v8 = vshrl.u32 %v5988_v31, 16  ;;  %v5956_v15 = vld [vmem:[%s6227_s13 + $0x40] sm:$0xff] }
 0x1dd   : > { %v6711_v9 = vadd.f32 %v1982_v60, %v1620_v18  ;;  %v2696_v60 = vshll.u32 %v5989_v0, 16  ;;  %v2694_v48 = vor.u32 %v2692_v8, %v2690_v30  ;;  %v5973_v8 = vld [vmem:[%s6222_s10 + $0x48] sm:$0xff] }
 0x1de   : > { %v1086_v53 = vpop.f32.mrf.mxu2  ;;  %v1340_v51 = vpop.f32.mrf.mxu3 }
 0x1df   : > { %v2698_v27 = vrot.slane %v2696_v60, 1 }
 0x1e1   : > { %v1596_v21 = vpop.f32.mrf.mxu0  ;;  %v6731_v50 = vsel %vm843_vm2, %v2694_v48, %v2698_v27 }
 0x1e2   : > { %v1986_v5 = vpop.f32.mrf.mxu1 }
 0x1e3   : > { %5342 = vmatmul.msk.bf16.gmra.mxu2 %vm395_vm1, %v5955_v62  ;;  %5423 = vmatmul.msk.bf16.gmra.mxu3 %vm395_vm1, %v5971_v4 }
 0x1e4   : > { %5504 = vmatmul.msk.bf16.gmra.mxu0 %vm395_vm1, %v6716_v13 }
 0x1e5   : > { %5520 = vmatmul.msk.bf16.gmra.mxu1 %vm395_vm1, %v6424_v25 }
 0x1e6   : > { %v1088_v1 = vpop.f32.mrf.mxu2  ;;  %v1342_v40 = vpop.f32.mrf.mxu3 }
 0x1e7   : > { %v1113_v39 = vadd.f32 %v1088_v1, %v6440_v37  ;;  %v5990_v37 = vld [vmem:[%s6227_s13 + $0x50] sm:$0xff] }
 0x1e9   : > { %v1367_v24 = vadd.f32 %v1342_v40, %v1113_v39  ;;  %v1598_v10 = vpop.f32.mrf.mxu0 }
 0x1ea   : > { %v1988_v43 = vpop.f32.mrf.mxu1 }
 0x1eb   : > { %v1621_v38 = vadd.f32 %v1596_v21, %v1367_v24  ;;  %v2700_v21 = vshrl.u32 %v5989_v0, 16  ;;  %v5957_v43 = vld [vmem:[%s6227_s13 + $0x48] sm:$0xff] }
 0x1ed   : > { %v6726_v55 = vadd.f32 %v1986_v5, %v1621_v38  ;;  %v2704_v5 = vshll.u32 %v5990_v37, 16  ;;  %v2702_v40 = vor.u32 %v2700_v21, %v2698_v27  ;;  %v5974_v21 = vld [vmem:[%s6222_s10 + $0x50] sm:$0xff] }
 0x1ee   : > { %v1090_v61 = vpop.f32.mrf.mxu2  ;;  %v1344_v25 = vpop.f32.mrf.mxu3 }
 0x1ef   : > { %v2706_v39 = vrot.slane %v2704_v5, 1 }
 0x1f1   : > { %v1600_v52 = vpop.f32.mrf.mxu0  ;;  %v6746_v48 = vsel %vm843_vm2, %v2702_v40, %v2706_v39 }
 0x1f2   : > { %v1990_v18 = vpop.f32.mrf.mxu1 }
 0x1f3   : > { %5343 = vmatmul.msk.bf16.gmra.mxu2 %vm395_vm1, %v5956_v15  ;;  %5424 = vmatmul.msk.bf16.gmra.mxu3 %vm395_vm1, %v5972_v56 }
 0x1f4   : > { %5505 = vmatmul.msk.bf16.gmra.mxu0 %vm395_vm1, %v6731_v50 }
 0x1f5   : > { %5521 = vmatmul.msk.bf16.gmra.mxu1 %vm395_vm1, %v6444_v63 }
 0x1f6   : > { %v1092_v31 = vpop.f32.mrf.mxu2  ;;  %v1346_v30 = vpop.f32.mrf.mxu3 }
 0x1f7   : > { %v1114_v53 = vadd.f32 %v1092_v31, %v6460_v17  ;;  %v5991_v17 = vld [vmem:[%s6227_s13 + $0x58] sm:$0xff] }
 0x1f9   : > { %v1368_v51 = vadd.f32 %v1346_v30, %v1114_v53  ;;  %v1602_v62 = vpop.f32.mrf.mxu0 }
 0x1fa   : > { %v1992_v4 = vpop.f32.mrf.mxu1 }
 0x1fb   : > { %v1622_v1 = vadd.f32 %v1600_v52, %v1368_v51  ;;  %v2708_v52 = vshrl.u32 %v5990_v37, 16  ;;  %v5958_v4 = vld [vmem:[%s6227_s13 + $0x50] sm:$0xff]  ;;  %v5992_v37 = vld [vmem:[%s6227_s13 + $0x60] sm:$0xff] }
 0x1fd   : > { %v6741_v24 = vadd.f32 %v1990_v18, %v1622_v1  ;;  %v2712_v18 = vshll.u32 %v5991_v17, 16  ;;  %v2710_v30 = vor.u32 %v2708_v52, %v2706_v39 }
 0x1fe   : > { %v1094_v10 = vpop.f32.mrf.mxu2  ;;  %v1348_v63 = vpop.f32.mrf.mxu3 }
 0x1ff   : > { %v2714_v53 = vrot.slane %v2712_v18, 1 }
 0x201   : > { %v1604_v60 = vpop.f32.mrf.mxu0 }
 0x202   : > { %v1994_v38 = vpop.f32.mrf.mxu1 }
 0x203   : > { %5344 = vmatmul.msk.bf16.gmra.mxu2 %vm395_vm1, %v5957_v43  ;;  %5425 = vmatmul.msk.bf16.gmra.mxu3 %vm395_vm1, %v5973_v8 }
 0x204   : > { %5506 = vmatmul.msk.bf16.gmra.mxu0 %vm395_vm1, %v6746_v48 }
 0x205   : > { %5522 = vmatmul.msk.bf16.gmra.mxu1 %vm395_vm1, %v6464_v44 }
 0x206   : > { %v1096_v0 = vpop.f32.mrf.mxu2  ;;  %v1350_v27 = vpop.f32.mrf.mxu3 }
 0x207   : > { %v1115_v61 = vadd.f32 %v1096_v0, %v6480_v54  ;;  %v6763_v54 = vsel %vm843_vm2, %v2710_v30, %v2714_v53 }
 0x209   : > { %v1369_v25 = vadd.f32 %v1350_v27, %v1115_v61  ;;  %v1606_v15 = vpop.f32.mrf.mxu0 }
 0x20a   : > { %v1996_v56 = vpop.f32.mrf.mxu1 }
 0x20b   : > { %v1623_v31 = vadd.f32 %v1604_v60, %v1369_v25  ;;  %v2716_v60 = vshrl.u32 %v5991_v17, 16  ;;  %v5959_v56 = vld [vmem:[%s6227_s13 + $0x58] sm:$0xff] }
 0x20d   : > { %v6756_v51 = vadd.f32 %v1994_v38, %v1623_v31  ;;  %v2720_v38 = vshll.u32 %v5992_v37, 16  ;;  %v2718_v27 = vor.u32 %v2716_v60, %v2714_v53 }
 0x20e   : > { %v1098_v62 = vpop.f32.mrf.mxu2  ;;  %v1352_v44 = vpop.f32.mrf.mxu3 }
 0x20f   : > { %v2722_v61 = vrot.slane %v2720_v38, 1 }
 0x211   : > { %v2832_v5 = vpop.f32.mrf.mxu0  ;;  %v6780_v31 = vsel %vm843_vm2, %v2718_v27, %v2722_v61 }
 0x212   : > { %v6760_v1 = vpop.f32.mrf.mxu1 }
 0x213   : > { %5345 = vmatmul.msk.bf16.gmra.mxu2 %vm395_vm1, %v5958_v4  ;;  %5426 = vmatmul.msk.bf16.gmra.mxu3 %vm395_vm1, %v5974_v21  ;;  %v2724_v21 = vshrl.u32 %v5992_v37, 16 }
 0x214   : > { %5507 = vmatmul.msk.bf16.gmra.mxu0 %vm395_vm1, %v6763_v54 }
 0x215   : > { %5523 = vmatmul.msk.bf16.gmra.mxu1 %vm395_vm1, %v6484_v35  ;;  %v5975_v35 = vld [vmem:[%s6222_s10 + $0x58] sm:$0xff] }
 0x216   : > { %v2188_v40 = vpop.f32.mrf.mxu2  ;;  %v2442_v39 = vpop.f32.mrf.mxu3 }
 0x217   : > { %v2252_v10 = vadd.f32 %v2188_v40, %v6499_v3  ;;  %v5993_v3 = vld [vmem:[%s6227_s13 + $0x68] sm:$0xff] }
 0x219   : > { %v2506_v63 = vadd.f32 %v2442_v39, %v2252_v10  ;;  %v2834_v43 = vpop.f32.mrf.mxu0  ;;  %v2726_v39 = vor.u32 %v2724_v21, %v2722_v61  ;;  %v5961_v21 = vld [vmem:[%s6227_s13 + $0x68] sm:$0xff] }
 0x21a   : > { %v2977_v8 = vpop.f32.mrf.mxu1 }
 0x21b   : > { %v6773_v0 = vadd.f32 %v2832_v5, %v2506_v63  ;;  %v2728_v5 = vshll.u32 %v5993_v3, 16  ;;  %v5960_v8 = vld [vmem:[%s6227_s13 + $0x60] sm:$0xff] }
 0x21d   : > { %v2730_v10 = vrot.slane %v2728_v5, 1 }
 0x21e   : > { %v2190_v25 = vpop.f32.mrf.mxu2  ;;  %v2444_v15 = vpop.f32.mrf.mxu3 }
 0x21f   : > { %v6797_v27 = vsel %vm843_vm2, %v2726_v39, %v2730_v10 }
 0x221   : > { %v2836_v52 = vpop.f32.mrf.mxu0 }
 0x222   : > { %v6777_v18 = vpop.f32.mrf.mxu1 }
 0x223   : > { %5346 = vmatmul.msk.bf16.gmra.mxu2 %vm395_vm1, %v5959_v56  ;;  %5427 = vmatmul.msk.bf16.gmra.mxu3 %vm395_vm1, %v5975_v35 }
 0x224   : > { %5508 = vmatmul.msk.bf16.gmra.mxu0 %vm395_vm1, %v6780_v31 }
 0x225   : > { %5524 = vmatmul.msk.bf16.gmra.mxu1 %vm395_vm1, %v6503_v49  ;;  %v5976_v49 = vld [vmem:[%s6222_s10 + $0x60] sm:$0xff] }
 0x226   : > { %v2192_v17 = vpop.f32.mrf.mxu2  ;;  %v2446_v30 = vpop.f32.mrf.mxu3 }
 0x227   : > { %v2253_v53 = vadd.f32 %v2192_v17, %v6518_v36  ;;  %v5994_v36 = vld [vmem:[%s6227_s13 + $0x70] sm:$0xff] }
 0x228   : > { %v2736_v17 = vshll.u32 %v5994_v36, 16 }
 0x229   : > { %v2507_v62 = vadd.f32 %v2446_v30, %v2253_v53  ;;  %v2838_v44 = vpop.f32.mrf.mxu0 }
 0x22a   : > { %v2981_v4 = vpop.f32.mrf.mxu1 }
 0x22b   : > { %v6790_v40 = vadd.f32 %v2836_v52, %v2507_v62  ;;  %v2732_v52 = vshrl.u32 %v5993_v3, 16  ;;  %v2738_v62 = vrot.slane %v2736_v17, 1  ;;  %v5962_v17 = vld [vmem:[%s6227_s13 + $0x70] sm:$0xff] }
 0x22d   : > { %v2734_v53 = vor.u32 %v2732_v52, %v2730_v10 }
 0x22e   : > { %v2194_v63 = vpop.f32.mrf.mxu2  ;;  %v2448_v43 = vpop.f32.mrf.mxu3 }
 0x22f   : > { %v6814_v63 = vsel %vm843_vm2, %v2734_v53, %v2738_v62 }
 0x231   : > { %v2840_v60 = vpop.f32.mrf.mxu0 }
 0x232   : > { %v6794_v38 = vpop.f32.mrf.mxu1 }
 0x233   : > { %5347 = vmatmul.msk.bf16.gmra.mxu2 %vm395_vm1, %v5960_v8  ;;  %5428 = vmatmul.msk.bf16.gmra.mxu3 %vm395_vm1, %v5976_v49 }
 0x234   : > { %5509 = vmatmul.msk.bf16.gmra.mxu0 %vm395_vm1, %v6797_v27 }
 0x235   : > { %5525 = vmatmul.msk.bf16.gmra.mxu1 %vm395_vm1, %v6522_v14  ;;  %v5977_v14 = vld [vmem:[%s6222_s10 + $0x68] sm:$0xff] }
 0x236   : > { %v2196_v37 = vpop.f32.mrf.mxu2  ;;  %v2450_v61 = vpop.f32.mrf.mxu3 }
 0x237   : > { %v2254_v25 = vadd.f32 %v2196_v37, %v6537_v28  ;;  %v5995_v28 = vld [vmem:[%s6227_s13 + $0x78] sm:$0xff]  ;;  %v2740_v37 = vshrl.u32 %v5994_v36, 16 }
 0x239   : > { %v2508_v15 = vadd.f32 %v2450_v61, %v2254_v25  ;;  %v2842_v56 = vpop.f32.mrf.mxu0  ;;  %v2744_v61 = vshll.u32 %v5995_v28, 16 }
 0x23a   : > { %v2985_v35 = vpop.f32.mrf.mxu1 }
 0x23b   : > { %v6807_v30 = vadd.f32 %v2840_v60, %v2508_v15  ;;  %v2742_v15 = vor.u32 %v2740_v37, %v2738_v62  ;;  %v2746_v56 = vrot.slane %v2744_v61, 1 }
 0x23e   : > { %v2198_v44 = vpop.f32.mrf.mxu2  ;;  %v2452_v4 = vpop.f32.mrf.mxu3 }
 0x23f   : > { %v6831_v4 = vsel %vm843_vm2, %v2742_v15, %v2746_v56  ;;  %v5963_v15 = vld [vmem:[%s6227_s13 + $0x78] sm:$0xff] }
 0x241   : > { %v2844_v5 = vpop.f32.mrf.mxu0 }
 0x242   : > { %v6811_v39 = vpop.f32.mrf.mxu1 }
 0x243   : > { %5348 = vmatmul.msk.bf16.gmra.mxu2 %vm395_vm1, %v5961_v21  ;;  %5429 = vmatmul.msk.bf16.gmra.mxu3 %vm395_vm1, %v5977_v14 }
 0x244   : > { %5510 = vmatmul.msk.bf16.gmra.mxu0 %vm395_vm1, %v6814_v63 }
 0x245   : > { %5526 = vmatmul.msk.bf16.gmra.mxu1 %vm395_vm1, %v6541_v20  ;;  %v5978_v20 = vld [vmem:[%s6222_s10 + $0x70] sm:$0xff] }
 0x246   : > { %v2200_v3 = vpop.f32.mrf.mxu2  ;;  %v2454_v10 = vpop.f32.mrf.mxu3 }
 0x247   : > { %v2255_v43 = vadd.f32 %v2200_v3, %v6556_v22  ;;  %v5996_v22 = vld [vmem:[%s6227_s13 + $0x80] sm:$0xff] }
 0x249   : > { %v2509_v8 = vadd.f32 %v2454_v10, %v2255_v43  ;;  %v2846_v49 = vpop.f32.mrf.mxu0  ;;  %v2748_v10 = vshrl.u32 %v5995_v28, 16  ;;  %v2752_v43 = vshll.u32 %v5996_v22, 16 }
 0x24a   : > { %v2989_v60 = vpop.f32.mrf.mxu1 }
 0x24b   : > { %v6824_v25 = vadd.f32 %v2844_v5, %v2509_v8  ;;  %v2750_v49 = vor.u32 %v2748_v10, %v2746_v56  ;;  %v2754_v60 = vrot.slane %v2752_v43, 1 }
 0x24e   : > { %v2202_v35 = vpop.f32.mrf.mxu2  ;;  %v2456_v52 = vpop.f32.mrf.mxu3 }
 0x251   : > { %v2848_v53 = vpop.f32.mrf.mxu0 }
 0x252   : > { %v6828_v44 = vpop.f32.mrf.mxu1 }
 0x253   : > { %5349 = vmatmul.msk.bf16.gmra.mxu2 %vm395_vm1, %v5962_v17  ;;  %5430 = vmatmul.msk.bf16.gmra.mxu3 %vm395_vm1, %v5978_v20  ;;  %v6848_v17 = vsel %vm843_vm2, %v2750_v49, %v2754_v60 }
 0x254   : > { %5511 = vmatmul.msk.bf16.gmra.mxu0 %vm395_vm1, %v6831_v4  ;;  %7453 = vst [vmem:[#allocation14_spill] sm:$0xff] %v6848_v17 }
 0x255   : > { %5527 = vmatmul.msk.bf16.gmra.mxu1 %vm395_vm1, %v6560_v19  ;;  %v5979_v19 = vld [vmem:[%s6222_s10 + $0x78] sm:$0xff] }
 0x256   : > { %v2204_v36 = vpop.f32.mrf.mxu2  ;;  %v2458_v62 = vpop.f32.mrf.mxu3 }
 0x257   : > { %v2256_v21 = vadd.f32 %v2204_v36, %v6575_v23  ;;  %v5997_v23 = vld [vmem:[%s6227_s13 + $0x88] sm:$0xff] }
 0x259   : > { %v2510_v14 = vadd.f32 %v2458_v62, %v2256_v21  ;;  %v2850_v5 = vpop.f32.mrf.mxu0  ;;  %v2756_v21 = vshrl.u32 %v5996_v22, 16 }
 0x25a   : > { %v2993_v3 = vpop.f32.mrf.mxu1 }
 0x25b   : > { %v6841_v8 = vadd.f32 %v2848_v53, %v2510_v14  ;;  %v2760_v14 = vshll.u32 %v5997_v23, 16  ;;  %v2758_v3 = vor.u32 %v2756_v21, %v2754_v60 }
 0x25d   : > { %v2762_v10 = vrot.slane %v2760_v14, 1 }
 0x25e   : > { %v2206_v37 = vpop.f32.mrf.mxu2  ;;  %v2460_v61 = vpop.f32.mrf.mxu3 }
 0x25f   : > { %v2554_v37 = vld [vmem:[%s6227_s13 + $0x90] sm:$0x1]  ;;  %v5980_v61 = vld [vmem:[%s6222_s10 + $0x80] sm:$0xff] }
 0x261   : > { %v2852_v35 = vpop.f32.mrf.mxu0 }
 0x262   : > { %v6845_v52 = vpop.f32.mrf.mxu1 }
 0x263   : > { %5350 = vmatmul.msk.bf16.gmra.mxu2 %vm395_vm1, %v5963_v15  ;;  %5431 = vmatmul.msk.bf16.gmra.mxu3 %vm395_vm1, %v5979_v19 }
 0x264   : > { %5512 = vmatmul.msk.bf16.gmra.mxu0 %vm395_vm1, %v6848_v17  ;;  %v6866_v17 = vsel %vm843_vm2, %v2758_v3, %v2762_v10 }
 0x265   : > { %5528 = vmatmul.msk.bf16.gmra.mxu1 %vm395_vm1, %v6579_v42  ;;  %v5964_v42 = vld [vmem:[%s6227_s13 + $0x80] sm:$0xff] }
 0x266   : > { %v2208_v28 = vpop.f32.mrf.mxu2  ;;  %v2462_v56 = vpop.f32.mrf.mxu3 }
 0x267   : > { %v2257_v20 = vadd.f32 %v2208_v28, %v6595_v29  ;;  %v2622_v29 = vunpack.c.l.b16 %v2554_v37  ;;  %v5981_v37 = vld [vmem:[%s6222_s10 + $0x88] sm:$0xff] }
 0x269   : > { %v2511_v53 = vadd.f32 %v2462_v56, %v2257_v20  ;;  %v2854_v36 = vpop.f32.mrf.mxu0  ;;  %v2639_v22 = vpack.c.b16 %v2622_v29, %v2622_v29 }
 0x26a   : > { %v2997_v62 = vpop.f32.mrf.mxu1  ;;  %v2764_v36 = vshrl.u32 %v5997_v23, 16  ;;  %v5999_v23 = vld [vmem:[%s6222_s10 + $0x8] sm:$0xff] }
 0x26b   : > { %v6858_v5 = vadd.f32 %v2852_v35, %v2511_v53  ;;  %v2768_v62 = vshll.u32 %v2639_v22, 16 }
 0x26c   : > { %v2766_v14 = vor.u32 %v2764_v36, %v2762_v10 }
 0x26d   : > { %v2770_v3 = vrot.slane %v2768_v62, 1 }
 0x26e   : > { %v2210_v43 = vpop.f32.mrf.mxu2  ;;  %v2464_v49 = vpop.f32.mrf.mxu3 }
 0x271   : > { %v2856_v15 = vpop.f32.mrf.mxu0 }
 0x272   : > { %v6863_v19 = vpop.f32.mrf.mxu1 }
 0x273   : > { %5351 = vmatmul.msk.bf16.gmra.mxu2 %vm395_vm1, %v5964_v42  ;;  %5432 = vmatmul.msk.bf16.gmra.mxu3 %vm395_vm1, %v5980_v61  ;;  %v5998_v42 = vld [vmem:[%s6222_s10] sm:$0xff] }
 0x274   : > { %5513 = vmatmul.msk.bf16.gmra.mxu0 %vm395_vm1, %v6866_v17  ;;  %v3231_v10 = vshll.u32 %v5998_v42, 16 }
 0x275   : > { %5529 = vmatmul.msk.bf16.gmra.mxu1 %vm395_vm1, %v6600_v26  ;;  %v5965_v26 = vld [vmem:[%s6227_s13 + $0x88] sm:$0xff] }
 0x276   : > { %v2212_v60 = vpop.f32.mrf.mxu2  ;;  %v2466_v35 = vpop.f32.mrf.mxu3 }
 0x277   : > { %v2258_v28 = vadd.f32 %v2212_v60, %v6613_v58  ;;  %v6883_v58 = vsel %vm843_vm2, %v2766_v14, %v2770_v3 }
 0x279   : > { %v2512_v56 = vadd.f32 %v2466_v35, %v2258_v28  ;;  %v2858_v20 = vpop.f32.mrf.mxu0  ;;  %v3229_v35 = vshrl.u32 %v5998_v42, 16  ;;  %v3233_v28 = vrot.slane %v3231_v10, 1  ;;  %v6083_v42 = vld [vmem:[%s6222_s10 + $0x8] sm:$0xff] }
 0x27a   : > { %v3001_v53 = vpop.f32.mrf.mxu1 }
 0x27b   : > { %v6875_v21 = vadd.f32 %v2856_v15, %v2512_v56  ;;  %v3236_v56 = vshll.u32 %v5999_v23, 16  ;;  %v3234_v14 = vor.u32 %v3233_v28, %v3229_v35 }
 0x27d   : > { %v3238_v3 = vrot.slane %v3236_v56, 1 }
 0x27e   : > { %v2214_v43 = vpop.f32.mrf.mxu2  ;;  %v2468_v49 = vpop.f32.mrf.mxu3 }
 0x27f   : > { %v3239_v49 = vsel %vm843_vm2, %v3234_v14, %v3238_v3 }
 0x281   : > { %v2860_v61 = vpop.f32.mrf.mxu0 }
 0x282   : > { %v6880_v29 = vpop.f32.mrf.mxu1 }
 0x283   : > { %5352 = vmatmul.msk.bf16.gmra.mxu2 %vm395_vm1, %v5965_v26  ;;  %5433 = vmatmul.msk.bf16.gmra.mxu3 %vm395_vm1, %v5981_v37 }
 0x284   : > { %5514 = vmatmul.msk.bf16.gmra.mxu0 %vm395_vm1, %v6883_v58 }
 0x285   : > { %5530 = vmatmul.msk.bf16.gmra.mxu1 %vm395_vm1, %v6617_v7 }
 0x286   : > { %v2216_v15 = vpop.f32.mrf.mxu2  ;;  %v2470_v22 = vpop.f32.mrf.mxu3 }
 0x287   : > { %v2259_v60 = vadd.f32 %v2216_v15, %v6632_v47  ;;  %v6082_v47 = vld [vmem:[%s6222_s10] sm:$0xff] }
 0x289   : > { %v2513_v20 = vadd.f32 %v2470_v22, %v2259_v60  ;;  %v2862_v53 = vpop.f32.mrf.mxu0  ;;  %v3240_v60 = vshrl.u32 %v5999_v23, 16  ;;  %v6001_v23 = vld [vmem:[%s6222_s10 + $0x18] sm:$0xff] }
 0x28a   : > { %v3005_v36 = vpop.f32.mrf.mxu1 }
 0x28b   : > { %v6893_v62 = vadd.f32 %v2860_v61, %v2513_v20  ;;  %v6000_v61 = vld [vmem:[%s6222_s10 + $0x10] sm:$0xff]  ;;  %v3242_v36 = vor.u32 %v3240_v60, %v3238_v3 }
 0x28c   : > { %v3244_v35 = vshll.u32 %v6000_v61, 16 }
 0x28d   : > { %7454 = vst [vmem:[#allocation15_spill] sm:$0xff] %v6893_v62 }
 0x28e   : > { %v2218_v7 = vpop.f32.mrf.mxu2  ;;  %v2472_v43 = vpop.f32.mrf.mxu3  ;;  %v3246_v14 = vrot.slane %v3244_v35, 1 }
 0x291   : > { %v2864_v26 = vpop.f32.mrf.mxu0 }
 0x292   : > { %v6896_v37 = vpop.f32.mrf.mxu1 }
 0x293   : > { %5531 = vmatmul.msk.bf16.vlgmr.msrb.gmra.mxu2 %vm395_vm1, %v6082_v47  ;;  %5611 = vmatmul.msk.bf16.vlgmr.msrb.gmra.mxu3 %vm395_vm1, %v3239_v49 }
 0x294   : > { %5627 = vmatmul.msk.bf16.vlgmr.msrb.gmra.mxu0 %vm395_vm1, %v6083_v42  ;;  %v6084_v42 = vld [vmem:[%s6222_s10 + $0x8] sm:$0xff] }
 0x295   : > { %5643 = vmatmul.msk.bf16.vlgmr.msrb.gmra.mxu1 %vm395_vm1, %v6324_v12  ;;  %v3247_v12 = vsel %vm843_vm2, %v3242_v36, %v3246_v14 }
 0x296   : > { %v2220_v10 = vpop.f32.mrf.mxu2  ;;  %v2474_v15 = vpop.f32.mrf.mxu3 }
 0x297   : > { %v2260_v22 = vadd.f32 %v2220_v10, %v6651_v41  ;;  %v6085_v41 = vld [vmem:[%s6222_s10 + $0x10] sm:$0xff] }
 0x299   : > { %v2514_v28 = vadd.f32 %v2474_v15, %v2260_v22  ;;  %v2866_v56 = vpop.f32.mrf.mxu0  ;;  %v3248_v15 = vshrl.u32 %v6000_v61, 16  ;;  %v3252_v22 = vshll.u32 %v6001_v23, 16  ;;  %v6002_v61 = vld [vmem:[%s6222_s10 + $0x20] sm:$0xff] }
 0x29a   : > { %v3009_v20 = vpop.f32.mrf.mxu1 }
 0x29b   : > { %v6907_v53 = vadd.f32 %v2864_v26, %v2514_v28  ;;  %v3250_v20 = vor.u32 %v3248_v15, %v3246_v14  ;;  %v3254_v36 = vrot.slane %v3252_v22, 1 }
 0x29d   : > { %7455 = vst [vmem:[#allocation16_spill] sm:$0xff] %v6907_v53 }
 0x29e   : > { %v2222_v7 = vpop.f32.mrf.mxu2  ;;  %v2476_v43 = vpop.f32.mrf.mxu3 }
 0x2a1   : > { %v2868_v49 = vpop.f32.mrf.mxu0 }
 0x2a2   : > { %v6910_v47 = vpop.f32.mrf.mxu1 }
 0x2a3   : > { %5532 = vmatmul.msk.bf16.gmra.mxu2 %vm395_vm1, %v6084_v42  ;;  %5612 = vmatmul.msk.bf16.gmra.mxu3 %vm395_vm1, %v3247_v12 }
 0x2a4   : > { %5628 = vmatmul.msk.bf16.gmra.mxu0 %vm395_vm1, %v6085_v41  ;;  %v6086_v41 = vld [vmem:[%s6222_s10 + $0x10] sm:$0xff] }
 0x2a5   : > { %5644 = vmatmul.msk.bf16.gmra.mxu1 %vm395_vm1, %v6348_v32  ;;  %v3255_v32 = vsel %vm843_vm2, %v3250_v20, %v3254_v36 }
 0x2a6   : > { %v2224_v3 = vpop.f32.mrf.mxu2  ;;  %v2478_v26 = vpop.f32.mrf.mxu3 }
 0x2a7   : > { %v2261_v10 = vadd.f32 %v2224_v3, %v6666_v33  ;;  %v6087_v33 = vld [vmem:[%s6222_s10 + $0x18] sm:$0xff] }
 0x2a9   : > { %v2515_v60 = vadd.f32 %v2478_v26, %v2261_v10  ;;  %v2870_v35 = vpop.f32.mrf.mxu0  ;;  %v3256_v26 = vshrl.u32 %v6001_v23, 16  ;;  %v3260_v10 = vshll.u32 %v6002_v61, 16  ;;  %v7458_v23 = vld [vmem:[#allocation2_spill] sm:$0xff] }
 0x2aa   : > { %v3013_v28 = vpop.f32.mrf.mxu1 }
 0x2ab   : > { %v6921_v56 = vadd.f32 %v2868_v49, %v2515_v60  ;;  %v3258_v28 = vor.u32 %v3256_v26, %v3254_v36  ;;  %v3262_v20 = vrot.slane %v3260_v10, 1  ;;  %v6003_v36 = vld [vmem:[%s6222_s10 + $0x28] sm:$0xff] }
 0x2ac   : > { %v3268_v26 = vshll.u32 %v6003_v36, 16 }
 0x2ad   : > { %7456 = vst [vmem:[#allocation17_spill] sm:$0xff] %v6921_v56  ;;  %v6100_v56 = vld [vmem:[%s6222_s10 + $0x48] sm:$0xff] }
 0x2ae   : > { %v2226_v7 = vpop.f32.mrf.mxu2  ;;  %v2480_v43 = vpop.f32.mrf.mxu3 }
 0x2b1   : > { %v2872_v12 = vpop.f32.mrf.mxu0 }
 0x2b2   : > { %v6924_v42 = vpop.f32.mrf.mxu1 }
 0x2b3   : > { %5533 = vmatmul.msk.bf16.gmra.mxu2 %vm395_vm1, %v6086_v41  ;;  %5613 = vmatmul.msk.bf16.gmra.mxu3 %vm395_vm1, %v3255_v32 }
 0x2b4   : > { %5629 = vmatmul.msk.bf16.gmra.mxu0 %vm395_vm1, %v6087_v33  ;;  %v6088_v33 = vld [vmem:[%s6222_s10 + $0x18] sm:$0xff] }
 0x2b5   : > { %5645 = vmatmul.msk.bf16.gmra.mxu1 %vm395_vm1, %v6368_v59  ;;  %v3263_v59 = vsel %vm843_vm2, %v3258_v28, %v3262_v20 }
 0x2b6   : > { %v2228_v14 = vpop.f32.mrf.mxu2  ;;  %v2482_v49 = vpop.f32.mrf.mxu3 }
 0x2b7   : > { %v2262_v3 = vadd.f32 %v2228_v14, %v6681_v2  ;;  %v6089_v2 = vld [vmem:[%s6222_s10 + $0x20] sm:$0xff] }
 0x2b9   : > { %v2516_v15 = vadd.f32 %v2482_v49, %v2262_v3  ;;  %v2874_v22 = vpop.f32.mrf.mxu0  ;;  %v3264_v3 = vshrl.u32 %v6002_v61, 16  ;;  %v7460_v61 = vld [vmem:[#allocation3_spill] sm:$0xff] }
 0x2ba   : > { %v3017_v60 = vpop.f32.mrf.mxu1 }
 0x2bb   : > { %v6935_v35 = vadd.f32 %v2872_v12, %v2516_v15  ;;  %v3266_v28 = vor.u32 %v3264_v3, %v3262_v20  ;;  %v6004_v20 = vld [vmem:[%s6222_s10 + $0x30] sm:$0xff] }
 0x2bc   : > { %v3276_v3 = vshll.u32 %v6004_v20, 16 }
 0x2bd   : > { %7457 = vst [vmem:[#allocation18_spill] sm:$0xff] %v6935_v35  ;;  %v6090_v35 = vld [vmem:[%s6222_s10 + $0x20] sm:$0xff] }
 0x2be   : > { %v2230_v7 = vpop.f32.mrf.mxu2  ;;  %v2484_v43 = vpop.f32.mrf.mxu3 }
 0x2bf   : > { %v3270_v7 = vrot.slane %v3268_v26, 1 }
 0x2c1   : > { %v2876_v32 = vpop.f32.mrf.mxu0 }
 0x2c2   : > { %v6938_v41 = vpop.f32.mrf.mxu1 }
 0x2c3   : > { %5534 = vmatmul.msk.bf16.gmra.mxu2 %vm395_vm1, %v6088_v33  ;;  %5614 = vmatmul.msk.bf16.gmra.mxu3 %vm395_vm1, %v3263_v59  ;;  %v3271_v33 = vsel %vm843_vm2, %v3266_v28, %v3270_v7  ;;  %v3278_v28 = vrot.slane %v3276_v3, 1 }
 0x2c4   : > { %5630 = vmatmul.msk.bf16.gmra.mxu0 %vm395_vm1, %v6089_v2 }
 0x2c5   : > { %5646 = vmatmul.msk.bf16.gmra.mxu1 %vm395_vm1, %v7458_v23 }
 0x2c6   : > { %v2232_v12 = vpop.f32.mrf.mxu2  ;;  %v2486_v14 = vpop.f32.mrf.mxu3 }
 0x2c7   : > { %v2263_v49 = vadd.f32 %v2232_v12, %v6696_v46  ;;  %v6091_v46 = vld [vmem:[%s6222_s10 + $0x28] sm:$0xff] }
 0x2c9   : > { %v2517_v10 = vadd.f32 %v2486_v14, %v2263_v49  ;;  %v2878_v15 = vpop.f32.mrf.mxu0  ;;  %v3272_v49 = vshrl.u32 %v6003_v36, 16  ;;  %v7462_v36 = vld [vmem:[#allocation4_spill] sm:$0xff] }
 0x2ca   : > { %v3021_v22 = vpop.f32.mrf.mxu1 }
 0x2cb   : > { %v6949_v60 = vadd.f32 %v2876_v32, %v2517_v10  ;;  %v3274_v22 = vor.u32 %v3272_v49, %v3270_v7  ;;  %v6005_v7 = vld [vmem:[%s6222_s10 + $0x38] sm:$0xff] }
 0x2cc   : > { %v3284_v49 = vshll.u32 %v6005_v7, 16 }
 0x2cd   : > { %7459 = vst [vmem:[#allocation2_spill] sm:$0xff] %v6949_v60  ;;  %v6092_v60 = vld [vmem:[%s6222_s10 + $0x28] sm:$0xff] }
 0x2ce   : > { %v2234_v43 = vpop.f32.mrf.mxu2  ;;  %v2488_v59 = vpop.f32.mrf.mxu3 }
 0x2d1   : > { %v2880_v2 = vpop.f32.mrf.mxu0 }
 0x2d2   : > { %v6952_v23 = vpop.f32.mrf.mxu1 }
 0x2d3   : > { %5535 = vmatmul.msk.bf16.gmra.mxu2 %vm395_vm1, %v6090_v35  ;;  %5615 = vmatmul.msk.bf16.gmra.mxu3 %vm395_vm1, %v3271_v33  ;;  %v3279_v33 = vsel %vm843_vm2, %v3274_v22, %v3278_v28  ;;  %v3286_v22 = vrot.slane %v3284_v49, 1 }
 0x2d4   : > { %5631 = vmatmul.msk.bf16.gmra.mxu0 %vm395_vm1, %v6091_v46 }
 0x2d5   : > { %5647 = vmatmul.msk.bf16.gmra.mxu1 %vm395_vm1, %v7460_v61 }
 0x2d6   : > { %v2236_v32 = vpop.f32.mrf.mxu2  ;;  %v2490_v12 = vpop.f32.mrf.mxu3 }
 0x2d7   : > { %v2264_v14 = vadd.f32 %v2236_v32, %v6711_v9  ;;  %v6093_v9 = vld [vmem:[%s6222_s10 + $0x30] sm:$0xff] }
 0x2d9   : > { %v2518_v26 = vadd.f32 %v2490_v12, %v2264_v14  ;;  %v2882_v10 = vpop.f32.mrf.mxu0  ;;  %v3280_v14 = vshrl.u32 %v6004_v20, 16  ;;  %v7464_v20 = vld [vmem:[#allocation5_spill] sm:$0xff] }
 0x2da   : > { %v3025_v35 = vpop.f32.mrf.mxu1 }
 0x2db   : > { %v6963_v15 = vadd.f32 %v2880_v2, %v2518_v26  ;;  %v3282_v35 = vor.u32 %v3280_v14, %v3278_v28  ;;  %v6006_v28 = vld [vmem:[%s6222_s10 + $0x40] sm:$0xff] }
 0x2dc   : > { %v3292_v14 = vshll.u32 %v6006_v28, 16 }
 0x2dd   : > { %7461 = vst [vmem:[#allocation3_spill] sm:$0xff] %v6963_v15  ;;  %v6094_v15 = vld [vmem:[%s6222_s10 + $0x30] sm:$0xff] }
 0x2de   : > { %v2238_v43 = vpop.f32.mrf.mxu2  ;;  %v2492_v59 = vpop.f32.mrf.mxu3 }
 0x2e1   : > { %v2884_v46 = vpop.f32.mrf.mxu0 }
 0x2e2   : > { %v6966_v61 = vpop.f32.mrf.mxu1 }
 0x2e3   : > { %5536 = vmatmul.msk.bf16.gmra.mxu2 %vm395_vm1, %v6092_v60  ;;  %5616 = vmatmul.msk.bf16.gmra.mxu3 %vm395_vm1, %v3279_v33  ;;  %v3287_v33 = vsel %vm843_vm2, %v3282_v35, %v3286_v22  ;;  %v3294_v35 = vrot.slane %v3292_v14, 1 }
 0x2e4   : > { %5632 = vmatmul.msk.bf16.gmra.mxu0 %vm395_vm1, %v6093_v9 }
 0x2e5   : > { %5648 = vmatmul.msk.bf16.gmra.mxu1 %vm395_vm1, %v7462_v36 }
 0x2e6   : > { %v2240_v2 = vpop.f32.mrf.mxu2  ;;  %v2494_v32 = vpop.f32.mrf.mxu3 }
 0x2e7   : > { %v2265_v12 = vadd.f32 %v2240_v2, %v6726_v55  ;;  %v6095_v55 = vld [vmem:[%s6222_s10 + $0x38] sm:$0xff] }
 0x2e9   : > { %v2519_v3 = vadd.f32 %v2494_v32, %v2265_v12  ;;  %v2886_v26 = vpop.f32.mrf.mxu0  ;;  %v3288_v12 = vshrl.u32 %v6005_v7, 16  ;;  %v7466_v7 = vld [vmem:[#allocation6_spill] sm:$0xff] }
 0x2ea   : > { %v3029_v60 = vpop.f32.mrf.mxu1 }
 0x2eb   : > { %v6977_v10 = vadd.f32 %v2884_v46, %v2519_v3  ;;  %v3290_v60 = vor.u32 %v3288_v12, %v3286_v22  ;;  %v6007_v22 = vld [vmem:[%s6222_s10 + $0x48] sm:$0xff] }
 0x2ec   : > { %v3300_v12 = vshll.u32 %v6007_v22, 16 }
 0x2ed   : > { %7463 = vst [vmem:[#allocation4_spill] sm:$0xff] %v6977_v10  ;;  %v6096_v10 = vld [vmem:[%s6222_s10 + $0x38] sm:$0xff] }
 0x2ee   : > { %v2242_v43 = vpop.f32.mrf.mxu2  ;;  %v2496_v59 = vpop.f32.mrf.mxu3 }
 0x2f1   : > { %v2888_v9 = vpop.f32.mrf.mxu0 }
 0x2f2   : > { %v6980_v36 = vpop.f32.mrf.mxu1 }
 0x2f3   : > { %5537 = vmatmul.msk.bf16.gmra.mxu2 %vm395_vm1, %v6094_v15  ;;  %5617 = vmatmul.msk.bf16.gmra.mxu3 %vm395_vm1, %v3287_v33  ;;  %v3295_v33 = vsel %vm843_vm2, %v3290_v60, %v3294_v35  ;;  %v3302_v60 = vrot.slane %v3300_v12, 1 }
 0x2f4   : > { %5633 = vmatmul.msk.bf16.gmra.mxu0 %vm395_vm1, %v6095_v55 }
 0x2f5   : > { %5649 = vmatmul.msk.bf16.gmra.mxu1 %vm395_vm1, %v7464_v20 }
 0x2f6   : > { %v2244_v46 = vpop.f32.mrf.mxu2  ;;  %v2498_v2 = vpop.f32.mrf.mxu3 }
 0x2f7   : > { %v2266_v32 = vadd.f32 %v2244_v46, %v6741_v24  ;;  %v6097_v24 = vld [vmem:[%s6222_s10 + $0x40] sm:$0xff] }
 0x2f9   : > { %v2520_v49 = vadd.f32 %v2498_v2, %v2266_v32  ;;  %v2890_v3 = vpop.f32.mrf.mxu0  ;;  %v3296_v32 = vshrl.u32 %v6006_v28, 16  ;;  %v7468_v28 = vld [vmem:[#allocation7_spill] sm:$0xff] }
 0x2fa   : > { %v3033_v15 = vpop.f32.mrf.mxu1 }
 0x2fb   : > { %v6991_v26 = vadd.f32 %v2888_v9, %v2520_v49  ;;  %v3298_v15 = vor.u32 %v3296_v32, %v3294_v35 }
 0x2fd   : > { %7465 = vst [vmem:[#allocation5_spill] sm:$0xff] %v6991_v26  ;;  %v6098_v26 = vld [vmem:[%s6222_s10 + $0x40] sm:$0xff] }
 0x2fe   : > { %v2246_v43 = vpop.f32.mrf.mxu2  ;;  %v2500_v59 = vpop.f32.mrf.mxu3 }
 0x301   : > { %v2892_v55 = vpop.f32.mrf.mxu0 }
 0x302   : > { %v6994_v20 = vpop.f32.mrf.mxu1 }
 0x303   : > { %5538 = vmatmul.msk.bf16.gmra.mxu2 %vm395_vm1, %v6096_v10  ;;  %5618 = vmatmul.msk.bf16.gmra.mxu3 %vm395_vm1, %v3295_v33  ;;  %v3303_v33 = vsel %vm843_vm2, %v3298_v15, %v3302_v60 }
 0x304   : > { %5634 = vmatmul.msk.bf16.gmra.mxu0 %vm395_vm1, %v6097_v24 }
 0x305   : > { %5650 = vmatmul.msk.bf16.gmra.mxu1 %vm395_vm1, %v7466_v7 }
 0x306   : > { %v2248_v9 = vpop.f32.mrf.mxu2  ;;  %v2502_v46 = vpop.f32.mrf.mxu3 }
 0x307   : > { %v2267_v2 = vadd.f32 %v2248_v9, %v6756_v51  ;;  %v6099_v51 = vld [vmem:[%s6222_s10 + $0x48] sm:$0xff] }
 0x309   : > { %v2521_v14 = vadd.f32 %v2502_v46, %v2267_v2  ;;  %v2894_v49 = vpop.f32.mrf.mxu0  ;;  %v3304_v2 = vshrl.u32 %v6007_v22, 16  ;;  %v7469_v22 = vld [vmem:[#allocation8_spill] sm:$0xff] }
 0x30a   : > { %v3037_v10 = vpop.f32.mrf.mxu1 }
 0x30b   : > { %v7005_v3 = vadd.f32 %v2892_v55, %v2521_v14  ;;  %v6008_v55 = vld [vmem:[%s6222_s10 + $0x50] sm:$0xff]  ;;  %v3306_v10 = vor.u32 %v3304_v2, %v3302_v60  ;;  %v6009_v60 = vld [vmem:[%s6222_s10 + $0x58] sm:$0xff] }
 0x30c   : > { %v3308_v32 = vshll.u32 %v6008_v55, 16 }
 0x30d   : > { %7467 = vst [vmem:[#allocation6_spill] sm:$0xff] %v7005_v3 }
 0x30e   : > { %v2250_v43 = vpop.f32.mrf.mxu2  ;;  %v2504_v59 = vpop.f32.mrf.mxu3  ;;  %v3310_v15 = vrot.slane %v3308_v32, 1 }
 0x311   : > { %v3506_v24 = vpop.f32.mrf.mxu0 }
 0x312   : > { %v3595_v7 = vpop.f32.mrf.mxu1 }
 0x313   : > { %5539 = vmatmul.msk.bf16.gmra.mxu2 %vm395_vm1, %v6098_v26  ;;  %5619 = vmatmul.msk.bf16.gmra.mxu3 %vm395_vm1, %v3303_v33 }
 0x314   : > { %5635 = vmatmul.msk.bf16.gmra.mxu0 %vm395_vm1, %v6099_v51  ;;  %v3311_v51 = vsel %vm843_vm2, %v3306_v10, %v3310_v15 }
 0x315   : > { %5651 = vmatmul.msk.bf16.gmra.mxu1 %vm395_vm1, %v7468_v28 }
 0x316   : > { %v3048_v35 = vpop.f32.mrf.mxu2  ;;  %v3417_v9 = vpop.f32.mrf.mxu3 }
 0x317   : > { %v3049_v46 = vadd.f32 %v3048_v35, %v6760_v1  ;;  %v6101_v1 = vld [vmem:[%s6222_s10 + $0x50] sm:$0xff] }
 0x319   : > { %v3481_v12 = vadd.f32 %v3417_v9, %v3049_v46  ;;  %v3508_v14 = vpop.f32.mrf.mxu0  ;;  %v3312_v9 = vshrl.u32 %v6008_v55, 16  ;;  %v3316_v46 = vshll.u32 %v6009_v60, 16  ;;  %v7470_v55 = vld [vmem:[#allocation9_spill] sm:$0xff] }
 0x31a   : > { %v3597_v26 = vpop.f32.mrf.mxu1 }
 0x31b   : > { %v3570_v49 = vadd.f32 %v3506_v24, %v3481_v12  ;;  %v3314_v14 = vor.u32 %v3312_v9, %v3310_v15  ;;  %v3318_v26 = vrot.slane %v3316_v46, 1  ;;  %v6010_v15 = vld [vmem:[%s6222_s10 + $0x60] sm:$0xff] }
 0x31d   : > { %v7017_v43 = vadd.f32 %v3595_v7, %v3570_v49 }
 0x31e   : > { %v3050_v59 = vpop.f32.mrf.mxu2  ;;  %v3419_v33 = vpop.f32.mrf.mxu3 }
 0x31f   : > { %v3319_v33 = vsel %vm843_vm2, %v3314_v14, %v3318_v26 }
 0x321   : > { %v3510_v28 = vpop.f32.mrf.mxu0 }
 0x322   : > { %v3599_v3 = vpop.f32.mrf.mxu1 }
 0x323   : > { %5540 = vmatmul.msk.bf16.gmra.mxu2 %vm395_vm1, %v6100_v56  ;;  %5620 = vmatmul.msk.bf16.gmra.mxu3 %vm395_vm1, %v3311_v51 }
 0x324   : > { %5636 = vmatmul.msk.bf16.gmra.mxu0 %vm395_vm1, %v6101_v1 }
 0x325   : > { %5652 = vmatmul.msk.bf16.gmra.mxu1 %vm395_vm1, %v7469_v22  ;;  %v6102_v22 = vld [vmem:[%s6222_s10 + $0x50] sm:$0xff] }
 0x326   : > { %v3052_v24 = vpop.f32.mrf.mxu2  ;;  %v3421_v7 = vpop.f32.mrf.mxu3 }
 0x327   : > { %v3053_v35 = vadd.f32 %v3052_v24, %v6777_v18  ;;  %v6103_v18 = vld [vmem:[%s6222_s10 + $0x58] sm:$0xff] }
 0x329   : > { %v3482_v2 = vadd.f32 %v3421_v7, %v3053_v35  ;;  %v3512_v32 = vpop.f32.mrf.mxu0  ;;  %v3320_v7 = vshrl.u32 %v6009_v60, 16  ;;  %v3324_v35 = vshll.u32 %v6010_v15, 16  ;;  %v7471_v60 = vld [vmem:[#allocation10_spill] sm:$0xff] }
 0x32a   : > { %v3601_v56 = vpop.f32.mrf.mxu1 }
 0x32b   : > { %v3571_v12 = vadd.f32 %v3510_v28, %v3482_v2  ;;  %v3322_v56 = vor.u32 %v3320_v7, %v3318_v26  ;;  %v6011_v26 = vld [vmem:[%s6222_s10 + $0x68] sm:$0xff] }
 0x32d   : > { %v7029_v49 = vadd.f32 %v3599_v3, %v3571_v12  ;;  %v3326_v12 = vrot.slane %v3324_v35, 1 }
 0x32e   : > { %v3054_v10 = vpop.f32.mrf.mxu2  ;;  %v3423_v59 = vpop.f32.mrf.mxu3 }
 0x331   : > { %v3514_v51 = vpop.f32.mrf.mxu0 }
 0x332   : > { %v3603_v1 = vpop.f32.mrf.mxu1 }
 0x333   : > { %5541 = vmatmul.msk.bf16.gmra.mxu2 %vm395_vm1, %v6102_v22  ;;  %5621 = vmatmul.msk.bf16.gmra.mxu3 %vm395_vm1, %v3319_v33  ;;  %v3327_v33 = vsel %vm843_vm2, %v3322_v56, %v3326_v12 }
 0x334   : > { %5637 = vmatmul.msk.bf16.gmra.mxu0 %vm395_vm1, %v6103_v18 }
 0x335   : > { %5653 = vmatmul.msk.bf16.gmra.mxu1 %vm395_vm1, %v7470_v55  ;;  %v6104_v55 = vld [vmem:[%s6222_s10 + $0x58] sm:$0xff] }
 0x336   : > { %v3056_v3 = vpop.f32.mrf.mxu2  ;;  %v3425_v28 = vpop.f32.mrf.mxu3 }
 0x337   : > { %v3057_v24 = vadd.f32 %v3056_v3, %v6794_v38  ;;  %v6105_v38 = vld [vmem:[%s6222_s10 + $0x60] sm:$0xff] }
 0x339   : > { %v3483_v9 = vadd.f32 %v3425_v28, %v3057_v24  ;;  %v3516_v46 = vpop.f32.mrf.mxu0  ;;  %v3328_v28 = vshrl.u32 %v6010_v15, 16  ;;  %v3332_v24 = vshll.u32 %v6011_v26, 16  ;;  %v7472_v15 = vld [vmem:[#allocation11_spill] sm:$0xff] }
 0x33a   : > { %v3605_v2 = vpop.f32.mrf.mxu1 }
 0x33b   : > { %v3572_v32 = vadd.f32 %v3514_v51, %v3483_v9  ;;  %v3330_v2 = vor.u32 %v3328_v28, %v3326_v12  ;;  %v6012_v12 = vld [vmem:[%s6222_s10 + $0x70] sm:$0xff] }
 0x33d   : > { %v7041_v14 = vadd.f32 %v3603_v1, %v3572_v32  ;;  %v3334_v32 = vrot.slane %v3332_v24, 1 }
 0x33e   : > { %v3058_v10 = vpop.f32.mrf.mxu2  ;;  %v3427_v59 = vpop.f32.mrf.mxu3 }
 0x341   : > { %v3518_v22 = vpop.f32.mrf.mxu0 }
 0x342   : > { %v3607_v18 = vpop.f32.mrf.mxu1 }
 0x343   : > { %5542 = vmatmul.msk.bf16.gmra.mxu2 %vm395_vm1, %v6104_v55  ;;  %5622 = vmatmul.msk.bf16.gmra.mxu3 %vm395_vm1, %v3327_v33  ;;  %v3335_v33 = vsel %vm843_vm2, %v3330_v2, %v3334_v32 }
 0x344   : > { %5638 = vmatmul.msk.bf16.gmra.mxu0 %vm395_vm1, %v6105_v38 }
 0x345   : > { %5654 = vmatmul.msk.bf16.gmra.mxu1 %vm395_vm1, %v7471_v60  ;;  %v6106_v60 = vld [vmem:[%s6222_s10 + $0x60] sm:$0xff] }
 0x346   : > { %v3060_v51 = vpop.f32.mrf.mxu2  ;;  %v3429_v1 = vpop.f32.mrf.mxu3 }
 0x347   : > { %v3061_v3 = vadd.f32 %v3060_v51, %v6811_v39  ;;  %v6107_v39 = vld [vmem:[%s6222_s10 + $0x68] sm:$0xff] }
 0x349   : > { %v3484_v7 = vadd.f32 %v3429_v1, %v3061_v3  ;;  %v3520_v35 = vpop.f32.mrf.mxu0  ;;  %v3336_v1 = vshrl.u32 %v6011_v26, 16  ;;  %v3340_v3 = vshll.u32 %v6012_v12, 16  ;;  %v7473_v26 = vld [vmem:[#allocation12_spill] sm:$0xff] }
 0x34a   : > { %v3609_v9 = vpop.f32.mrf.mxu1 }
 0x34b   : > { %v3573_v46 = vadd.f32 %v3518_v22, %v3484_v7  ;;  %v3338_v9 = vor.u32 %v3336_v1, %v3334_v32  ;;  %v6013_v32 = vld [vmem:[%s6222_s10 + $0x78] sm:$0xff] }
 0x34d   : > { %v7053_v56 = vadd.f32 %v3607_v18, %v3573_v46  ;;  %v3342_v46 = vrot.slane %v3340_v3, 1 }
 0x34e   : > { %v3062_v10 = vpop.f32.mrf.mxu2  ;;  %v3431_v59 = vpop.f32.mrf.mxu3 }
 0x351   : > { %v3522_v55 = vpop.f32.mrf.mxu0 }
 0x352   : > { %v3611_v38 = vpop.f32.mrf.mxu1 }
 0x353   : > { %5543 = vmatmul.msk.bf16.gmra.mxu2 %vm395_vm1, %v6106_v60  ;;  %5623 = vmatmul.msk.bf16.gmra.mxu3 %vm395_vm1, %v3335_v33  ;;  %v3343_v33 = vsel %vm843_vm2, %v3338_v9, %v3342_v46  ;;  %v3144_v9 = vld [vmem:[%s6222_s10 + $0x80] sm:$0x1] }
 0x354   : > { %5639 = vmatmul.msk.bf16.gmra.mxu0 %vm395_vm1, %v6107_v39 }
 0x355   : > { %5655 = vmatmul.msk.bf16.gmra.mxu1 %vm395_vm1, %v7472_v15  ;;  %v6108_v15 = vld [vmem:[%s6222_s10 + $0x68] sm:$0xff] }
 0x356   : > { %v3064_v22 = vpop.f32.mrf.mxu2  ;;  %v3433_v18 = vpop.f32.mrf.mxu3 }
 0x357   : > { %v3065_v51 = vadd.f32 %v3064_v22, %v6828_v44  ;;  %v6109_v44 = vld [vmem:[%s6222_s10 + $0x70] sm:$0xff] }
 0x359   : > { %v3485_v28 = vadd.f32 %v3433_v18, %v3065_v51  ;;  %v3524_v24 = vpop.f32.mrf.mxu0  ;;  %v3344_v18 = vshrl.u32 %v6012_v12, 16  ;;  %v3348_v51 = vshll.u32 %v6013_v32, 16  ;;  %v6110_v12 = vld [vmem:[%s6222_s10 + $0x70] sm:$0xff] }
 0x35a   : > { %v3613_v7 = vpop.f32.mrf.mxu1 }
 0x35b   : > { %v3574_v35 = vadd.f32 %v3522_v55, %v3485_v28  ;;  %v3346_v7 = vor.u32 %v3344_v18, %v3342_v46 }
 0x35d   : > { %v7065_v2 = vadd.f32 %v3611_v38, %v3574_v35  ;;  %v3350_v35 = vrot.slane %v3348_v51, 1 }
 0x35e   : > { %v3066_v10 = vpop.f32.mrf.mxu2  ;;  %v3435_v59 = vpop.f32.mrf.mxu3 }
 0x361   : > { %v3526_v60 = vpop.f32.mrf.mxu0 }
 0x362   : > { %v3615_v39 = vpop.f32.mrf.mxu1 }
 0x363   : > { %5544 = vmatmul.msk.bf16.gmra.mxu2 %vm395_vm1, %v6108_v15  ;;  %5624 = vmatmul.msk.bf16.gmra.mxu3 %vm395_vm1, %v3343_v33  ;;  %v3351_v15 = vsel %vm843_vm2, %v3346_v7, %v3350_v35 }
 0x364   : > { %5640 = vmatmul.msk.bf16.gmra.mxu0 %vm395_vm1, %v6109_v44  ;;  %v3210_v44 = vunpack.c.l.b16 %v3144_v9 }
 0x365   : > { %5656 = vmatmul.msk.bf16.gmra.mxu1 %vm395_vm1, %v7473_v26 }
 0x366   : > { %v3068_v55 = vpop.f32.mrf.mxu2  ;;  %v3437_v38 = vpop.f32.mrf.mxu3  ;;  %v3227_v46 = vpack.c.b16 %v3210_v44, %v3210_v44  ;;  %v6030_v44 = vld [vmem:[%s6222_s10 + $0x10] sm:$0xff] }
 0x367   : > { %v3069_v22 = vadd.f32 %v3068_v55, %v6845_v52  ;;  %v6111_v55 = vld [vmem:[%s6222_s10 + $0x78] sm:$0xff] }
 0x368   : > { %v3356_v18 = vshll.u32 %v3227_v46, 16  ;;  %v6031_v46 = vld [vmem:[%s6222_s10 + $0x18] sm:$0xff] }
 0x369   : > { %v3486_v1 = vadd.f32 %v3437_v38, %v3069_v22  ;;  %v3528_v3 = vpop.f32.mrf.mxu0  ;;  %v3352_v22 = vshrl.u32 %v6013_v32, 16 }
 0x36a   : > { %v3617_v28 = vpop.f32.mrf.mxu1  ;;  %v3358_v7 = vrot.slane %v3356_v18, 1 }
 0x36b   : > { %v3575_v24 = vadd.f32 %v3526_v60, %v3486_v1 }
 0x36d   : > { %v7078_v10 = vadd.f32 %v3615_v39, %v3575_v24  ;;  %v3354_v24 = vor.u32 %v3352_v22, %v3350_v35  ;;  %v7474_v35 = vld [vmem:[#allocation13_spill] sm:$0xff] }
 0x36e   : > { %v3070_v59 = vpop.f32.mrf.mxu2  ;;  %v3439_v33 = vpop.f32.mrf.mxu3 }
 0x36f   : > { %v3359_v33 = vsel %vm843_vm2, %v3354_v24, %v3358_v7  ;;  %v4355_v7 = vshrl.u32 %v6030_v44, 16 }
 0x371   : > { %v3530_v26 = vpop.f32.mrf.mxu0 }
 0x372   : > { %v3619_v52 = vpop.f32.mrf.mxu1 }
 0x373   : > { %5545 = vmatmul.msk.bf16.gmra.mxu2 %vm395_vm1, %v6110_v12  ;;  %5625 = vmatmul.msk.bf16.gmra.mxu3 %vm395_vm1, %v3351_v15  ;;  %v6112_v12 = vld [vmem:[%s6222_s10 + $0x78] sm:$0xff] }
 0x374   : > { %5641 = vmatmul.msk.bf16.gmra.mxu0 %vm395_vm1, %v6111_v55 }
 0x375   : > { %5657 = vmatmul.msk.bf16.gmra.mxu1 %vm395_vm1, %v6604_v6 }
 0x376   : > { %v3072_v60 = vpop.f32.mrf.mxu2  ;;  %v3441_v39 = vpop.f32.mrf.mxu3 }
 0x377   : > { %v3073_v38 = vadd.f32 %v3072_v60, %v6863_v19  ;;  %v6014_v19 = vld [vmem:[%s6222_s10 + $0x8] sm:$0xff]  ;;  %v4357_v60 = vshll.u32 %v6030_v44, 16 }
 0x378   : > { %v3794_v55 = vshll.u32 %v6014_v19, 16  ;;  %v3792_v18 = vshrl.u32 %v6014_v19, 16 }
 0x379   : > { %v3487_v51 = vadd.f32 %v3441_v39, %v3073_v38  ;;  %v3532_v1 = vpop.f32.mrf.mxu0 }
 0x37a   : > { %v3621_v3 = vpop.f32.mrf.mxu1 }
 0x37b   : > { %v3576_v28 = vadd.f32 %v3530_v26, %v3487_v51  ;;  %v6113_v26 = vld [vmem:[%s6222_s10 + $0x80] sm:$0xff]  ;;  %v3796_v51 = vrot.slane %v3794_v55, 1 }
 0x37d   : > { %v7089_v9 = vadd.f32 %v3619_v52, %v3576_v28  ;;  %v6015_v52 = vld [vmem:[%s6222_s10 + $0x10] sm:$0xff] }
 0x37e   : > { %v3074_v6 = vpop.f32.mrf.mxu2  ;;  %v3443_v59 = vpop.f32.mrf.mxu3  ;;  %v3799_v1 = vshll.u32 %v6015_v52, 16 }
 0x37f   : > { %v4359_v6 = vrot.slane %v4357_v60, 1  ;;  %v4362_v59 = vshll.u32 %v6031_v46, 16  ;;  %v6114_v60 = vld [vmem:[%s6222_s10 + $0x10] sm:$0xff] }
 0x381   : > { %v3534_v15 = vpop.f32.mrf.mxu0  ;;  %v4364_v53 = vrot.slane %v4362_v59, 1 }
 0x382   : > { %v3623_v32 = vpop.f32.mrf.mxu1 }
 0x383   : > { %5546 = vmatmul.msk.bf16.gmra.mxu2 %vm395_vm1, %v6112_v12  ;;  %5626 = vmatmul.msk.bf16.gmra.mxu3 %vm395_vm1, %v3359_v33  ;;  %v3797_v12 = vor.u32 %v3796_v51, %v3792_v18 }
 0x384   : > { %5642 = vmatmul.msk.bf16.gmra.mxu0 %vm395_vm1, %v6113_v26  ;;  %v3801_v26 = vrot.slane %v3799_v1, 1  ;;  %v3803_v1 = vshrl.u32 %v6015_v52, 16 }
 0x385   : > { %5658 = vmatmul.msk.bf16.gmra.mxu1 %vm395_vm1, %v7474_v35  ;;  %v4360_v35 = vor.u32 %v4359_v6, %v4355_v7  ;;  %v4366_v6 = vshrl.u32 %v6031_v46, 16  ;;  %v6115_v46 = vld [vmem:[%s6222_s10 + $0x18] sm:$0xff] }
 0x386   : > { %v3076_v39 = vpop.f32.mrf.mxu2  ;;  %v3445_v38 = vpop.f32.mrf.mxu3  ;;  %v3802_v55 = vsel %vm843_vm2, %v3797_v12, %v3801_v26  ;;  %v3805_v12 = vor.u32 %v3803_v1, %v3801_v26  ;;  %v6033_v26 = vld [vmem:[%s6222_s10 + $0x28] sm:$0xff] }
 0x387   : > { %v3077_v22 = vadd.f32 %v3076_v39, %v6880_v29  ;;  %v4365_v44 = vsel %vm843_vm2, %v4360_v35, %v4364_v53  ;;  %v4368_v35 = vor.u32 %v4366_v6, %v4364_v53  ;;  %v6017_v53 = vld [vmem:[%s6222_s10 + $0x20] sm:$0xff]  ;;  %v4378_v6 = vshll.u32 %v6033_v26, 16 }
 0x388   : > { %v3815_v1 = vshll.u32 %v6017_v53, 16 }
 0x389   : > { %v3488_v3 = vadd.f32 %v3445_v38, %v3077_v22  ;;  %v3536_v28 = vpop.f32.mrf.mxu0 }
 0x38a   : > { %v3625_v24 = vpop.f32.mrf.mxu1 }
 0x38b   : > { %v3577_v33 = vadd.f32 %v3534_v15, %v3488_v3  ;;  %v6016_v15 = vld [vmem:[%s6222_s10 + $0x18] sm:$0xff] }
 0x38c   : > { %v3807_v3 = vshll.u32 %v6016_v15, 16 }
 0x38d   : > { %v7104_v62 = vadd.f32 %v3623_v32, %v3577_v33  ;;  %v6032_v32 = vld [vmem:[%s6222_s10 + $0x20] sm:$0xff] }
 0x38e   : > { %v3078_v29 = vpop.f32.mrf.mxu2  ;;  %v3447_v19 = vpop.f32.mrf.mxu3  ;;  %v4370_v59 = vshll.u32 %v6032_v32, 16 }
 0x390   : > { %v4372_v29 = vrot.slane %v4370_v59, 1 }
 0x391   : > { %v3538_v39 = vpop.f32.mrf.mxu0 }
 0x392   : > { %v3627_v38 = vpop.f32.mrf.mxu1 }
 0x393   : > { %5723 = vmatmul.msk.bf16.vlgmr.msra.gmra.mxu2 %vm395_vm1, %v3802_v55  ;;  %5739 = vmatmul.msk.bf16.vlgmr.msra.gmra.mxu3 %vm395_vm1, %v6114_v60 }
 0x394   : > { %5755 = vmatmul.msk.bf16.vlgmr.msra.gmra.mxu0 %vm395_vm1, %v6637_v34  ;;  %v3809_v34 = vrot.slane %v3807_v3, 1 }
 0x395   : > { %5835 = vmatmul.msk.bf16.vlgmr.msra.gmra.mxu1 %vm395_vm1, %v4365_v44 }
 0x396   : > { %v3080_v22 = vpop.f32.mrf.mxu2  ;;  %v3449_v18 = vpop.f32.mrf.mxu3 }
 0x397   : > { %v3081_v51 = vadd.f32 %v3080_v22, %v6896_v37  ;;  %v3810_v37 = vsel %vm843_vm2, %v3805_v12, %v3809_v34  ;;  %v4373_v22 = vsel %vm843_vm2, %v4368_v35, %v4372_v29  ;;  %v4380_v35 = vrot.slane %v4378_v6, 1 }
 0x399   : > { %v3489_v28 = vadd.f32 %v3449_v18, %v3081_v51  ;;  %v3540_v24 = vpop.f32.mrf.mxu0  ;;  %v3811_v51 = vshrl.u32 %v6016_v15, 16 }
 0x39a   : > { %v3629_v7 = vpop.f32.mrf.mxu1 }
 0x39b   : > { %v3578_v33 = vadd.f32 %v3538_v39, %v3489_v28  ;;  %v4374_v7 = vshrl.u32 %v6032_v32, 16  ;;  %v6116_v32 = vld [vmem:[%s6222_s10 + $0x20] sm:$0xff] }
 0x39d   : > { %v7117_v19 = vadd.f32 %v3627_v38, %v3578_v33  ;;  %v3813_v33 = vor.u32 %v3811_v51, %v3809_v34  ;;  %v4376_v12 = vor.u32 %v4374_v7, %v4372_v29  ;;  %v6018_v34 = vld [vmem:[%s6222_s10 + $0x28] sm:$0xff]  ;;  %v6034_v29 = vld [vmem:[%s6222_s10 + $0x30] sm:$0xff] }
 0x39e   : > { %v3082_v55 = vpop.f32.mrf.mxu2  ;;  %v3451_v44 = vpop.f32.mrf.mxu3 }
 0x3a1   : > { %v3542_v52 = vpop.f32.mrf.mxu0 }
 0x3a2   : > { %v3631_v60 = vpop.f32.mrf.mxu1 }
 0x3a3   : > { %5724 = vmatmul.msk.bf16.gmra.mxu2 %vm395_vm1, %v3810_v37  ;;  %5740 = vmatmul.msk.bf16.gmra.mxu3 %vm395_vm1, %v6115_v46  ;;  %v4381_v46 = vsel %vm843_vm2, %v4376_v12, %v4380_v35 }
 0x3a4   : > { %5756 = vmatmul.msk.bf16.gmra.mxu0 %vm395_vm1, %v6656_v45  ;;  %v3817_v45 = vrot.slane %v3815_v1, 1 }
 0x3a5   : > { %5836 = vmatmul.msk.bf16.gmra.mxu1 %vm395_vm1, %v4373_v22 }
 0x3a6   : > { %v3084_v39 = vpop.f32.mrf.mxu2  ;;  %v3453_v38 = vpop.f32.mrf.mxu3 }
 0x3a7   : > { %v3085_v18 = vadd.f32 %v3084_v39, %v6910_v47  ;;  %v3818_v47 = vsel %vm843_vm2, %v3813_v33, %v3817_v45 }
 0x3a9   : > { %v3490_v3 = vadd.f32 %v3453_v38, %v3085_v18  ;;  %v3544_v28 = vpop.f32.mrf.mxu0  ;;  %v3819_v38 = vshrl.u32 %v6017_v53, 16  ;;  %v3823_v18 = vshll.u32 %v6018_v34, 16 }
 0x3aa   : > { %v3633_v24 = vpop.f32.mrf.mxu1  ;;  %v4382_v28 = vshrl.u32 %v6033_v26, 16  ;;  %v6117_v26 = vld [vmem:[%s6222_s10 + $0x28] sm:$0xff] }
 0x3ab   : > { %v3579_v59 = vadd.f32 %v3542_v52, %v3490_v3  ;;  %v4386_v24 = vshll.u32 %v6034_v29, 16  ;;  %v3821_v6 = vor.u32 %v3819_v38, %v3817_v45  ;;  %v6019_v45 = vld [vmem:[%s6222_s10 + $0x30] sm:$0xff] }
 0x3ad   : > { %v7130_v55 = vadd.f32 %v3631_v60, %v3579_v59  ;;  %v4384_v59 = vor.u32 %v4382_v28, %v4380_v35  ;;  %v4388_v33 = vrot.slane %v4386_v24, 1  ;;  %v6035_v35 = vld [vmem:[%s6222_s10 + $0x38] sm:$0xff] }
 0x3ae   : > { %v3086_v44 = vpop.f32.mrf.mxu2  ;;  %v3455_v37 = vpop.f32.mrf.mxu3 }
 0x3b1   : > { %v3546_v15 = vpop.f32.mrf.mxu0 }
 0x3b2   : > { %v3635_v22 = vpop.f32.mrf.mxu1 }
 0x3b3   : > { %5725 = vmatmul.msk.bf16.gmra.mxu2 %vm395_vm1, %v3818_v47  ;;  %5741 = vmatmul.msk.bf16.gmra.mxu3 %vm395_vm1, %v6116_v32 }
 0x3b4   : > { %5757 = vmatmul.msk.bf16.gmra.mxu0 %vm395_vm1, %v6671_v11  ;;  %v3825_v11 = vrot.slane %v3823_v18, 1 }
 0x3b5   : > { %5837 = vmatmul.msk.bf16.gmra.mxu1 %vm395_vm1, %v4381_v46  ;;  %v4389_v46 = vsel %vm843_vm2, %v4384_v59, %v4388_v33 }
 0x3b6   : > { %v3088_v52 = vpop.f32.mrf.mxu2  ;;  %v3457_v60 = vpop.f32.mrf.mxu3 }
 0x3b7   : > { %v3089_v39 = vadd.f32 %v3088_v52, %v6924_v42  ;;  %v3826_v42 = vsel %vm843_vm2, %v3821_v6, %v3825_v11  ;;  %v3827_v52 = vshrl.u32 %v6018_v34, 16 }
 0x3b9   : > { %v3491_v51 = vadd.f32 %v3457_v60, %v3089_v39  ;;  %v3548_v1 = vpop.f32.mrf.mxu0  ;;  %v3831_v60 = vshll.u32 %v6019_v45, 16  ;;  %v3829_v28 = vor.u32 %v3827_v52, %v3825_v11  ;;  %v6020_v11 = vld [vmem:[%s6222_s10 + $0x38] sm:$0xff] }
 0x3ba   : > { %v3637_v3 = vpop.f32.mrf.mxu1  ;;  %v4394_v1 = vshll.u32 %v6035_v35, 16 }
 0x3bb   : > { %v3580_v7 = vadd.f32 %v3546_v15, %v3491_v51  ;;  %v4390_v51 = vshrl.u32 %v6034_v29, 16  ;;  %v6118_v29 = vld [vmem:[%s6222_s10 + $0x30] sm:$0xff] }
 0x3bd   : > { %v7143_v12 = vadd.f32 %v3635_v22, %v3580_v7  ;;  %v4392_v24 = vor.u32 %v4390_v51, %v4388_v33  ;;  %v4396_v7 = vrot.slane %v4394_v1, 1  ;;  %v6036_v33 = vld [vmem:[%s6222_s10 + $0x40] sm:$0xff] }
 0x3be   : > { %v3090_v44 = vpop.f32.mrf.mxu2  ;;  %v3459_v37 = vpop.f32.mrf.mxu3 }
 0x3c1   : > { %v3550_v53 = vpop.f32.mrf.mxu0 }
 0x3c2   : > { %v3639_v47 = vpop.f32.mrf.mxu1 }
 0x3c3   : > { %5726 = vmatmul.msk.bf16.gmra.mxu2 %vm395_vm1, %v3826_v42  ;;  %5742 = vmatmul.msk.bf16.gmra.mxu3 %vm395_vm1, %v6117_v26  ;;  %v4397_v42 = vsel %vm843_vm2, %v4392_v24, %v4396_v7  ;;  %v3835_v26 = vshrl.u32 %v6019_v45, 16 }
 0x3c4   : > { %5758 = vmatmul.msk.bf16.gmra.mxu0 %vm395_vm1, %v6686_v16  ;;  %v3833_v16 = vrot.slane %v3831_v60, 1  ;;  %v4398_v60 = vshrl.u32 %v6035_v35, 16  ;;  %v6119_v35 = vld [vmem:[%s6222_s10 + $0x38] sm:$0xff] }
 0x3c5   : > { %5838 = vmatmul.msk.bf16.gmra.mxu1 %vm395_vm1, %v4389_v46 }
 0x3c6   : > { %v3092_v15 = vpop.f32.mrf.mxu2  ;;  %v3461_v22 = vpop.f32.mrf.mxu3  ;;  %v4400_v51 = vor.u32 %v4398_v60, %v4396_v7  ;;  %v6037_v7 = vld [vmem:[%s6222_s10 + $0x48] sm:$0xff] }
 0x3c7   : > { %v3093_v32 = vadd.f32 %v3092_v15, %v6938_v41  ;;  %v3834_v41 = vsel %vm843_vm2, %v3829_v28, %v3833_v16  ;;  %v3839_v15 = vshll.u32 %v6020_v11, 16 }
 0x3c9   : > { %v3492_v39 = vadd.f32 %v3461_v22, %v3093_v32  ;;  %v3552_v38 = vpop.f32.mrf.mxu0 }
 0x3ca   : > { %v3641_v18 = vpop.f32.mrf.mxu1 }
 0x3cb   : > { %v3581_v3 = vadd.f32 %v3550_v53, %v3492_v39  ;;  %v4402_v39 = vshll.u32 %v6036_v33, 16  ;;  %v3837_v18 = vor.u32 %v3835_v26, %v3833_v16  ;;  %v6021_v16 = vld [vmem:[%s6222_s10 + $0x40] sm:$0xff]  ;;  %v4406_v26 = vshrl.u32 %v6036_v33, 16 }
 0x3cc   : > { %v6120_v33 = vld [vmem:[%s6222_s10 + $0x40] sm:$0xff] }
 0x3cd   : > { %v7156_v6 = vadd.f32 %v3639_v47, %v3581_v3  ;;  %v4404_v1 = vrot.slane %v4402_v39, 1 }
 0x3ce   : > { %v3094_v59 = vpop.f32.mrf.mxu2  ;;  %v3463_v44 = vpop.f32.mrf.mxu3 }
 0x3cf   : > { %v4405_v44 = vsel %vm843_vm2, %v4400_v51, %v4404_v1 }
 0x3d1   : > { %v3554_v34 = vpop.f32.mrf.mxu0 }
 0x3d2   : > { %v3643_v37 = vpop.f32.mrf.mxu1 }
 0x3d3   : > { %5727 = vmatmul.msk.bf16.gmra.mxu2 %vm395_vm1, %v3834_v41  ;;  %5743 = vmatmul.msk.bf16.gmra.mxu3 %vm395_vm1, %v6118_v29  ;;  %v3847_v29 = vshll.u32 %v6021_v16, 16 }
 0x3d4   : > { %5759 = vmatmul.msk.bf16.gmra.mxu0 %vm395_vm1, %v6701_v57  ;;  %v3841_v57 = vrot.slane %v3839_v15, 1  ;;  %v4410_v15 = vshll.u32 %v6037_v7, 16 }
 0x3d5   : > { %5839 = vmatmul.msk.bf16.gmra.mxu1 %vm395_vm1, %v4397_v42  ;;  %v3843_v42 = vshrl.u32 %v6020_v11, 16 }
 0x3d6   : > { %v3096_v53 = vpop.f32.mrf.mxu2  ;;  %v3465_v47 = vpop.f32.mrf.mxu3  ;;  %v4412_v60 = vrot.slane %v4410_v15, 1 }
 0x3d7   : > { %v3097_v46 = vadd.f32 %v3096_v53, %v6952_v23  ;;  %v3842_v23 = vsel %vm843_vm2, %v3837_v18, %v3841_v57 }
 0x3d9   : > { %v3493_v22 = vadd.f32 %v3465_v47, %v3097_v46  ;;  %v3556_v32 = vpop.f32.mrf.mxu0 }
 0x3da   : > { %v3645_v52 = vpop.f32.mrf.mxu1  ;;  %v3845_v32 = vor.u32 %v3843_v42, %v3841_v57  ;;  %v6022_v57 = vld [vmem:[%s6222_s10 + $0x48] sm:$0xff] }
 0x3db   : > { %v3582_v38 = vadd.f32 %v3554_v34, %v3493_v22  ;;  %v4408_v52 = vor.u32 %v4406_v26, %v4404_v1  ;;  %v6038_v1 = vld [vmem:[%s6222_s10 + $0x50] sm:$0xff] }
 0x3dc   : > { %v4418_v42 = vshll.u32 %v6038_v1, 16 }
 0x3dd   : > { %v7169_v3 = vadd.f32 %v3643_v37, %v3582_v38 }
 0x3de   : > { %v3098_v28 = vpop.f32.mrf.mxu2  ;;  %v3467_v24 = vpop.f32.mrf.mxu3 }
 0x3df   : > { %v4413_v28 = vsel %vm843_vm2, %v4408_v52, %v4412_v60 }
 0x3e1   : > { %v3558_v45 = vpop.f32.mrf.mxu0 }
 0x3e2   : > { %v3647_v59 = vpop.f32.mrf.mxu1 }
 0x3e3   : > { %5728 = vmatmul.msk.bf16.gmra.mxu2 %vm395_vm1, %v3842_v23  ;;  %5744 = vmatmul.msk.bf16.gmra.mxu3 %vm395_vm1, %v6119_v35 }
 0x3e4   : > { %5760 = vmatmul.msk.bf16.gmra.mxu0 %vm395_vm1, %v6716_v13  ;;  %v3849_v13 = vrot.slane %v3847_v29, 1 }
 0x3e5   : > { %5840 = vmatmul.msk.bf16.gmra.mxu1 %vm395_vm1, %v4405_v44  ;;  %v3855_v44 = vshll.u32 %v6022_v57, 16 }
 0x3e6   : > { %v3100_v41 = vpop.f32.mrf.mxu2  ;;  %v3469_v34 = vpop.f32.mrf.mxu3 }
 0x3e7   : > { %v3101_v37 = vadd.f32 %v3100_v41, %v6966_v61  ;;  %v3850_v61 = vsel %vm843_vm2, %v3845_v32, %v3849_v13 }
 0x3e9   : > { %v3494_v53 = vadd.f32 %v3469_v34, %v3101_v37  ;;  %v3560_v47 = vpop.f32.mrf.mxu0  ;;  %v4414_v37 = vshrl.u32 %v6037_v7, 16  ;;  %v6121_v7 = vld [vmem:[%s6222_s10 + $0x48] sm:$0xff] }
 0x3ea   : > { %v3649_v46 = vpop.f32.mrf.mxu1 }
 0x3eb   : > { %v3583_v22 = vadd.f32 %v3558_v45, %v3494_v53  ;;  %v4416_v47 = vor.u32 %v4414_v37, %v4412_v60  ;;  %v4420_v46 = vrot.slane %v4418_v42, 1  ;;  %v6039_v60 = vld [vmem:[%s6222_s10 + $0x58] sm:$0xff] }
 0x3ed   : > { %v7182_v39 = vadd.f32 %v3647_v59, %v3583_v22  ;;  %v3851_v59 = vshrl.u32 %v6021_v16, 16  ;;  %v4421_v52 = vsel %vm843_vm2, %v4416_v47, %v4420_v46  ;;  %v6040_v47 = vld [vmem:[%s6222_s10 + $0x60] sm:$0xff] }
 0x3ee   : > { %v3102_v38 = vpop.f32.mrf.mxu2  ;;  %v3471_v18 = vpop.f32.mrf.mxu3 }
 0x3ef   : > { %v3853_v53 = vor.u32 %v3851_v59, %v3849_v13  ;;  %v6023_v13 = vld [vmem:[%s6222_s10 + $0x50] sm:$0xff] }
 0x3f1   : > { %v3562_v11 = vpop.f32.mrf.mxu0 }
 0x3f2   : > { %v3651_v51 = vpop.f32.mrf.mxu1 }
 0x3f3   : > { %5729 = vmatmul.msk.bf16.gmra.mxu2 %vm395_vm1, %v3850_v61  ;;  %5745 = vmatmul.msk.bf16.gmra.mxu3 %vm395_vm1, %v6120_v33 }
 0x3f4   : > { %5761 = vmatmul.msk.bf16.gmra.mxu0 %vm395_vm1, %v6731_v50  ;;  %v3857_v50 = vrot.slane %v3855_v44, 1 }
 0x3f5   : > { %5841 = vmatmul.msk.bf16.gmra.mxu1 %vm395_vm1, %v4413_v28 }
 0x3f6   : > { %v3104_v24 = vpop.f32.mrf.mxu2  ;;  %v3473_v23 = vpop.f32.mrf.mxu3 }
 0x3f7   : > { %v3105_v45 = vadd.f32 %v3104_v24, %v6980_v36  ;;  %v3858_v36 = vsel %vm843_vm2, %v3853_v53, %v3857_v50 }
 0x3f9   : > { %v3495_v35 = vadd.f32 %v3473_v23, %v3105_v45  ;;  %v3564_v41 = vpop.f32.mrf.mxu0  ;;  %v4422_v23 = vshrl.u32 %v6038_v1, 16  ;;  %v4426_v45 = vshll.u32 %v6039_v60, 16  ;;  %v6122_v1 = vld [vmem:[%s6222_s10 + $0x50] sm:$0xff] }
 0x3fa   : > { %v3653_v34 = vpop.f32.mrf.mxu1 }
 0x3fb   : > { %v3584_v29 = vadd.f32 %v3562_v11, %v3495_v35  ;;  %v3859_v11 = vshrl.u32 %v6022_v57, 16  ;;  %v4424_v35 = vor.u32 %v4422_v23, %v4420_v46  ;;  %v4428_v41 = vrot.slane %v4426_v45, 1 }
 0x3fd   : > { %v7195_v26 = vadd.f32 %v3651_v51, %v3584_v29  ;;  %v3863_v51 = vshll.u32 %v6023_v13, 16  ;;  %v3861_v44 = vor.u32 %v3859_v11, %v3857_v50  ;;  %v4429_v53 = vsel %vm843_vm2, %v4424_v35, %v4428_v41  ;;  %v6024_v50 = vld [vmem:[%s6222_s10 + $0x58] sm:$0xff]  ;;  %v7231_v11 = vld [vmem:[%s7426_s4] ss:$0 sm:$0xff] }
 0x3fe   : > { %v3106_v15 = vpop.f32.mrf.mxu2  ;;  %v3475_v22 = vpop.f32.mrf.mxu3 }
 0x3ff   : > { %v7223_v22 = vld [vmem:[%s7425_s3] ss:$0 sm:$0xff] }
 0x401   : > { %v3566_v16 = vpop.f32.mrf.mxu0 }
 0x402   : > { %v3655_v32 = vpop.f32.mrf.mxu1 }
 0x403   : > { %5730 = vmatmul.msk.bf16.gmra.mxu2 %vm395_vm1, %v3858_v36  ;;  %5746 = vmatmul.msk.bf16.gmra.mxu3 %vm395_vm1, %v6121_v7 }
 0x404   : > { %5762 = vmatmul.msk.bf16.gmra.mxu0 %vm395_vm1, %v6746_v48  ;;  %v3865_v48 = vrot.slane %v3863_v51, 1 }
 0x405   : > { %5842 = vmatmul.msk.bf16.gmra.mxu1 %vm395_vm1, %v4421_v52 }
 0x406   : > { %v3108_v38 = vpop.f32.mrf.mxu2  ;;  %v3477_v18 = vpop.f32.mrf.mxu3 }
 0x407   : > { %v3109_v61 = vadd.f32 %v3108_v38, %v6994_v20  ;;  %v3866_v20 = vsel %vm843_vm2, %v3861_v44, %v3865_v48 }
 0x409   : > { %v3496_v28 = vadd.f32 %v3477_v18, %v3109_v61  ;;  %v3568_v33 = vpop.f32.mrf.mxu0  ;;  %v4430_v18 = vshrl.u32 %v6039_v60, 16  ;;  %v2915_v61 = vmul.f32 %v7223_v22, %v6773_v0 }
 0x40a   : > { %v3657_v24 = vpop.f32.mrf.mxu1 }
 0x40b   : > { %v3585_v59 = vadd.f32 %v3566_v16, %v3496_v28  ;;  %v3867_v16 = vshrl.u32 %v6023_v13, 16  ;;  %v4432_v13 = vor.u32 %v4430_v18, %v4428_v41  ;;  %v2934_v60 = vadd.f32 %v7231_v11, %v2915_v61  ;;  %v6123_v41 = vld [vmem:[%s6222_s10 + $0x58] sm:$0xff] }
 0x40d   : > { %v7208_v34 = vadd.f32 %v3655_v32, %v3585_v59  ;;  %v3871_v32 = vshll.u32 %v6024_v50, 16  ;;  %v3869_v28 = vor.u32 %v3867_v16, %v3865_v48 }
 0x40e   : > { %v3110_v37 = vpop.f32.mrf.mxu2  ;;  %v3479_v42 = vpop.f32.mrf.mxu3 }
 0x40f   : > { %v3873_v33 = vrot.slane %v3871_v32, 1  ;;  %v2950_v42 = vmax.f32 %v2934_v60, 0.0 }
 0x411   : > { %v4158_v57 = vpop.f32.mrf.mxu0  ;;  %v3874_v59 = vsel %vm843_vm2, %v3869_v28, %v3873_v33 }
 0x412   : > { %v4543_v29 = vpop.f32.mrf.mxu1 }
 0x413   : > { %5731 = vmatmul.msk.bf16.gmra.mxu2 %vm395_vm1, %v3866_v20  ;;  %5747 = vmatmul.msk.bf16.gmra.mxu3 %vm395_vm1, %v6122_v1 }
 0x414   : > { %5763 = vmatmul.msk.bf16.gmra.mxu0 %vm395_vm1, %v6763_v54  ;;  %v4434_v54 = vshll.u32 %v6040_v47, 16 }
 0x415   : > { %5843 = vmatmul.msk.bf16.gmra.mxu1 %vm395_vm1, %v4429_v53  ;;  %v6041_v53 = vld [vmem:[%s6222_s10 + $0x68] sm:$0xff] }
 0x416   : > { %v3980_v46 = vpop.f32.mrf.mxu2  ;;  %v4069_v15 = vpop.f32.mrf.mxu3  ;;  %v4436_v24 = vrot.slane %v4434_v54, 1  ;;  %v4442_v18 = vshll.u32 %v6041_v53, 16 }
 0x417   : > { %v4044_v36 = vadd.f32 %v3980_v46, %v7017_v43 }
 0x418   : > { %v4437_v48 = vsel %vm843_vm2, %v4432_v13, %v4436_v24  ;;  %v4444_v13 = vrot.slane %v4442_v18, 1 }
 0x419   : > { %v4133_v52 = vadd.f32 %v4069_v15, %v4044_v36  ;;  %v4160_v7 = vpop.f32.mrf.mxu0  ;;  %v3875_v36 = vshrl.u32 %v6024_v50, 16 }
 0x41a   : > { %v4545_v38 = vpop.f32.mrf.mxu1 }
 0x41b   : > { %v4222_v51 = vadd.f32 %v4158_v57, %v4133_v52  ;;  %v6025_v57 = vld [vmem:[%s6222_s10 + $0x60] sm:$0xff]  ;;  %v4438_v38 = vshrl.u32 %v6040_v47, 16  ;;  %v3877_v61 = vor.u32 %v3875_v36, %v3873_v33 }
 0x41c   : > { %v3879_v16 = vshll.u32 %v6025_v57, 16 }
 0x41d   : > { %v4607_v43 = vadd.f32 %v4543_v29, %v4222_v51 }
 0x41e   : > { %v3982_v23 = vpop.f32.mrf.mxu2  ;;  %v4071_v45 = vpop.f32.mrf.mxu3  ;;  %v3881_v51 = vrot.slane %v3879_v16, 1 }
 0x41f   : > { %v4623_v0 = vmul.f32 %v7223_v22, %v4607_v43  ;;  %v4440_v43 = vor.u32 %v4438_v38, %v4436_v24  ;;  %v6124_v24 = vld [vmem:[%s6222_s10 + $0x60] sm:$0xff] }
 0x420   : > { %v3882_v47 = vsel %vm843_vm2, %v3877_v61, %v3881_v51 }
 0x421   : > { %v4639_v44 = vadd.f32 %v7231_v11, %v4623_v0  ;;  %v4162_v35 = vpop.f32.mrf.mxu0  ;;  %v4445_v33 = vsel %vm843_vm2, %v4440_v43, %v4444_v13 }
 0x422   : > { %v4547_v37 = vpop.f32.mrf.mxu1 }
 0x423   : > { %v4655_v20 = vmax.f32 %v4639_v44, 0.0  ;;  %5732 = vmatmul.msk.bf16.gmra.mxu2 %vm395_vm1, %v3874_v59  ;;  %5748 = vmatmul.msk.bf16.gmra.mxu3 %vm395_vm1, %v6123_v41 }
 0x424   : > { %5764 = vmatmul.msk.bf16.gmra.mxu0 %vm395_vm1, %v6780_v31  ;;  %v2916_v31 = vmul.f32 %v7223_v22, %v6790_v40 }
 0x425   : > { %5844 = vmatmul.msk.bf16.gmra.mxu1 %vm395_vm1, %v4437_v48  ;;  %v7245_v29 = vmax.f32 %v2950_v42, %v4655_v20  ;;  %v6042_v48 = vld [vmem:[%s6222_s10 + $0x70] sm:$0xff] }
 0x426   : > { %v3984_v1 = vpop.f32.mrf.mxu2  ;;  %v4073_v46 = vpop.f32.mrf.mxu3  ;;  %v2935_v50 = vadd.f32 %v7231_v11, %v2916_v31 }
 0x427   : > { %v4045_v15 = vadd.f32 %v3984_v1, %v7029_v49 }
 0x428   : > { %v2951_v59 = vmax.f32 %v2935_v50, 0.0 }
 0x429   : > { %v4134_v32 = vadd.f32 %v4073_v46, %v4045_v15  ;;  %v4164_v52 = vpop.f32.mrf.mxu0  ;;  %v3883_v46 = vshrl.u32 %v6025_v57, 16 }
 0x42a   : > { %v4549_v7 = vpop.f32.mrf.mxu1  ;;  %v4446_v52 = vshrl.u32 %v6041_v53, 16 }
 0x42b   : > { %v4223_v54 = vadd.f32 %v4162_v35, %v4134_v32  ;;  %v6026_v35 = vld [vmem:[%s6222_s10 + $0x68] sm:$0xff]  ;;  %v2917_v7 = vmul.f32 %v7223_v22, %v6807_v30  ;;  %v3885_v18 = vor.u32 %v3883_v46, %v3881_v51 }
 0x42c   : > { %v3887_v15 = vshll.u32 %v6026_v35, 16  ;;  %v4448_v61 = vor.u32 %v4446_v52, %v4444_v13  ;;  %v6125_v13 = vld [vmem:[%s6222_s10 + $0x68] sm:$0xff] }
 0x42d   : > { %v4608_v28 = vadd.f32 %v4547_v37, %v4223_v54  ;;  %v2936_v57 = vadd.f32 %v7231_v11, %v2917_v7 }
 0x42e   : > { %v3986_v23 = vpop.f32.mrf.mxu2  ;;  %v4075_v49 = vpop.f32.mrf.mxu3  ;;  %v3889_v31 = vrot.slane %v3887_v15, 1  ;;  %v4454_v15 = vshrl.u32 %v6042_v48, 16 }
 0x42f   : > { %v4624_v45 = vmul.f32 %v7223_v22, %v4608_v28 }
 0x430   : > { %v3890_v53 = vsel %vm843_vm2, %v3885_v18, %v3889_v31 }
 0x431   : > { %v4640_v60 = vadd.f32 %v7231_v11, %v4624_v45  ;;  %v4166_v40 = vpop.f32.mrf.mxu0  ;;  %v2952_v45 = vmax.f32 %v2936_v57, 0.0  ;;  %v6126_v57 = vld [vmem:[%s6222_s10 + $0x70] sm:$0xff] }
 0x432   : > { %v4551_v0 = vpop.f32.mrf.mxu1 }
 0x433   : > { %v4656_v44 = vmax.f32 %v4640_v60, 0.0  ;;  %5733 = vmatmul.msk.bf16.gmra.mxu2 %vm395_vm1, %v3882_v47  ;;  %5749 = vmatmul.msk.bf16.gmra.mxu3 %vm395_vm1, %v6124_v24  ;;  %v6027_v60 = vld [vmem:[%s6222_s10 + $0x70] sm:$0xff]  ;;  %v3891_v24 = vshrl.u32 %v6026_v35, 16 }
 0x434   : > { %5765 = vmatmul.msk.bf16.gmra.mxu0 %vm395_vm1, %v6797_v27  ;;  %v4450_v27 = vshll.u32 %v6042_v48, 16 }
 0x435   : > { %5845 = vmatmul.msk.bf16.gmra.mxu1 %vm395_vm1, %v4445_v33  ;;  %v7263_v37 = vmax.f32 %v2951_v59, %v4656_v44 }
 0x436   : > { %v3988_v42 = vpop.f32.mrf.mxu2  ;;  %v4077_v20 = vpop.f32.mrf.mxu3  ;;  %v4452_v28 = vrot.slane %v4450_v27, 1 }
 0x437   : > { %v4687_v41 = vmax.f32 %v7245_v29, %v7263_v37  ;;  %v4046_v1 = vadd.f32 %v3988_v42, %v7041_v14  ;;  %v3895_v42 = vshll.u32 %v6027_v60, 16 }
 0x438   : > { %v4453_v51 = vsel %vm843_vm2, %v4448_v61, %v4452_v28  ;;  %v4456_v7 = vor.u32 %v4454_v15, %v4452_v28 }
 0x439   : > { %v4135_v36 = vadd.f32 %v4077_v20, %v4046_v1  ;;  %v4168_v16 = vpop.f32.mrf.mxu0  ;;  %v3897_v52 = vrot.slane %v3895_v42, 1 }
 0x43a   : > { %v4553_v32 = vpop.f32.mrf.mxu1  ;;  %v2918_v16 = vmul.f32 %v7223_v22, %v6824_v25 }
 0x43b   : > { %v4224_v38 = vadd.f32 %v4166_v40, %v4135_v36  ;;  %v3893_v32 = vor.u32 %v3891_v24, %v3889_v31 }
 0x43c   : > { %v2937_v35 = vadd.f32 %v7231_v11, %v2918_v16 }
 0x43d   : > { %v4609_v54 = vadd.f32 %v4551_v0, %v4224_v38  ;;  %v6043_v0 = vld [vmem:[%s6222_s10 + $0x78] sm:$0xff]  ;;  %v3898_v48 = vsel %vm843_vm2, %v3893_v32, %v3897_v52 }
 0x43e   : > { %v3990_v43 = vpop.f32.mrf.mxu2  ;;  %v4079_v14 = vpop.f32.mrf.mxu3  ;;  %v4458_v36 = vshll.u32 %v6043_v0, 16  ;;  %v4462_v24 = vshrl.u32 %v6043_v0, 16 }
 0x43f   : > { %v4625_v23 = vmul.f32 %v7223_v22, %v4609_v54  ;;  %v2953_v14 = vmax.f32 %v2937_v35, 0.0  ;;  %v6045_v35 = vld [vmem:[%s6222_s10 + $0x88] sm:$0xff] }
 0x440   : > { %v4460_v38 = vrot.slane %v4458_v36, 1 }
 0x441   : > { %v4641_v49 = vadd.f32 %v7231_v11, %v4625_v23  ;;  %v4170_v30 = vpop.f32.mrf.mxu0  ;;  %v6028_v23 = vld [vmem:[%s6222_s10 + $0x78] sm:$0xff] }
 0x442   : > { %v4555_v50 = vpop.f32.mrf.mxu1  ;;  %v4461_v43 = vsel %vm843_vm2, %v4456_v7, %v4460_v38  ;;  %v6127_v7 = vld [vmem:[%s6222_s10 + $0x78] sm:$0xff] }
 0x443   : > { %v4657_v47 = vmax.f32 %v4641_v49, 0.0  ;;  %5734 = vmatmul.msk.bf16.gmra.mxu2 %vm395_vm1, %v3890_v53  ;;  %5750 = vmatmul.msk.bf16.gmra.mxu3 %vm395_vm1, %v6125_v13  ;;  %v6044_v49 = vld [vmem:[%s6222_s10 + $0x80] sm:$0xff]  ;;  %v3903_v13 = vshll.u32 %v6028_v23, 16 }
 0x444   : > { %5766 = vmatmul.msk.bf16.gmra.mxu0 %vm395_vm1, %v6814_v63  ;;  %v4466_v42 = vshll.u32 %v6044_v49, 16 }
 0x445   : > { %5846 = vmatmul.msk.bf16.gmra.mxu1 %vm395_vm1, %v4453_v51  ;;  %v4673_v40 = vmax.f32 %v2952_v45, %v4657_v47  ;;  %v3899_v47 = vshrl.u32 %v6027_v60, 16  ;;  %v4464_v60 = vor.u32 %v4462_v24, %v4460_v38  ;;  %v7475_v38 = vld [vmem:[#allocation14_spill] sm:$0xff] }
 0x446   : > { %v3992_v33 = vpop.f32.mrf.mxu2  ;;  %v4081_v59 = vpop.f32.mrf.mxu3  ;;  %v4468_v15 = vrot.slane %v4466_v42, 1 }
 0x447   : > { %v4047_v44 = vadd.f32 %v3992_v33, %v7053_v56 }
 0x448   : > { %v4469_v32 = vsel %vm843_vm2, %v4464_v60, %v4468_v15 }
 0x449   : > { %v4136_v20 = vadd.f32 %v4081_v59, %v4047_v44  ;;  %v4172_v1 = vpop.f32.mrf.mxu0 }
 0x44a   : > { %v4557_v46 = vpop.f32.mrf.mxu1  ;;  %v3905_v1 = vrot.slane %v3903_v13, 1 }
 0x44b   : > { %v4225_v63 = vadd.f32 %v4170_v30, %v4136_v20  ;;  %v3901_v20 = vor.u32 %v3899_v47, %v3897_v52 }
 0x44d   : > { %v4610_v27 = vadd.f32 %v4555_v50, %v4225_v63  ;;  %v3906_v0 = vsel %vm843_vm2, %v3901_v20, %v3905_v1 }
 0x44e   : > { %v3994_v18 = vpop.f32.mrf.mxu2  ;;  %v4083_v56 = vpop.f32.mrf.mxu3 }
 0x44f   : > { %v4626_v54 = vmul.f32 %v7223_v22, %v4610_v27  ;;  %v6029_v18 = vld [vmem:[%s6222_s10 + $0x80] sm:$0xff] }
 0x451   : > { %v4642_v25 = vadd.f32 %v7231_v11, %v4626_v54  ;;  %v4174_v61 = vpop.f32.mrf.mxu0 }
 0x452   : > { %v4559_v31 = vpop.f32.mrf.mxu1 }
 0x453   : > { %v4658_v28 = vmax.f32 %v4642_v25, 0.0  ;;  %5735 = vmatmul.msk.bf16.gmra.mxu2 %vm395_vm1, %v3898_v48  ;;  %5751 = vmatmul.msk.bf16.gmra.mxu3 %vm395_vm1, %v6126_v57  ;;  %v4470_v57 = vshrl.u32 %v6044_v49, 16 }
 0x454   : > { %5767 = vmatmul.msk.bf16.gmra.mxu0 %vm395_vm1, %v6831_v4 }
 0x455   : > { %5847 = vmatmul.msk.bf16.gmra.mxu1 %vm395_vm1, %v4461_v43  ;;  %v4674_v53 = vmax.f32 %v2953_v14, %v4658_v28  ;;  %v4472_v13 = vor.u32 %v4470_v57, %v4468_v15  ;;  %v6128_v15 = vld [vmem:[%s6222_s10 + $0x80] sm:$0xff] }
 0x456   : > { %v3996_v30 = vpop.f32.mrf.mxu2  ;;  %v4085_v50 = vpop.f32.mrf.mxu3 }
 0x457   : > { %v4688_v51 = vmax.f32 %v4673_v40, %v4674_v53  ;;  %v4048_v45 = vadd.f32 %v3996_v30, %v7065_v2  ;;  %v2919_v2 = vmul.f32 %v7223_v22, %v6841_v8  ;;  %v4474_v53 = vshll.u32 %v6045_v35, 16 }
 0x458   : > { %v2920_v30 = vmul.f32 %v7223_v22, %v6858_v5 }
 0x459   : > { %v6049_v4 = vpack.c.bf16 %v4688_v51, %v4687_v41  ;;  %v4137_v33 = vadd.f32 %v4085_v50, %v4048_v45  ;;  %v4176_v59 = vpop.f32.mrf.mxu0  ;;  %v2938_v37 = vadd.f32 %v7231_v11, %v2919_v2 }
 0x45a   : > { %v4561_v44 = vpop.f32.mrf.mxu1  ;;  %v4270_v59 = vld [vmem:[%s6222_s10 + $0x90] sm:$0x1] }
 0x45b   : > { %6050 = vst [vmem:[%s7305_s29] sm:$0xff] %v6049_v4   ;;  %v4226_v40 = vadd.f32 %v4174_v61, %v4137_v33  ;;  %v2954_v52 = vmax.f32 %v2938_v37, 0.0  ;;  %v3907_v61 = vshrl.u32 %v6028_v23, 16  ;;  %v4476_v4 = vrot.slane %v4474_v53, 1  ;;  %v3707_v33 = vld [vmem:[%s6222_s10 + $0x88] sm:$0x1] }
 0x45c   : > { %v2939_v44 = vadd.f32 %v7231_v11, %v2920_v30  ;;  %v3773_v42 = vunpack.c.l.b16 %v3707_v33 }
 0x45d   : > { %v4611_v46 = vadd.f32 %v4559_v31, %v4226_v40  ;;  %v3911_v31 = vshll.u32 %v6029_v18, 16  ;;  %v3909_v51 = vor.u32 %v3907_v61, %v3905_v1  ;;  %v4477_v20 = vsel %vm843_vm2, %v4472_v13, %v4476_v4 }
 0x45e   : > { %v3998_v36 = vpop.f32.mrf.mxu2  ;;  %v4087_v29 = vpop.f32.mrf.mxu3  ;;  %v4336_v1 = vunpack.c.l.b16 %v4270_v59 }
 0x45f   : > { %v4627_v41 = vmul.f32 %v7223_v22, %v4611_v46  ;;  %v3913_v45 = vrot.slane %v3911_v31, 1  ;;  %v2955_v46 = vmax.f32 %v2939_v44, 0.0  ;;  %v3790_v36 = vpack.c.b16 %v3773_v42, %v3773_v42  ;;  %v7476_v44 = vld [vmem:[#allocation15_spill] sm:$0xff] }
 0x460   : > { %v4353_v37 = vpack.c.b16 %v4336_v1, %v4336_v1 }
 0x461   : > { %v4643_v8 = vadd.f32 %v7231_v11, %v4627_v41  ;;  %v4178_v16 = vpop.f32.mrf.mxu0  ;;  %v3914_v49 = vsel %vm843_vm2, %v3909_v51, %v3913_v45 }
 0x462   : > { %v4563_v63 = vpop.f32.mrf.mxu1 }
 0x463   : > { %v4659_v27 = vmax.f32 %v4643_v8, 0.0  ;;  %5736 = vmatmul.msk.bf16.gmra.mxu2 %vm395_vm1, %v3906_v0  ;;  %5752 = vmatmul.msk.bf16.gmra.mxu3 %vm395_vm1, %v6127_v7 }
 0x464   : > { %5768 = vmatmul.msk.bf16.gmra.mxu0 %vm395_vm1, %v7475_v38  ;;  %v4478_v38 = vshrl.u32 %v6045_v35, 16 }
 0x465   : > { %5848 = vmatmul.msk.bf16.gmra.mxu1 %vm395_vm1, %v4469_v32  ;;  %v7325_v56 = vmax.f32 %v2954_v52, %v4659_v27  ;;  %v3919_v32 = vshll.u32 %v3790_v36, 16 }
 0x466   : > { %v4000_v54 = vpop.f32.mrf.mxu2  ;;  %v4089_v48 = vpop.f32.mrf.mxu3 }
 0x467   : > { %v4049_v25 = vadd.f32 %v4000_v54, %v7078_v10  ;;  %v4482_v54 = vshll.u32 %v4353_v37, 16  ;;  %v3921_v61 = vrot.slane %v3919_v32, 1 }
 0x469   : > { %v4138_v43 = vadd.f32 %v4089_v48, %v4049_v25  ;;  %v4180_v14 = vpop.f32.mrf.mxu0 }
 0x46a   : > { %v4565_v28 = vpop.f32.mrf.mxu1  ;;  %v4484_v14 = vrot.slane %v4482_v54, 1 }
 0x46b   : > { %v4227_v50 = vadd.f32 %v4178_v16, %v4138_v43  ;;  %v4480_v43 = vor.u32 %v4478_v38, %v4476_v4 }
 0x46d   : > { %v4612_v47 = vadd.f32 %v4563_v63, %v4227_v50  ;;  %v3915_v63 = vshrl.u32 %v6029_v18, 16 }
 0x46e   : > { %v4002_v10 = vpop.f32.mrf.mxu2  ;;  %v4091_v23 = vpop.f32.mrf.mxu3 }
 0x46f   : > { %v4628_v24 = vmul.f32 %v7223_v22, %v4612_v47  ;;  %v3917_v25 = vor.u32 %v3915_v63, %v3913_v45  ;;  %v6129_v45 = vld [vmem:[%s6222_s10 + $0x88] sm:$0xff] }
 0x471   : > { %v4644_v5 = vadd.f32 %v7231_v11, %v4628_v24  ;;  %v4182_v2 = vpop.f32.mrf.mxu0  ;;  %v3922_v57 = vsel %vm843_vm2, %v3917_v25, %v3921_v61  ;;  %v2922_v24 = vmul.f32 %v7223_v22, %v7476_v44 }
 0x472   : > { %v4567_v40 = vpop.f32.mrf.mxu1 }
 0x473   : > { %v4660_v60 = vmax.f32 %v4644_v5, 0.0  ;;  %5737 = vmatmul.msk.bf16.gmra.mxu2 %vm395_vm1, %v3914_v49  ;;  %5753 = vmatmul.msk.bf16.gmra.mxu3 %vm395_vm1, %v6128_v15 }
 0x474   : > { %5769 = vmatmul.msk.bf16.gmra.mxu0 %vm395_vm1, %v6866_v17  ;;  %v2921_v17 = vmul.f32 %v7223_v22, %v6875_v21  ;;  %v4485_v21 = vsel %vm843_vm2, %v4480_v43, %v4484_v14 }
 0x475   : > { %5849 = vmatmul.msk.bf16.gmra.mxu1 %vm395_vm1, %v4477_v20  ;;  %v4676_v29 = vmax.f32 %v2955_v46, %v4660_v60 }
 0x476   : > { %v4004_v41 = vpop.f32.mrf.mxu2  ;;  %v4093_v0 = vpop.f32.mrf.mxu3 }
 0x477   : > { %v4689_v8 = vmax.f32 %v7325_v56, %v4676_v29  ;;  %v4050_v16 = vadd.f32 %v4004_v41, %v7089_v9  ;;  %v2940_v9 = vadd.f32 %v7231_v11, %v2921_v17 }
 0x479   : > { %v4139_v52 = vadd.f32 %v4093_v0, %v4050_v16  ;;  %v4184_v27 = vpop.f32.mrf.mxu0  ;;  %v2956_v50 = vmax.f32 %v2940_v9, 0.0 }
 0x47a   : > { %v4569_v7 = vpop.f32.mrf.mxu1 }
 0x47b   : > { %v4228_v48 = vadd.f32 %v4182_v2, %v4139_v52  ;;  %v7477_v52 = vld [vmem:[#allocation16_spill] sm:$0xff] }
 0x47c   : > { %v2923_v27 = vmul.f32 %v7223_v22, %v7477_v52 }
 0x47d   : > { %v4613_v31 = vadd.f32 %v4567_v40, %v4228_v48  ;;  %v2941_v40 = vadd.f32 %v7231_v11, %v2922_v24 }
 0x47e   : > { %v4006_v56 = vpop.f32.mrf.mxu2  ;;  %v4095_v28 = vpop.f32.mrf.mxu3  ;;  %v2942_v48 = vadd.f32 %v7231_v11, %v2923_v27 }
 0x47f   : > { %v4629_v18 = vmul.f32 %v7223_v22, %v4613_v31 }
 0x481   : > { %v4645_v35 = vadd.f32 %v7231_v11, %v4629_v18  ;;  %v4186_v53 = vpop.f32.mrf.mxu0 }
 0x482   : > { %v4571_v30 = vpop.f32.mrf.mxu1 }
 0x483   : > { %v4661_v51 = vmax.f32 %v4645_v35, 0.0  ;;  %5738 = vmatmul.msk.bf16.gmra.mxu2 %vm395_vm1, %v3922_v57  ;;  %5754 = vmatmul.msk.bf16.gmra.mxu3 %vm395_vm1, %v6129_v45 }
 0x484   : > { %5770 = vmatmul.msk.bf16.gmra.mxu0 %vm395_vm1, %v6883_v58 }
 0x485   : > { %5850 = vmatmul.msk.bf16.gmra.mxu1 %vm395_vm1, %v4485_v21  ;;  %v4677_v47 = vmax.f32 %v2956_v50, %v4661_v51 }
 0x486   : > { %v4008_v13 = vpop.f32.mrf.mxu2  ;;  %v4097_v4 = vpop.f32.mrf.mxu3 }
 0x487   : > { %v4051_v33 = vadd.f32 %v4008_v13, %v7104_v62  ;;  %v2957_v62 = vmax.f32 %v2941_v40, 0.0 }
 0x489   : > { %v4140_v10 = vadd.f32 %v4097_v4, %v4051_v33  ;;  %v4188_v23 = vpop.f32.mrf.mxu0 }
 0x48a   : > { %v4573_v59 = vpop.f32.mrf.mxu1 }
 0x48b   : > { %v4229_v49 = vadd.f32 %v4186_v53, %v4140_v10  ;;  %v7478_v53 = vld [vmem:[#allocation17_spill] sm:$0xff] }
 0x48d   : > { %v4614_v42 = vadd.f32 %v4571_v30, %v4229_v49  ;;  %v2924_v30 = vmul.f32 %v7223_v22, %v7478_v53 }
 0x48e   : > { %v4010_v5 = vpop.f32.mrf.mxu2  ;;  %v4099_v2 = vpop.f32.mrf.mxu3 }
 0x48f   : > { %v4630_v58 = vmul.f32 %v7223_v22, %v4614_v42 }
 0x491   : > { %v4646_v20 = vadd.f32 %v7231_v11, %v4630_v58  ;;  %v4190_v1 = vpop.f32.mrf.mxu0  ;;  %v7479_v58 = vld [vmem:[#allocation18_spill] sm:$0xff] }
 0x492   : > { %v4575_v46 = vpop.f32.mrf.mxu1 }
 0x493   : > { %v4662_v60 = vmax.f32 %v4646_v20, 0.0  ;;  %v2925_v20 = vmul.f32 %v7223_v22, %v7479_v58 }
 0x495   : > { %v4678_v15 = vmax.f32 %v2957_v62, %v4662_v60 }
 0x496   : > { %v4012_v36 = vpop.f32.mrf.mxu2  ;;  %v4101_v29 = vpop.f32.mrf.mxu3 }
 0x497   : > { %v4690_v37 = vmax.f32 %v4677_v47, %v4678_v15  ;;  %v4052_v41 = vadd.f32 %v4012_v36, %v7117_v19  ;;  %v2943_v47 = vadd.f32 %v7231_v11, %v2924_v30  ;;  %v2944_v15 = vadd.f32 %v7231_v11, %v2925_v20 }
 0x499   : > { %v6054_v0 = vpack.c.bf16 %v4690_v37, %v4689_v8  ;;  %v4141_v16 = vadd.f32 %v4101_v29, %v4052_v41  ;;  %v4192_v63 = vpop.f32.mrf.mxu0  ;;  %v2958_v8 = vmax.f32 %v2942_v48, 0.0  ;;  %v2959_v23 = vmax.f32 %v2943_v47, 0.0 }
 0x49a   : > { %v4577_v32 = vpop.f32.mrf.mxu1 }
 0x49b   : > { %6066 = vst [vmem:[%s7305_s29 + $0x8] sm:$0xff] %v6054_v0   ;;  %v4230_v7 = vadd.f32 %v4190_v1, %v4141_v16  ;;  %v2960_v0 = vmax.f32 %v2944_v15, 0.0 }
 0x49d   : > { %v4615_v38 = vadd.f32 %v4575_v46, %v4230_v7 }
 0x49e   : > { %v4014_v54 = vpop.f32.mrf.mxu2  ;;  %v4103_v17 = vpop.f32.mrf.mxu3 }
 0x49f   : > { %v4631_v25 = vmul.f32 %v7223_v22, %v4615_v38  ;;  %v7480_v54 = vld [vmem:[#allocation2_spill] sm:$0xff] }
 0x4a0   : > { %v2926_v17 = vmul.f32 %v7223_v22, %v7480_v54 }
 0x4a1   : > { %v4647_v61 = vadd.f32 %v7231_v11, %v4631_v25  ;;  %v4194_v31 = vpop.f32.mrf.mxu0 }
 0x4a2   : > { %v4579_v19 = vpop.f32.mrf.mxu1 }
 0x4a3   : > { %v4663_v43 = vmax.f32 %v4647_v61, 0.0 }
 0x4a5   : > { %v7372_v14 = vmax.f32 %v2958_v8, %v4663_v43 }
 0x4a6   : > { %v4016_v56 = vpop.f32.mrf.mxu2  ;;  %v4105_v28 = vpop.f32.mrf.mxu3 }
 0x4a7   : > { %v4053_v9 = vadd.f32 %v4016_v56, %v7130_v55 }
 0x4a9   : > { %v4142_v18 = vadd.f32 %v4105_v28, %v4053_v9  ;;  %v4196_v57 = vpop.f32.mrf.mxu0 }
 0x4aa   : > { %v4581_v35 = vpop.f32.mrf.mxu1 }
 0x4ab   : > { %v4231_v21 = vadd.f32 %v4194_v31, %v4142_v18 }
 0x4ad   : > { %v4616_v50 = vadd.f32 %v4579_v19, %v4231_v21  ;;  %v2945_v19 = vadd.f32 %v7231_v11, %v2926_v17 }
 0x4ae   : > { %v4018_v51 = vpop.f32.mrf.mxu2  ;;  %v4107_v45 = vpop.f32.mrf.mxu3 }
 0x4af   : > { %v4632_v13 = vmul.f32 %v7223_v22, %v4616_v50  ;;  %v7481_v45 = vld [vmem:[#allocation3_spill] sm:$0xff] }
 0x4b0   : > { %v2927_v47 = vmul.f32 %v7223_v22, %v7481_v45  ;;  %v7484_v45 = vld [vmem:[#allocation6_spill] sm:$0xff] }
 0x4b1   : > { %v4648_v4 = vadd.f32 %v7231_v11, %v4632_v13  ;;  %v4198_v33 = vpop.f32.mrf.mxu0 }
 0x4b2   : > { %v4583_v10 = vpop.f32.mrf.mxu1 }
 0x4b3   : > { %v4664_v55 = vmax.f32 %v4648_v4, 0.0 }
 0x4b5   : > { %v4680_v59 = vmax.f32 %v2959_v23, %v4664_v55  ;;  %v2946_v23 = vadd.f32 %v7231_v11, %v2927_v47  ;;  %v2930_v47 = vmul.f32 %v7223_v22, %v7484_v45 }
 0x4b6   : > { %v4020_v44 = vpop.f32.mrf.mxu2  ;;  %v4109_v24 = vpop.f32.mrf.mxu3 }
 0x4b7   : > { %v4691_v49 = vmax.f32 %v7372_v14, %v4680_v59  ;;  %v4054_v42 = vadd.f32 %v4020_v44, %v7143_v12 }
 0x4b9   : > { %v4143_v5 = vadd.f32 %v4109_v24, %v4054_v42  ;;  %v4200_v2 = vpop.f32.mrf.mxu0  ;;  %v2962_v24 = vmax.f32 %v2946_v23, 0.0  ;;  %v2949_v23 = vadd.f32 %v7231_v11, %v2930_v47 }
 0x4ba   : > { %v4585_v40 = vpop.f32.mrf.mxu1 }
 0x4bb   : > { %v4232_v1 = vadd.f32 %v4198_v33, %v4143_v5 }
 0x4bd   : > { %v4617_v46 = vadd.f32 %v4583_v10, %v4232_v1 }
 0x4be   : > { %v4022_v62 = vpop.f32.mrf.mxu2  ;;  %v4111_v60 = vpop.f32.mrf.mxu3 }
 0x4bf   : > { %v4633_v36 = vmul.f32 %v7223_v22, %v4617_v46  ;;  %v7482_v46 = vld [vmem:[#allocation4_spill] sm:$0xff] }
 0x4c0   : > { %v2928_v62 = vmul.f32 %v7223_v22, %v7482_v46 }
 0x4c1   : > { %v4649_v29 = vadd.f32 %v7231_v11, %v4633_v36  ;;  %v4202_v37 = vpop.f32.mrf.mxu0 }
 0x4c2   : > { %v4587_v41 = vpop.f32.mrf.mxu1 }
 0x4c3   : > { %v4665_v12 = vmax.f32 %v4649_v29, 0.0 }
 0x4c5   : > { %v4681_v16 = vmax.f32 %v2960_v0, %v4665_v12 }
 0x4c6   : > { %v4024_v63 = vpop.f32.mrf.mxu2  ;;  %v4113_v32 = vpop.f32.mrf.mxu3 }
 0x4c7   : > { %v4055_v52 = vadd.f32 %v4024_v63, %v7156_v6  ;;  %v2961_v6 = vmax.f32 %v2945_v19, 0.0 }
 0x4c9   : > { %v4144_v27 = vadd.f32 %v4113_v32, %v4055_v52  ;;  %v4204_v7 = vpop.f32.mrf.mxu0 }
 0x4ca   : > { %v4589_v38 = vpop.f32.mrf.mxu1 }
 0x4cb   : > { %v4233_v48 = vadd.f32 %v4202_v37, %v4144_v27  ;;  %v2947_v37 = vadd.f32 %v7231_v11, %v2928_v62 }
 0x4cd   : > { %v4618_v25 = vadd.f32 %v4587_v41, %v4233_v48  ;;  %v2963_v63 = vmax.f32 %v2947_v37, 0.0 }
 0x4ce   : > { %v4026_v61 = vpop.f32.mrf.mxu2  ;;  %v4115_v31 = vpop.f32.mrf.mxu3 }
 0x4cf   : > { %v4634_v8 = vmul.f32 %v7223_v22, %v4618_v25  ;;  %v7483_v25 = vld [vmem:[#allocation5_spill] sm:$0xff] }
 0x4d0   : > { %v2929_v61 = vmul.f32 %v7223_v22, %v7483_v25 }
 0x4d1   : > { %v4650_v43 = vadd.f32 %v7231_v11, %v4634_v8  ;;  %v4206_v14 = vpop.f32.mrf.mxu0 }
 0x4d2   : > { %v4591_v56 = vpop.f32.mrf.mxu1 }
 0x4d3   : > { %v4666_v28 = vmax.f32 %v4650_v43, 0.0 }
 0x4d5   : > { %v4682_v9 = vmax.f32 %v2961_v6, %v4666_v28 }
 0x4d6   : > { %v4028_v18 = vpop.f32.mrf.mxu2  ;;  %v4117_v57 = vpop.f32.mrf.mxu3 }
 0x4d7   : > { %v4692_v35 = vmax.f32 %v4681_v16, %v4682_v9  ;;  %v4056_v53 = vadd.f32 %v4028_v18, %v7169_v3 }
 0x4d9   : > { %v6059_v30 = vpack.c.bf16 %v4692_v35, %v4691_v49  ;;  %v4145_v21 = vadd.f32 %v4117_v57, %v4056_v53  ;;  %v4208_v50 = vpop.f32.mrf.mxu0 }
 0x4da   : > { %v4593_v51 = vpop.f32.mrf.mxu1 }
 0x4db   : > { %6067 = vst [vmem:[%s7305_s29 + $0x10] sm:$0xff] %v6059_v30   ;;  %v4234_v13 = vadd.f32 %v4206_v14, %v4145_v21  ;;  %v2948_v14 = vadd.f32 %v7231_v11, %v2929_v61 }
 0x4dd   : > { %v4619_v4 = vadd.f32 %v4591_v56, %v4234_v13  ;;  %v2964_v18 = vmax.f32 %v2948_v14, 0.0 }
 0x4de   : > { %v4030_v33 = vpop.f32.mrf.mxu2  ;;  %v4119_v10 = vpop.f32.mrf.mxu3 }
 0x4df   : > { %v4635_v55 = vmul.f32 %v7223_v22, %v4619_v4 }
 0x4e1   : > { %v4651_v59 = vadd.f32 %v7231_v11, %v4635_v55  ;;  %v4210_v44 = vpop.f32.mrf.mxu0 }
 0x4e2   : > { %v4595_v3 = vpop.f32.mrf.mxu1 }
 0x4e3   : > { %v4667_v49 = vmax.f32 %v4651_v59, 0.0 }
 0x4e5   : > { %v4683_v42 = vmax.f32 %v2962_v24, %v4667_v49 }
 0x4e6   : > { %v4032_v5 = vpop.f32.mrf.mxu2  ;;  %v4121_v2 = vpop.f32.mrf.mxu3 }
 0x4e7   : > { %v4057_v40 = vadd.f32 %v4032_v5, %v7182_v39 }
 0x4e9   : > { %v4146_v58 = vadd.f32 %v4121_v2, %v4057_v40  ;;  %v4212_v20 = vpop.f32.mrf.mxu0 }
 0x4ea   : > { %v4597_v1 = vpop.f32.mrf.mxu1 }
 0x4eb   : > { %v4235_v60 = vadd.f32 %v4210_v44, %v4146_v58  ;;  %v2965_v44 = vmax.f32 %v2949_v23, 0.0 }
 0x4ed   : > { %v4620_v15 = vadd.f32 %v4595_v3, %v4235_v60 }
 0x4ee   : > { %v4034_v36 = vpop.f32.mrf.mxu2  ;;  %v4123_v29 = vpop.f32.mrf.mxu3 }
 0x4ef   : > { %v4636_v41 = vmul.f32 %v7223_v22, %v4620_v15 }
 0x4f1   : > { %v4652_v0 = vadd.f32 %v7231_v11, %v4636_v41  ;;  %v4214_v12 = vpop.f32.mrf.mxu0 }
 0x4f2   : > { %v4599_v16 = vpop.f32.mrf.mxu1 }
 0x4f3   : > { %v4668_v39 = vmax.f32 %v4652_v0, 0.0 }
 0x4f5   : > { %v4684_v32 = vmax.f32 %v2963_v63, %v4668_v39 }
 0x4f6   : > { %v4036_v52 = vpop.f32.mrf.mxu2  ;;  %v4125_v27 = vpop.f32.mrf.mxu3 }
 0x4f7   : > { %v4693_v7 = vmax.f32 %v4683_v42, %v4684_v32  ;;  %v4058_v38 = vadd.f32 %v4036_v52, %v7195_v26 }
 0x4f9   : > { %v4147_v54 = vadd.f32 %v4125_v27, %v4058_v38  ;;  %v4216_v17 = vpop.f32.mrf.mxu0 }
 0x4fa   : > { %v4601_v48 = vpop.f32.mrf.mxu1 }
 0x4fb   : > { %v4236_v31 = vadd.f32 %v4214_v12, %v4147_v54 }
 0x4fd   : > { %v4621_v19 = vadd.f32 %v4599_v16, %v4236_v31 }
 0x4fe   : > { %v4038_v8 = vpop.f32.mrf.mxu2  ;;  %v4127_v43 = vpop.f32.mrf.mxu3 }
 0x4ff   : > { %v4637_v56 = vmul.f32 %v7223_v22, %v4621_v19 }
 0x501   : > { %v4653_v6 = vadd.f32 %v7231_v11, %v4637_v56  ;;  %v4218_v28 = vpop.f32.mrf.mxu0 }
 0x502   : > { %v4603_v9 = vpop.f32.mrf.mxu1 }
 0x503   : > { %v4669_v26 = vmax.f32 %v4653_v6, 0.0 }
 0x505   : > { %v4685_v57 = vmax.f32 %v2964_v18, %v4669_v26 }
 0x506   : > { %v4040_v35 = vpop.f32.mrf.mxu2  ;;  %v4129_v53 = vpop.f32.mrf.mxu3 }
 0x507   : > { %v4059_v30 = vadd.f32 %v4040_v35, %v7208_v34 }
 0x509   : > { %v4148_v21 = vadd.f32 %v4129_v53, %v4059_v30  ;;  %v4220_v50 = vpop.f32.mrf.mxu0 }
 0x50a   : > { %v4605_v51 = vpop.f32.mrf.mxu1 }
 0x50b   : > { %v4237_v13 = vadd.f32 %v4218_v28, %v4148_v21 }
 0x50d   : > { %v4622_v4 = vadd.f32 %v4603_v9, %v4237_v13 }
 0x50e   : > { %v4042_v33 = vpop.f32.mrf.mxu2  ;;  %v4131_v10 = vpop.f32.mrf.mxu3 }
 0x50f   : > { %v4638_v55 = vmul.f32 %v7223_v22, %v4622_v4 }
 0x511   : > { %v4654_v59 = vadd.f32 %v7231_v11, %v4638_v55 }
 0x513   : > { %v4670_v3 = vmax.f32 %v4654_v59, 0.0 }
 0x515   : > { %v4686_v34 = vmax.f32 %v2965_v44, %v4670_v3 }
 0x517   : > { %v4694_v24 = vmax.f32 %v4685_v57, %v4686_v34 }
 0x519   : > { %v6064_v49 = vpack.c.bf16 %v4694_v24, %v4693_v7 }
 0x51b   : > { %6068 = vst [vmem:[%s7305_s29 + $0x18] sm:$0xff] %v6064_v49  }
 0x51c PF: > { %s15_s18 = sadd.s32 1, %s6136_s18  }
 0x51d   : > { %p12_p4 = scmp.ge.s32.totalorder %s15_s18, 4  }
 0x51f   :  { %14 = sbr.rel (!%p12_p4) target bundleno = 1 (0x1), region = 81 }

</bundles_post_ra>
